<compile_context>
chip_gen: v7x
topology: tpu7x:2x2x1
jax: 0.10.0
libtpu: 0.0.40
codegen_flags: <defaults>
</compile_context>

<pallas_src>
import functools

import jax
import jax.numpy as jnp
from jax.experimental import pallas as pl
from jax.experimental.pallas import tpu as pltpu


def _conv_bn_relu_kernel(x_ref, w_ref, shift_ref, o_ref, *,
                         ksize_h, ksize_w, th, wo, relu):
    # x_ref:     (1, Hp_pad, Wp, C)  bf16 padded NHWC image (resident across row tiles)
    # w_ref:     (KH*KW, C, O_pad)   bf16 conv weight with BN scale folded in
    # shift_ref: (1, O_pad)          f32 folded BN shift
    # o_ref:     (1, th, Wo, O_pad)  f32 output row-band
    j = pl.program_id(1)
    row0 = j * th
    o_pad = o_ref.shape[-1]
    c_in = x_ref.shape[-1]

    acc = jnp.zeros((th * wo, o_pad), jnp.float32)
    # Unrolled over the (small, static) KH*KW taps: shifted slab -> MXU dot.
    for r in range(ksize_h):
        for c in range(ksize_w):
            slab = x_ref[0, pl.ds(row0 + r, th), c:c + wo, :]      # (th, Wo, C)
            slab2d = slab.reshape(th * wo, c_in)                   # (th*Wo, C)
            acc = acc + jnp.dot(slab2d, w_ref[r * ksize_w + c],
                                preferred_element_type=jnp.float32)

    y = acc + shift_ref[...]            # BN scale already folded into weights
    if relu:
        y = jnp.maximum(y, 0.0)
    o_ref[...] = y.reshape(1, th, wo, o_pad).astype(o_ref.dtype)


def basic_conv_forward(x, weight, gamma, beta, running_mean, running_var, *,
                       stride=1, padding=1, eps=1e-5, relu=True, bn=True,
                       th=None):
    """x: (N, C, H, W) float32; weight: (O, C, KH, KW). Returns (N, O, Ho, Wo) f32."""
    N, C, H, W = x.shape
    O, Cw, KH, KW = weight.shape
    assert Cw == C
    if stride != 1:
        # TODO(synk): stride != 1 not supported in the fused Pallas path.
        raise NotImplementedError("fused Pallas BasicConv supports stride=1 only")

    Hp = H + 2 * padding
    Wp = W + 2 * padding
    Ho = Hp - KH + 1
    Wo = Wp - KW + 1

    # Row-band size: aim for ~1024 output rows of the patch-matmul per step.
    if th is None:
        th = max(1, min(Ho, max(8, 1024 // max(1, Wo))))
    n_row = pl.cdiv(Ho, th)
    Ho_pad = n_row * th
    Hp_pad = Ho_pad + KH - 1

    O_pad = pl.cdiv(O, 128) * 128

    # ---- input: NCHW -> NHWC, zero-pad spatially (+ bottom rows for tiling), bf16 ----
    # TODO(synk): an NHWC end-to-end pipeline would remove this transpose pass.
    x_nhwc = jnp.transpose(x, (0, 2, 3, 1)).astype(jnp.float32)
    xp = jnp.pad(x_nhwc, ((0, 0),
                          (padding, padding + (Hp_pad - Hp)),
                          (padding, padding),
                          (0, 0))).astype(jnp.bfloat16)

    # ---- fold BN (inference) into a per-output-channel scale / shift ----
    if bn:
        scale = gamma / jnp.sqrt(running_var + eps)
        shift = beta - running_mean * scale
    else:
        scale = jnp.ones((O,), jnp.float32)
        shift = jnp.zeros((O,), jnp.float32)

    # weight (O,C,KH,KW) -> (KH,KW,C,O), scale folded, padded to O_pad, bf16
    w = jnp.transpose(weight, (2, 3, 1, 0)).astype(jnp.float32) * scale[None, None, None, :]
    w = w.reshape(KH * KW, C, O)
    w = jnp.pad(w, ((0, 0), (0, 0), (0, O_pad - O))).astype(jnp.bfloat16)
    shift_p = jnp.pad(shift.astype(jnp.float32), (0, O_pad - O)).reshape(1, O_pad)

    kernel = functools.partial(_conv_bn_relu_kernel,
                               ksize_h=KH, ksize_w=KW, th=th, wo=Wo, relu=relu)

    out = pl.pallas_call(
        kernel,
        out_shape=jax.ShapeDtypeStruct((N, Ho_pad, Wo, O_pad), jnp.float32),
        grid_spec=pltpu.PrefetchScalarGridSpec(
            num_scalar_prefetch=0,
            grid=(N, n_row),
            in_specs=[
                # full padded image per batch element; block index ignores the
                # row-tile axis so it stays resident across row bands.
                pl.BlockSpec((1, Hp_pad, Wp, C), lambda n, j: (n, 0, 0, 0)),
                pl.BlockSpec((KH * KW, C, O_pad), lambda n, j: (0, 0, 0)),
                pl.BlockSpec((1, O_pad), lambda n, j: (0, 0)),
            ],
            out_specs=pl.BlockSpec((1, th, Wo, O_pad), lambda n, j: (n, j, 0, 0)),
        ),
        compiler_params=pltpu.CompilerParams(
            dimension_semantics=("parallel", "parallel"),
            vmem_limit_bytes=48 * 1024 * 1024,
        ),
    )(xp, w, shift_p)

    out = out[:, :Ho, :, :O]
    # TODO(synk): consumers that accept NHWC could skip this transpose back to NCHW.
    return jnp.transpose(out, (0, 3, 1, 2))


if __name__ == "__main__":
    key = jax.random.PRNGKey(0)
    k_x, k_w, k_g, k_b, k_m, k_v = jax.random.split(key, 6)

    N, C_in, H, W = 2, 4, 16, 16
    C_out, KH, KW = 8, 3, 3

    x = jax.random.normal(k_x, (N, C_in, H, W), jnp.float32)
    weight = jax.random.normal(k_w, (C_out, C_in, KH, KW), jnp.float32) * 0.1
    gamma = 1.0 + 0.1 * jax.random.normal(k_g, (C_out,), jnp.float32)
    beta = 0.1 * jax.random.normal(k_b, (C_out,), jnp.float32)
    running_mean = 0.1 * jax.random.normal(k_m, (C_out,), jnp.float32)
    running_var = jnp.abs(jax.random.normal(k_v, (C_out,), jnp.float32)) + 0.5

    out = basic_conv_forward(x, weight, gamma, beta, running_mean, running_var,
                             stride=1, padding=1, relu=True, bn=True)
    jax.block_until_ready(out)

    # sanity check against a pure-JAX f32 reference (kernel uses bf16 inputs,
    # f32 accumulation -> loose-but-meaningful tolerance)
    ref = jax.lax.conv_general_dilated(
        x, weight, window_strides=(1, 1), padding=((1, 1), (1, 1)),
        dimension_numbers=("NCHW", "OIHW", "NCHW"))
    scale = gamma / jnp.sqrt(running_var + 1e-5)
    shift = beta - running_mean * scale
    ref = jnp.maximum(ref * scale[None, :, None, None]
                      + shift[None, :, None, None], 0.0)
    assert out.shape == ref.shape
    err = float(jnp.max(jnp.abs(out - ref)))
    assert jnp.allclose(out, ref, atol=5e-2, rtol=5e-2), err

    print("KERNEL_OK")
</pallas_src>

<mosaic_0001>
module attributes {stable_mosaic.version = 11 : i64} {
  func.func @_conv_bn_relu_kernel(%arg0: i32, %arg1: i32, %arg2: memref<1x18x18x4xbf16, #tpu.memory_space<vmem>>, %arg3: memref<9x4x128xbf16, #tpu.memory_space<vmem>>, %arg4: memref<1x128xf32, #tpu.memory_space<vmem>>, %arg5: memref<1x16x16x128xf32, #tpu.memory_space<vmem>>) attributes {dimension_semantics = [#tpu.dimension_semantics<parallel>, #tpu.dimension_semantics<parallel>], iteration_bounds = array<i64: 2, 1>, scalar_prefetch = 0 : i64, scratch_operands = 0 : i64, tpu.core_type = #tpu.core_type<tc>, window_params = [{transform_indices = @transform_0, window_bounds = array<i64: 1, 18, 18, 4>}, {pipeline_mode = #tpu.pipeline_mode<synchronous>, transform_indices = @transform_1, window_bounds = array<i64: 9, 4, 128>}, {pipeline_mode = #tpu.pipeline_mode<synchronous>, transform_indices = @transform_2, window_bounds = array<i64: 1, 128>}, {transform_indices = @transform_3, window_bounds = array<i64: 1, 16, 16, 128>}]} {
    %c16_i32 = arith.constant 16 : i32
    %0 = arith.muli %arg1, %c16_i32 : i32
    %cst = arith.constant 0.000000e+00 : f32
    %1 = vector.broadcast %cst : f32 to vector<256x128xf32>
    %c0_i32 = arith.constant 0 : i32
    %2 = arith.addi %0, %c0_i32 : i32
    %c0 = arith.constant 0 : index
    %3 = arith.index_cast %2 : i32 to index
    %c0_0 = arith.constant 0 : index
    %c0_1 = arith.constant 0 : index
    %4 = vector.load %arg2[%c0, %3, %c0_0, %c0_1] : memref<1x18x18x4xbf16, #tpu.memory_space<vmem>>, vector<1x16x16x4xbf16>
    %5 = vector.shape_cast %4 : vector<1x16x16x4xbf16> to vector<16x16x4xbf16>
    %6 = vector.shape_cast %5 : vector<16x16x4xbf16> to vector<256x4xbf16>
    %c0_2 = arith.constant 0 : index
    %c0_3 = arith.constant 0 : index
    %c0_4 = arith.constant 0 : index
    %7 = vector.load %arg3[%c0_2, %c0_3, %c0_4] : memref<9x4x128xbf16, #tpu.memory_space<vmem>>, vector<1x4x128xbf16>
    %8 = vector.shape_cast %7 : vector<1x4x128xbf16> to vector<4x128xbf16>
    %cst_5 = arith.constant dense<0.000000e+00> : vector<256x128xf32>
    %9 = tpu.matmul %6, %8, %cst_5 {dimension_numbers = #tpu.dot_dimension_numbers<[1], [0], [0], [1], [0, 0, 1, 1], [], []>} : vector<256x4xbf16>, vector<4x128xbf16>, vector<256x128xf32> -> vector<256x128xf32>
    %10 = arith.addf %1, %9 : vector<256x128xf32>
    %c0_i32_6 = arith.constant 0 : i32
    %11 = arith.addi %0, %c0_i32_6 : i32
    %c0_7 = arith.constant 0 : index
    %12 = arith.index_cast %11 : i32 to index
    %c1 = arith.constant 1 : index
    %c0_8 = arith.constant 0 : index
    %13 = vector.load %arg2[%c0_7, %12, %c1, %c0_8] : memref<1x18x18x4xbf16, #tpu.memory_space<vmem>>, vector<1x16x16x4xbf16>
    %14 = vector.shape_cast %13 : vector<1x16x16x4xbf16> to vector<16x16x4xbf16>
    %15 = vector.shape_cast %14 : vector<16x16x4xbf16> to vector<256x4xbf16>
    %c1_9 = arith.constant 1 : index
    %c0_10 = arith.constant 0 : index
    %c0_11 = arith.constant 0 : index
    %16 = vector.load %arg3[%c1_9, %c0_10, %c0_11] : memref<9x4x128xbf16, #tpu.memory_space<vmem>>, vector<1x4x128xbf16>
    %17 = vector.shape_cast %16 : vector<1x4x128xbf16> to vector<4x128xbf16>
    %cst_12 = arith.constant dense<0.000000e+00> : vector<256x128xf32>
    %18 = tpu.matmul %15, %17, %cst_12 {dimension_numbers = #tpu.dot_dimension_numbers<[1], [0], [0], [1], [0, 0, 1, 1], [], []>} : vector<256x4xbf16>, vector<4x128xbf16>, vector<256x128xf32> -> vector<256x128xf32>
    %19 = arith.addf %10, %18 : vector<256x128xf32>
    %c0_i32_13 = arith.constant 0 : i32
    %20 = arith.addi %0, %c0_i32_13 : i32
    %c0_14 = arith.constant 0 : index
    %21 = arith.index_cast %20 : i32 to index
    %c2 = arith.constant 2 : index
    %c0_15 = arith.constant 0 : index
    %22 = vector.load %arg2[%c0_14, %21, %c2, %c0_15] : memref<1x18x18x4xbf16, #tpu.memory_space<vmem>>, vector<1x16x16x4xbf16>
    %23 = vector.shape_cast %22 : vector<1x16x16x4xbf16> to vector<16x16x4xbf16>
    %24 = vector.shape_cast %23 : vector<16x16x4xbf16> to vector<256x4xbf16>
    %c2_16 = arith.constant 2 : index
    %c0_17 = arith.constant 0 : index
    %c0_18 = arith.constant 0 : index
    %25 = vector.load %arg3[%c2_16, %c0_17, %c0_18] : memref<9x4x128xbf16, #tpu.memory_space<vmem>>, vector<1x4x128xbf16>
    %26 = vector.shape_cast %25 : vector<1x4x128xbf16> to vector<4x128xbf16>
    %cst_19 = arith.constant dense<0.000000e+00> : vector<256x128xf32>
    %27 = tpu.matmul %24, %26, %cst_19 {dimension_numbers = #tpu.dot_dimension_numbers<[1], [0], [0], [1], [0, 0, 1, 1], [], []>} : vector<256x4xbf16>, vector<4x128xbf16>, vector<256x128xf32> -> vector<256x128xf32>
    %28 = arith.addf %19, %27 : vector<256x128xf32>
    %c1_i32 = arith.constant 1 : i32
    %29 = arith.addi %0, %c1_i32 : i32
    %c0_20 = arith.constant 0 : index
    %30 = arith.index_cast %29 : i32 to index
    %c0_21 = arith.constant 0 : index
    %c0_22 = arith.constant 0 : index
    %31 = vector.load %arg2[%c0_20, %30, %c0_21, %c0_22] : memref<1x18x18x4xbf16, #tpu.memory_space<vmem>>, vector<1x16x16x4xbf16>
    %32 = vector.shape_cast %31 : vector<1x16x16x4xbf16> to vector<16x16x4xbf16>
    %33 = vector.shape_cast %32 : vector<16x16x4xbf16> to vector<256x4xbf16>
    %c3 = arith.constant 3 : index
    %c0_23 = arith.constant 0 : index
    %c0_24 = arith.constant 0 : index
    %34 = vector.load %arg3[%c3, %c0_23, %c0_24] : memref<9x4x128xbf16, #tpu.memory_space<vmem>>, vector<1x4x128xbf16>
    %35 = vector.shape_cast %34 : vector<1x4x128xbf16> to vector<4x128xbf16>
    %cst_25 = arith.constant dense<0.000000e+00> : vector<256x128xf32>
    %36 = tpu.matmul %33, %35, %cst_25 {dimension_numbers = #tpu.dot_dimension_numbers<[1], [0], [0], [1], [0, 0, 1, 1], [], []>} : vector<256x4xbf16>, vector<4x128xbf16>, vector<256x128xf32> -> vector<256x128xf32>
    %37 = arith.addf %28, %36 : vector<256x128xf32>
    %c1_i32_26 = arith.constant 1 : i32
    %38 = arith.addi %0, %c1_i32_26 : i32
    %c0_27 = arith.constant 0 : index
    %39 = arith.index_cast %38 : i32 to index
    %c1_28 = arith.constant 1 : index
    %c0_29 = arith.constant 0 : index
    %40 = vector.load %arg2[%c0_27, %39, %c1_28, %c0_29] : memref<1x18x18x4xbf16, #tpu.memory_space<vmem>>, vector<1x16x16x4xbf16>
    %41 = vector.shape_cast %40 : vector<1x16x16x4xbf16> to vector<16x16x4xbf16>
    %42 = vector.shape_cast %41 : vector<16x16x4xbf16> to vector<256x4xbf16>
    %c4 = arith.constant 4 : index
    %c0_30 = arith.constant 0 : index
    %c0_31 = arith.constant 0 : index
    %43 = vector.load %arg3[%c4, %c0_30, %c0_31] : memref<9x4x128xbf16, #tpu.memory_space<vmem>>, vector<1x4x128xbf16>
    %44 = vector.shape_cast %43 : vector<1x4x128xbf16> to vector<4x128xbf16>
    %cst_32 = arith.constant dense<0.000000e+00> : vector<256x128xf32>
    %45 = tpu.matmul %42, %44, %cst_32 {dimension_numbers = #tpu.dot_dimension_numbers<[1], [0], [0], [1], [0, 0, 1, 1], [], []>} : vector<256x4xbf16>, vector<4x128xbf16>, vector<256x128xf32> -> vector<256x128xf32>
    %46 = arith.addf %37, %45 : vector<256x128xf32>
    %c1_i32_33 = arith.constant 1 : i32
    %47 = arith.addi %0, %c1_i32_33 : i32
    %c0_34 = arith.constant 0 : index
    %48 = arith.index_cast %47 : i32 to index
    %c2_35 = arith.constant 2 : index
    %c0_36 = arith.constant 0 : index
    %49 = vector.load %arg2[%c0_34, %48, %c2_35, %c0_36] : memref<1x18x18x4xbf16, #tpu.memory_space<vmem>>, vector<1x16x16x4xbf16>
    %50 = vector.shape_cast %49 : vector<1x16x16x4xbf16> to vector<16x16x4xbf16>
    %51 = vector.shape_cast %50 : vector<16x16x4xbf16> to vector<256x4xbf16>
    %c5 = arith.constant 5 : index
    %c0_37 = arith.constant 0 : index
    %c0_38 = arith.constant 0 : index
    %52 = vector.load %arg3[%c5, %c0_37, %c0_38] : memref<9x4x128xbf16, #tpu.memory_space<vmem>>, vector<1x4x128xbf16>
    %53 = vector.shape_cast %52 : vector<1x4x128xbf16> to vector<4x128xbf16>
    %cst_39 = arith.constant dense<0.000000e+00> : vector<256x128xf32>
    %54 = tpu.matmul %51, %53, %cst_39 {dimension_numbers = #tpu.dot_dimension_numbers<[1], [0], [0], [1], [0, 0, 1, 1], [], []>} : vector<256x4xbf16>, vector<4x128xbf16>, vector<256x128xf32> -> vector<256x128xf32>
    %55 = arith.addf %46, %54 : vector<256x128xf32>
    %c2_i32 = arith.constant 2 : i32
    %56 = arith.addi %0, %c2_i32 : i32
    %c0_40 = arith.constant 0 : index
    %57 = arith.index_cast %56 : i32 to index
    %c0_41 = arith.constant 0 : index
    %c0_42 = arith.constant 0 : index
    %58 = vector.load %arg2[%c0_40, %57, %c0_41, %c0_42] : memref<1x18x18x4xbf16, #tpu.memory_space<vmem>>, vector<1x16x16x4xbf16>
    %59 = vector.shape_cast %58 : vector<1x16x16x4xbf16> to vector<16x16x4xbf16>
    %60 = vector.shape_cast %59 : vector<16x16x4xbf16> to vector<256x4xbf16>
    %c6 = arith.constant 6 : index
    %c0_43 = arith.constant 0 : index
    %c0_44 = arith.constant 0 : index
    %61 = vector.load %arg3[%c6, %c0_43, %c0_44] : memref<9x4x128xbf16, #tpu.memory_space<vmem>>, vector<1x4x128xbf16>
    %62 = vector.shape_cast %61 : vector<1x4x128xbf16> to vector<4x128xbf16>
    %cst_45 = arith.constant dense<0.000000e+00> : vector<256x128xf32>
    %63 = tpu.matmul %60, %62, %cst_45 {dimension_numbers = #tpu.dot_dimension_numbers<[1], [0], [0], [1], [0, 0, 1, 1], [], []>} : vector<256x4xbf16>, vector<4x128xbf16>, vector<256x128xf32> -> vector<256x128xf32>
    %64 = arith.addf %55, %63 : vector<256x128xf32>
    %c2_i32_46 = arith.constant 2 : i32
    %65 = arith.addi %0, %c2_i32_46 : i32
    %c0_47 = arith.constant 0 : index
    %66 = arith.index_cast %65 : i32 to index
    %c1_48 = arith.constant 1 : index
    %c0_49 = arith.constant 0 : index
    %67 = vector.load %arg2[%c0_47, %66, %c1_48, %c0_49] : memref<1x18x18x4xbf16, #tpu.memory_space<vmem>>, vector<1x16x16x4xbf16>
    %68 = vector.shape_cast %67 : vector<1x16x16x4xbf16> to vector<16x16x4xbf16>
    %69 = vector.shape_cast %68 : vector<16x16x4xbf16> to vector<256x4xbf16>
    %c7 = arith.constant 7 : index
    %c0_50 = arith.constant 0 : index
    %c0_51 = arith.constant 0 : index
    %70 = vector.load %arg3[%c7, %c0_50, %c0_51] : memref<9x4x128xbf16, #tpu.memory_space<vmem>>, vector<1x4x128xbf16>
    %71 = vector.shape_cast %70 : vector<1x4x128xbf16> to vector<4x128xbf16>
    %cst_52 = arith.constant dense<0.000000e+00> : vector<256x128xf32>
    %72 = tpu.matmul %69, %71, %cst_52 {dimension_numbers = #tpu.dot_dimension_numbers<[1], [0], [0], [1], [0, 0, 1, 1], [], []>} : vector<256x4xbf16>, vector<4x128xbf16>, vector<256x128xf32> -> vector<256x128xf32>
    %73 = arith.addf %64, %72 : vector<256x128xf32>
    %c2_i32_53 = arith.constant 2 : i32
    %74 = arith.addi %0, %c2_i32_53 : i32
    %c0_54 = arith.constant 0 : index
    %75 = arith.index_cast %74 : i32 to index
    %c2_55 = arith.constant 2 : index
    %c0_56 = arith.constant 0 : index
    %76 = vector.load %arg2[%c0_54, %75, %c2_55, %c0_56] : memref<1x18x18x4xbf16, #tpu.memory_space<vmem>>, vector<1x16x16x4xbf16>
    %77 = vector.shape_cast %76 : vector<1x16x16x4xbf16> to vector<16x16x4xbf16>
    %78 = vector.shape_cast %77 : vector<16x16x4xbf16> to vector<256x4xbf16>
    %c8 = arith.constant 8 : index
    %c0_57 = arith.constant 0 : index
    %c0_58 = arith.constant 0 : index
    %79 = vector.load %arg3[%c8, %c0_57, %c0_58] : memref<9x4x128xbf16, #tpu.memory_space<vmem>>, vector<1x4x128xbf16>
    %80 = vector.shape_cast %79 : vector<1x4x128xbf16> to vector<4x128xbf16>
    %cst_59 = arith.constant dense<0.000000e+00> : vector<256x128xf32>
    %81 = tpu.matmul %78, %80, %cst_59 {dimension_numbers = #tpu.dot_dimension_numbers<[1], [0], [0], [1], [0, 0, 1, 1], [], []>} : vector<256x4xbf16>, vector<4x128xbf16>, vector<256x128xf32> -> vector<256x128xf32>
    %82 = arith.addf %73, %81 : vector<256x128xf32>
    %c0_60 = arith.constant 0 : index
    %c0_61 = arith.constant 0 : index
    %83 = vector.load %arg4[%c0_60, %c0_61] : memref<1x128xf32, #tpu.memory_space<vmem>>, vector<1x128xf32>
    %84 = vector.broadcast %83 : vector<1x128xf32> to vector<256x128xf32>
    %85 = arith.addf %82, %84 : vector<256x128xf32>
    %cst_62 = arith.constant 0.000000e+00 : f32
    %86 = vector.broadcast %cst_62 : f32 to vector<256x128xf32>
    %87 = arith.maximumf %85, %86 : vector<256x128xf32>
    %88 = vector.shape_cast %87 : vector<256x128xf32> to vector<1x16x16x128xf32>
    %c0_63 = arith.constant 0 : index
    %c0_64 = arith.constant 0 : index
    %c0_65 = arith.constant 0 : index
    %c0_66 = arith.constant 0 : index
    %89 = vector.load %arg5[%c0_63, %c0_64, %c0_65, %c0_66] : memref<1x16x16x128xf32, #tpu.memory_space<vmem>>, vector<1x16x16x128xf32>
    tpu.vector_store %arg5[%c0_63, %c0_64, %c0_65, %c0_66], %88 {strides = array<i32>} : memref<1x16x16x128xf32, #tpu.memory_space<vmem>>, vector<1x16x16x128xf32>,
    return
  }
  func.func @transform_0(%arg0: i32, %arg1: i32) -> (i32, i32, i32, i32) {
    %c0_i32 = arith.constant 0 : i32
    %c0_i32_0 = arith.constant 0 : i32
    %c0_i32_1 = arith.constant 0 : i32
    %c0_i32_2 = arith.constant 0 : i32
    return %arg0, %c0_i32, %c0_i32_0, %c0_i32_1 : i32, i32, i32, i32
  }
  func.func @transform_1(%arg0: i32, %arg1: i32) -> (i32, i32, i32) {
    %c0_i32 = arith.constant 0 : i32
    %c0_i32_0 = arith.constant 0 : i32
    %c0_i32_1 = arith.constant 0 : i32
    %c0_i32_2 = arith.constant 0 : i32
    return %c0_i32, %c0_i32_0, %c0_i32_1 : i32, i32, i32
  }
  func.func @transform_2(%arg0: i32, %arg1: i32) -> (i32, i32) {
    %c0_i32 = arith.constant 0 : i32
    %c0_i32_0 = arith.constant 0 : i32
    %c0_i32_1 = arith.constant 0 : i32
    return %c0_i32, %c0_i32_0 : i32, i32
  }
  func.func @transform_3(%arg0: i32, %arg1: i32) -> (i32, i32, i32, i32) {
    %c0_i32 = arith.constant 0 : i32
    %c0_i32_0 = arith.constant 0 : i32
    %c0_i32_1 = arith.constant 0 : i32
    return %arg0, %arg1, %c0_i32, %c0_i32_0 : i32, i32, i32, i32
  }
}

</mosaic_0001>

<bundles_post_ra>
// kernel: tpu_custom_call.1
= control target key start
LH: loop header
LB: loop body
LE: loop exit
PB: predicated region body
PF: predicated region fallthrough
CT: control target
= control target key end

     0   :  { %8 = vsyncpa [#allocation3], 0  ;;  %s8400_s0 = inlined_call_operand.vmem [shape: bf16[2,18,18,4], index: 0, kind: input, shape index: {}]   ;;  %s8401_s1 = inlined_call_operand.vmem [shape: bf16[9,4,128], index: 1, kind: input, shape index: {}]   ;;  %s8402_s2 = inlined_call_operand.vmem [shape: f32[1,128], index: 2, kind: input, shape index: {}]   ;;  %s8403_s3 = inlined_call_operand.hbm [shape: f32[2,16,16,128], index: 3, kind: output, shape index: {}]  }
   0x1   :  { %10 = vsyncpa [#allocation3 + $0x1], 0  ;;  %s6500_s12 = smov 0   ;;  %s6502_s13 = smov 0  }
   0x2   :  { %s6504_s14 = smov 0   ;;  %s6506_s15 = smov 0  }
   0x3   :  { %s6508_s16 = smov 0   ;;  %s6510_s17 = smov 0  }
   0x4 LB: > { %s4957_s18 = sadd.s32 4294967295, %s6475_s17   ;;  %s4958_s19 = sadd.s32 4294967294, %s6475_s17   ;;  %s6475_s17 = sphi %s6510_s17, %s16_s17   ;;  %s6471_s16 = sphi %s6508_s16, %s8477_s16   ;;  %s6467_s15 = sphi %s6506_s15, %s8476_s15   ;;  %s6463_s14 = sphi %s6504_s14, %s8475_s14   ;;  %s6459_s13 = sphi %s6502_s13, %s8474_s13   ;;  %s6455_s12 = sphi %s6500_s12, %s8473_s12  }
   0x5   : > { %s28_s20 = sadd.s32 1, %s6471_s16  ;;  %s105_s21 = sadd.s32 1, %s6463_s14 }
   0x6   : > { %p30_p0 = scmp.ge.s32.totalorder %s28_s20, 2  ;;  %p115_p1 = scmp.ne.s32.totalorder %s6463_s14, %s6459_s13 }
   0x7   : > { %p116_p2 = scmp.eq.s32.totalorder %s4957_s18, 1  ;;  %p121_p3 = scmp.ne.s32.totalorder %s6459_s13, %s6455_s12 }
   0x8   : > { %s8479_s20 = smov (%p30_p0, %s28_s20), 0  ;;  %p122_p5 = scmp.eq.s32.totalorder %s4958_s19, 1 }
   0x9   : > { %p6540_p4 = por %p116_p2, %p115_p1  ;;  %s100_s23 = ssub.s32 %s6471_s16, %s8479_s20 }
   0xa   : > { %p4961_p6 = scmp.ge.s32.totalorder %s6475_s17, 1  ;;  %p103_p7 = scmp.eq.s32.totalorder %s100_s23, 0 }
   0xb   : > { %p6547_p8 = por %p122_p5, %p121_p3  ;;  %p154_p9 = scmp.lt.s32.totalorder %s6475_s17, 3 }
   0xc   : > { %s6553_s25 = scalar_select %p103_p7, %s6463_s14, %s105_s21  }
   0xd   : > { %p155_p10 = pnand %p4961_p6, %p154_p9 }
   0xf   : > { %158 = sbr.rel (%p155_p10) target bundleno = 611 (0x263), region = 32 }
  0x16   : > { %v4964_v0 = vld [vmem:[%s8401_s1 + $0x2] sm:$0x3]  ;;  %vm724_vm0 = vcmask 1041408   ;;  %v5191_v1 = vld [vmem:[%s8401_s1 + $0x8] sm:$0x3]  ;;  %p178_p11 = scmp.lt.s32.totalorder %s6467_s15, 1 }
  0x17   : > { %6224 = vmatprep.subr.msk.bf16.mxu1 %vm724_vm0, %v4964_v0  ;;  %6228 = vmatprep.subr.msk.bf16.mxu0 %vm724_vm0, %v5191_v1  ;;  %v726_v2 = vsel %vm724_vm0, %v4964_v0, 0  ;;  %v6566_v3 = vsel %vm724_vm0, %v5191_v1, 0  ;;  %v221_v4 = vld [vmem:[%s8401_s1] sm:$0x3]  ;;  %v5256_v5 = vld [vmem:[%s8401_s1 + $0xa] sm:$0x3] }
  0x18   : > { %8419 = vst [vmem:[#allocation5_spill] sm:$0xff] %v6566_v3  ;;  %5661 = vmatpush3.bf16.msra.mxu1 %v726_v2  ;;  %5797 = vmatpush3.bf16.msra.mxu0 %v6566_v3  ;;  %s179_s30 = scalar_select %p178_p11, %s6467_s15, 1  ;;  %vm238_vm1 = vsmask.f32 3328  ;;  %vm239_vm2 = vsmask.f32 7440 }
  0x19   : > { %6225 = vmatprep.subr.msk.bf16.mxu1 %vm724_vm0, %v221_v4  ;;  %6230 = vmatprep.subr.msk.bf16.mxu0 %vm724_vm0, %v5256_v5  ;;  %vm675_vm3 = vcmask 31744   ;;  %v6594_v17 = vsel %vm724_vm0, %v221_v4, 0  ;;  %v6600_v26 = vld [vmem:[%s8401_s1 + $0xc] sm:$0x3]  ;;  %vm6607_vm4 = vmor %vm238_vm1, %vm239_vm2  ;;  %v6613_v37 = vsel %vm724_vm0, %v5256_v5, 0  ;;  %vm1229_vm5 = vcmask 1042432  }
  0x1a   : > { %s6234_s8 = smul.u32 216, %s179_s30  ;;  %v6617_v41 = vsel %vm724_vm0, %v6600_v26, 0  ;;  %vm1230_vm6 = vcmask 1046532   ;;  %s175_s9 = sand.u32 1, %s6459_s13  }
  0x1b   : > { %vm6833_vm7 = vmor %vm1229_vm5, %vm1230_vm6  ;;  %s4962_s18 = sshll.u32 %s175_s9, 8  ;;  %s5506_s21 = sshll.u32 %s6467_s15, 12 }
  0x1c   : > { %s6581_s11 = scalar_lea.vmem %s8400_s0, %s6234_s8  ;;  %s8277_s19 = scalar_lea.vmem [#allocation2], %s4962_s18 }
  0x1d   : > { %v189_v6 = vld [vmem:[%s6581_s11] sm:$0xf]  ;;  %v190_v7 = vld [vmem:[%s6581_s11 + $0x4] sm:$0xf]  ;;  %v222_v8 = vld [vmem:[%s6581_s11 + $0x8] sm:$0x1]  ;;  %s8345_s28 = scalar_lea.hbm %s8403_s3, %s5506_s21 }
  0x1e   : > { %v242_v9 = vshrl.u32 %v189_v6, 16  ;;  %v245_v10 = vshll.u32 %v189_v6, 16  ;;  %v251_v11 = vshll.u32 %v190_v7, 16  ;;  %v255_v12 = vshrl.u32 %v190_v7, 16  ;;  %v5143_v13 = vld [vmem:[%s6581_s11 + $0xc] sm:$0xf] }
  0x1f   : > { %v261_v14 = vshll.u32 %v222_v8, 16  ;;  %v6588_v15 = vld [vmem:[%s6581_s11 + $0x10] sm:$0xf]  ;;  %v6591_v16 = vld [vmem:[%s6581_s11 + $0x14] sm:$0x1]  ;;  %v2049_v23 = vshrl.u32 %v5143_v13, 16 }
  0x20   : > { %v244_v18 = vrot.slane %v242_v9, 4  ;;  %v247_v19 = vrot.slane %v245_v10, 5  ;;  %v253_v20 = vrot.slane %v251_v11, 5  ;;  %v257_v21 = vrot.slane %v255_v12, 4  ;;  %v191_v31 = vld [vmem:[%s6581_s11 + $0xc] sm:$0xf] }
  0x21   : > { %v263_v22 = vrot.slane %v261_v14, 5  ;;  %v2052_v24 = vshll.u32 %v5143_v13, 16  ;;  %v2058_v25 = vshll.u32 %v6588_v15, 16  ;;  %v2062_v29 = vshrl.u32 %v6588_v15, 16  ;;  %v192_v36 = vld [vmem:[%s6581_s11 + $0x10] sm:$0xf] }
  0x22   : > { %v248_v27 = vor.u32 %v247_v19, %v244_v18  ;;  %v258_v28 = vor.u32 %v257_v21, %v253_v20  ;;  %v2068_v30 = vshll.u32 %v6591_v16, 16  ;;  %v2051_v33 = vrot.slane %v2049_v23, 4  ;;  %v223_v44 = vld [vmem:[%s6581_s11 + $0x14] sm:$0x1]  ;;  %v5146_v55 = vld [vmem:[%s6581_s11 + $0x18] sm:$0xf] }
  0x23   : > { %v2054_v34 = vrot.slane %v2052_v24, 5  ;;  %v2060_v35 = vrot.slane %v2058_v25, 5  ;;  %v2064_v40 = vrot.slane %v2062_v29, 4  ;;  %v266_v45 = vshrl.u32 %v191_v31, 16  ;;  %v6626_v60 = vld [vmem:[%s6581_s11 + $0x1c] sm:$0xf] }
  0x24   : > { %v249_v38 = vrot.slane %v248_v27, 4  ;;  %v259_v39 = vrot.slane %v258_v28, 4  ;;  %v2070_v43 = vrot.slane %v2068_v30, 5  ;;  %v269_v46 = vshll.u32 %v191_v31, 16  ;;  %v6634_v1 = vld [vmem:[%s6581_s11 + $0x20] sm:$0x1] }
  0x25   : > { %v2055_v42 = vor.u32 %v2054_v34, %v2051_v33  ;;  %v2065_v49 = vor.u32 %v2064_v40, %v2060_v35  ;;  %v275_v50 = vshll.u32 %v192_v36, 16  ;;  %v268_v53 = vrot.slane %v266_v45, 4  ;;  %v193_v18 = vld [vmem:[%s6581_s11 + $0x18] sm:$0xf]  ;;  %v194_v23 = vld [vmem:[%s6581_s11 + $0x1c] sm:$0xf] }
  0x26   : > { %v254_v47 = vsel %vm6607_vm4, %v249_v38, %v253_v20  ;;  %v264_v48 = vsel %vm6607_vm4, %v259_v39, %v263_v22  ;;  %v271_v54 = vrot.slane %v269_v46, 5  ;;  %v279_v58 = vshrl.u32 %v192_v36, 16  ;;  %v224_v31 = vld [vmem:[%s6581_s11 + $0x20] sm:$0x1]  ;;  %v5149_v40 = vld [vmem:[%s6581_s11 + $0x24] sm:$0xf] }
  0x27   : > { %v4965_v51 = vcombine.low %v254_v47, %v264_v48  ;;  %v2056_v52 = vrot.slane %v2055_v42, 4  ;;  %v2066_v56 = vrot.slane %v2065_v49, 4  ;;  %v277_v57 = vrot.slane %v275_v50, 5  ;;  %v6657_v46 = vld [vmem:[%s6581_s11 + $0x28] sm:$0xf]  ;;  %s4874_s23 = sshll.u32 %s8277_s19, 4  ;;  %s8347_s23 = int_to_ptr.vmem [resolvable:$true] %s4874_s23 }
  0x28   : > { %v285_v59 = vshll.u32 %v223_v44, 16  ;;  %v2792_v62 = vrot.slane %v6588_v15, 5  ;;  %v2795_v63 = vrot.slane %v6591_v16, 5  ;;  %v272_v0 = vor.u32 %v271_v54, %v268_v53  ;;  %v6666_v54 = vld [vmem:[%s6581_s11 + $0x2c] sm:$0x1]  ;;  %s8354_s15 = scalar_lea.sflag [#allocation3], %s175_s9 }
  0x29   : > { %5662 = vmatprep.mubr.msk.bf16.mxu1 %vm675_vm3, %v4965_v51  ;;  %v2061_v61 = vsel %vm6607_vm4, %v2056_v52, %v2060_v35  ;;  %v2071_v2 = vsel %vm6607_vm4, %v2066_v56, %v2070_v43  ;;  %v281_v4 = vrot.slane %v279_v58, 4  ;;  %v2073_v6 = vshrl.u32 %v5146_v55, 16  ;;  %v5045_v51 = vld [vmem:[%s8401_s1 + $0x4] sm:$0x3]  ;;  %v6866_v16 = vld [vmem:[%s6581_s11 + $0x7c] sm:$0xf] }
  0x2a   : > { %v287_v5 = vrot.slane %v285_v59, 5  ;;  %v5192_v7 = vcombine.low %v2061_v61, %v2071_v2  ;;  %v273_v8 = vrot.slane %v272_v0, 4  ;;  %v2076_v9 = vshll.u32 %v5146_v55, 16  ;;  %v195_v0 = vld [vmem:[%s6581_s11 + $0x24] sm:$0xf]  ;;  %s6397_s29 = scalar_lea.vmem %s8347_s23, 4096 }
  0x2b   : > { %v2082_v10 = vshll.u32 %v6626_v60, 16  ;;  %v282_v11 = vor.u32 %v281_v4, %v277_v57  ;;  %v2075_v12 = vrot.slane %v2073_v6, 4  ;;  %v2086_v13 = vshrl.u32 %v6626_v60, 16  ;;  %p6398_p12 = scmp.ne.s32.totalorder %s8347_s23, %s6397_s29  ;;  %s6477_s30 = smov [#allocation2]  }
  0x2c   : > { %v2092_v14 = vshll.u32 %v6634_v1, 16  ;;  %5798 = vmatprep.mubr.msk.bf16.mxu0 %vm675_vm3, %v5192_v7  ;;  %v278_v19 = vsel %vm6607_vm4, %v273_v8, %v277_v57  ;;  %v2078_v20 = vrot.slane %v2076_v9, 5  ;;  %v2799_v22 = vrot.slane %v6626_v60, 5  ;;  %v196_v7 = vld [vmem:[%s6581_s11 + $0x28] sm:$0xf]  ;;  %s6401_s4 = sshll.u32 %s6477_s30, 4  ;;  %s6402_s4 = int_to_ptr.vmem [resolvable:$false] %s6401_s4 }
  0x2d   : > { %v2084_v21 = vrot.slane %v2082_v10, 5  ;;  %v283_v24 = vrot.slane %v282_v11, 4  ;;  %v2088_v25 = vrot.slane %v2086_v13, 4  ;;  %v2802_v28 = vrot.slane %v6634_v1, 5  ;;  %v225_v13 = vld [vmem:[%s6581_s11 + $0x2c] sm:$0x1]  ;;  %p6399_p13 = pnand %p6398_p12, %p6540_p4  ;;  %p6404_p1 = scmp.lt.s32.totalorder %s8347_s23, %s6402_s4 }
  0x2e   : > { %v2094_v27 = vrot.slane %v2092_v14, 5  ;;  %v2079_v29 = vor.u32 %v2078_v20, %v2075_v12  ;;  %v6650_v30 = vrot.slane %v2799_v22, 4  ;;  %v290_v33 = vshrl.u32 %v193_v18, 16  ;;  %s6403_s5 = scalar_lea.vmem %s6402_s4, 8192 }
  0x2f   : > { %v293_v34 = vshll.u32 %v193_v18, 16  ;;  %v288_v35 = vsel %vm6607_vm4, %v283_v24, %v287_v5  ;;  %v2089_v36 = vor.u32 %v2088_v25, %v2084_v21  ;;  %v299_v38 = vshll.u32 %v194_v23, 16  ;;  %v5152_v24 = vld [vmem:[%s6581_s11 + $0x30] sm:$0xf]  ;;  %p6400_p0 = pneg %p6399_p13  ;;  %p6405_p2 = scmp.lt.s32.totalorder %s6403_s5, %s6397_s29 }
  0x30   : > { %v303_v39 = vshrl.u32 %v194_v23, 16  ;;  %v4966_v42 = vcombine.low %v278_v19, %v288_v35  ;;  %v2080_v43 = vrot.slane %v2079_v29, 4  ;;  %v292_v44 = vrot.slane %v290_v33, 4  ;;  %v6686_v33 = vld [vmem:[%s6581_s11 + $0x34] sm:$0xf] }
  0x31   : > { %v295_v45 = vrot.slane %v293_v34, 5  ;;  %v2090_v47 = vrot.slane %v2089_v36, 4  ;;  %v301_v48 = vrot.slane %v299_v38, 5  ;;  %v309_v50 = vshll.u32 %v224_v31, 16  ;;  %p6406_p3 = por %p6405_p2, %p6404_p1 }
  0x32   : > { %v305_v49 = vrot.slane %v303_v39, 4  ;;  %5663 = vmatmul.mubr.msk.bf16.vlgmr.msra.gmra.mrb[0].mxu1 %vm675_vm3, %v4966_v42  ;;  %v2085_v52 = vsel %vm6607_vm4, %v2080_v43, %v2084_v21  ;;  %v2097_v55 = vshrl.u32 %v5149_v40, 16  ;;  %v2100_v56 = vshll.u32 %v5149_v40, 16  ;;  %v6694_v40 = vld [vmem:[%s6581_s11 + $0x38] sm:$0x1] }
  0x33   : > { %v296_v53 = vor.u32 %v295_v45, %v292_v44  ;;  %5695 = vmatpush3.bf16.msra.mxu1 %v6594_v17  ;;  %v2095_v57 = vsel %vm6607_vm4, %v2090_v47, %v2094_v27  ;;  %v311_v59 = vrot.slane %v309_v50, 5  ;;  %v2106_v61 = vshll.u32 %v6657_v46, 16  ;;  %p6407_p5 = pnand %p6406_p3, %p6400_p0 }
  0x34   : > { %v306_v58 = vor.u32 %v305_v49, %v301_v48  ;;  %v5193_v2 = vcombine.low %v2085_v52, %v2095_v57  ;;  %v2099_v5 = vrot.slane %v2097_v55, 4  ;;  %v2102_v6 = vrot.slane %v2100_v56, 5  ;;  %6226 = vmatprep.subr.msk.bf16.mxu1 %vm724_vm0, %v5045_v51  ;;  %v197_v52 = vld [vmem:[%s6581_s11 + $0x30] sm:$0xf] }
  0x35   : > { %v297_v4 = vrot.slane %v296_v53, 4  ;;  %v2108_v9 = vrot.slane %v2106_v61, 5  ;;  %v2110_v17 = vshrl.u32 %v6657_v46, 16  ;;  %v2116_v10 = vshll.u32 %v6666_v54, 16 }
  0x36   : > { %v307_v8 = vrot.slane %v306_v58, 4  ;;  %5799 = vmatmul.mubr.msk.bf16.vlgmr.msra.gmra.mrb[0].mxu0 %vm675_vm3, %v5193_v2  ;;  %v2103_v12 = vor.u32 %v2102_v6, %v2099_v5  ;;  %v314_v14 = vshrl.u32 %v195_v0, 16  ;;  %v317_v18 = vshll.u32 %v195_v0, 16  ;;  %v198_v58 = vld [vmem:[%s6581_s11 + $0x34] sm:$0xf] }
  0x37   : > { %v302_v11 = vsel %vm6607_vm4, %v297_v4, %v301_v48  ;;  %5831 = vmatpush3.bf16.msra.mxu0 %v6613_v37  ;;  %v2112_v20 = vrot.slane %v2110_v17, 4  ;;  %v2118_v21 = vrot.slane %v2116_v10, 5  ;;  %v323_v23 = vshll.u32 %v196_v7, 16  ;;  %v226_v4 = vld [vmem:[%s6581_s11 + $0x38] sm:$0x1] }
  0x38   : > { %v312_v19 = vsel %vm6607_vm4, %v307_v8, %v311_v59  ;;  %v2104_v27 = vrot.slane %v2103_v12, 4  ;;  %v316_v29 = vrot.slane %v314_v14, 4  ;;  %v319_v31 = vrot.slane %v317_v18, 5  ;;  %6231 = vmatprep.subr.msk.bf16.mxu0 %vm724_vm0, %v6600_v26  ;;  %v5155_v12 = vld [vmem:[%s6581_s11 + $0x3c] sm:$0xf] }
  0x39   : > { %v4967_v25 = vcombine.low %v302_v11, %v312_v19  ;;  %v2113_v34 = vor.u32 %v2112_v20, %v2108_v9  ;;  %v325_v35 = vrot.slane %v323_v23, 5  ;;  %v327_v37 = vshrl.u32 %v196_v7, 16  ;;  %v6711_v20 = vld [vmem:[%s6581_s11 + $0x40] sm:$0xf] }
  0x3a   : > { %v333_v36 = vshll.u32 %v225_v13, 16  ;;  %v2109_v38 = vsel %vm6607_vm4, %v2104_v27, %v2108_v9  ;;  %v320_v39 = vor.u32 %v319_v31, %v316_v29  ;;  %v2121_v42 = vshrl.u32 %v5152_v24, 16 }
  0x3b   : > { %5666 = vmatprep.mubr.msk.bf16.mxu1 %vm675_vm3, %v4967_v25  ;;  %v2124_v43 = vshll.u32 %v5152_v24, 16  ;;  %v2114_v44 = vrot.slane %v2113_v34, 4  ;;  %v329_v45 = vrot.slane %v327_v37, 4  ;;  %v2130_v26 = vshll.u32 %v6686_v33, 16  ;;  %v6716_v34 = vld [vmem:[%s6581_s11 + $0x44] sm:$0x1] }
  0x3c   : > { %v335_v47 = vrot.slane %v333_v36, 5  ;;  %v321_v48 = vrot.slane %v320_v39, 4  ;;  %v2123_v49 = vrot.slane %v2121_v42, 4  ;;  %v2134_v51 = vshrl.u32 %v6686_v33, 16  ;;  %v199_v42 = vld [vmem:[%s6581_s11 + $0x3c] sm:$0xf] }
  0x3d   : > { %v2126_v50 = vrot.slane %v2124_v43, 5  ;;  %v2119_v53 = vsel %vm6607_vm4, %v2114_v44, %v2118_v21  ;;  %v330_v55 = vor.u32 %v329_v45, %v325_v35  ;;  %v2132_v56 = vrot.slane %v2130_v26, 5  ;;  %v200_v26 = vld [vmem:[%s6581_s11 + $0x40] sm:$0xf] }
  0x3e   : > { %v2140_v57 = vshll.u32 %v6694_v40, 16  ;;  %v5194_v59 = vcombine.low %v2109_v38, %v2119_v53  ;;  %v326_v61 = vsel %vm6607_vm4, %v321_v48, %v325_v35  ;;  %v2136_v2 = vrot.slane %v2134_v51, 4 }
  0x3f   : > { %v2127_v0 = vor.u32 %v2126_v50, %v2123_v49  ;;  %v331_v5 = vrot.slane %v330_v55, 4  ;;  %v338_v7 = vshrl.u32 %v197_v52, 16  ;;  %v341_v8 = vshll.u32 %v197_v52, 16 }
  0x40   : > { %v2142_v6 = vrot.slane %v2140_v57, 5  ;;  %5802 = vmatprep.mubr.msk.bf16.mxu0 %vm675_vm3, %v5194_v59  ;;  %v2137_v17 = vor.u32 %v2136_v2, %v2132_v56  ;;  %v347_v10 = vshll.u32 %v198_v58, 16  ;;  %v351_v11 = vshrl.u32 %v198_v58, 16  ;;  %v5158_v2 = vld [vmem:[%s6581_s11 + $0x48] sm:$0xf] }
  0x41   : > { %v2128_v9 = vrot.slane %v2127_v0, 4  ;;  %v336_v13 = vsel %vm6607_vm4, %v331_v5, %v335_v47  ;;  %v340_v14 = vrot.slane %v338_v7, 4  ;;  %v343_v18 = vrot.slane %v341_v8, 5  ;;  %v6734_v8 = vld [vmem:[%s6581_s11 + $0x4c] sm:$0xf] }
  0x42   : > { %v357_v19 = vshll.u32 %v226_v4, 16  ;;  %v4968_v21 = vcombine.low %v326_v61, %v336_v13  ;;  %v2138_v24 = vrot.slane %v2137_v17, 4  ;;  %v349_v25 = vrot.slane %v347_v10, 5  ;;  %v227_v61 = vld [vmem:[%s6581_s11 + $0x44] sm:$0x1] }
  0x43   : > { %v2133_v23 = vsel %vm6607_vm4, %v2128_v9, %v2132_v56  ;;  %v344_v27 = vor.u32 %v343_v18, %v340_v14  ;;  %v353_v29 = vrot.slane %v351_v11, 4  ;;  %v2145_v35 = vshrl.u32 %v5155_v12, 16 }
  0x44   : > { %v359_v31 = vrot.slane %v357_v19, 5  ;;  %5667 = vmatmul.mubr.msk.bf16.gmra.mrb[4].mxu1 %vm675_vm3, %v4968_v21  ;;  %v2143_v37 = vsel %vm6607_vm4, %v2138_v24, %v2142_v6  ;;  %v2148_v36 = vshll.u32 %v5155_v12, 16  ;;  %v2154_v38 = vshll.u32 %v6711_v20, 16 }
  0x45   : > { %v2158_v39 = vshrl.u32 %v6711_v20, 16  ;;  %v5195_v43 = vcombine.low %v2133_v23, %v2143_v37  ;;  %v345_v44 = vrot.slane %v344_v27, 4  ;;  %v354_v45 = vor.u32 %v353_v29, %v349_v25  ;;  %v6742_v23 = vld [vmem:[%s6581_s11 + $0x50] sm:$0x1]  ;;  %v6746_v27 = vld [vmem:[%s6581_s11 + $0x48] sm:$0xf] }
  0x46   : > { %v2147_v47 = vrot.slane %v2145_v35, 4  ;;  %v2150_v48 = vrot.slane %v2148_v36, 5  ;;  %v2156_v49 = vrot.slane %v2154_v38, 5  ;;  %v2164_v51 = vshll.u32 %v6716_v34, 16  ;;  %v6749_v36 = vld [vmem:[%s6581_s11 + $0x4c] sm:$0xf] }
  0x47   : > { %v2160_v50 = vrot.slane %v2158_v39, 4  ;;  %5803 = vmatmul.mubr.msk.bf16.gmra.mrb[4].mxu0 %vm675_vm3, %v5195_v43  ;;  %v350_v52 = vsel %vm6607_vm4, %v345_v44, %v349_v25  ;;  %v355_v53 = vrot.slane %v354_v45, 4  ;;  %v362_v55 = vshrl.u32 %v199_v42, 16 }
  0x48   : > { %v365_v56 = vshll.u32 %v199_v42, 16  ;;  %v2151_v57 = vor.u32 %v2150_v48, %v2147_v47  ;;  %v2166_v59 = vrot.slane %v2164_v51, 5  ;;  %v371_v0 = vshll.u32 %v200_v26, 16 }
  0x49   : > { %v2161_v58 = vor.u32 %v2160_v50, %v2156_v49  ;;  %v360_v4 = vsel %vm6607_vm4, %v355_v53, %v359_v31  ;;  %v364_v5 = vrot.slane %v362_v55, 4  ;;  %v375_v7 = vshrl.u32 %v200_v26, 16  ;;  %v228_v26 = vld [vmem:[%s6581_s11 + $0x50] sm:$0x1]  ;;  %v5161_v53 = vld [vmem:[%s6581_s11 + $0x54] sm:$0xf] }
  0x4a   : > { %v367_v6 = vrot.slane %v365_v56, 5  ;;  %v4969_v9 = vcombine.low %v350_v52, %v360_v4  ;;  %v2152_v17 = vrot.slane %v2151_v57, 4  ;;  %v373_v11 = vrot.slane %v371_v0, 5  ;;  %v6765_v4 = vld [vmem:[%s6581_s11 + $0x58] sm:$0xf] }
  0x4b   : > { %v2162_v10 = vrot.slane %v2161_v58, 4  ;;  %v377_v13 = vrot.slane %v375_v7, 4  ;;  %v381_v14 = vshll.u32 %v227_v61, 16  ;;  %v2169_v18 = vshrl.u32 %v5158_v2, 16 }
  0x4c   : > { %v368_v12 = vor.u32 %v367_v6, %v364_v5  ;;  %5670 = vmatprep.mubr.msk.bf16.mxu1 %vm675_vm3, %v4969_v9  ;;  %v2157_v19 = vsel %vm6607_vm4, %v2152_v17, %v2156_v49  ;;  %v2172_v24 = vshll.u32 %v5158_v2, 16  ;;  %v2178_v25 = vshll.u32 %v6734_v8, 16 }
  0x4d   : > { %v2167_v21 = vsel %vm6607_vm4, %v2162_v10, %v2166_v59  ;;  %v378_v35 = vor.u32 %v377_v13, %v373_v11  ;;  %v383_v37 = vrot.slane %v381_v14, 5  ;;  %v2171_v38 = vrot.slane %v2169_v18, 4 }
  0x4e   : > { %v5196_v29 = vcombine.low %v2157_v19, %v2167_v21  ;;  %v369_v31 = vrot.slane %v368_v12, 4  ;;  %v2174_v39 = vrot.slane %v2172_v24, 5  ;;  %v2180_v42 = vrot.slane %v2178_v25, 5  ;;  %v6771_v12 = vld [vmem:[%s6581_s11 + $0x5c] sm:$0x1] }
  0x4f   : > { %v2182_v43 = vshrl.u32 %v6734_v8, 16  ;;  %v379_v45 = vrot.slane %v378_v35, 4  ;;  %v2188_v47 = vshll.u32 %v6742_v23, 16  ;;  %v386_v48 = vshrl.u32 %v6746_v27, 16  ;;  %v6775_v24 = vld [vmem:[%s6581_s11 + $0x54] sm:$0xf] }
  0x50   : > { %5806 = vmatprep.mubr.msk.bf16.mxu0 %vm675_vm3, %v5196_v29  ;;  %v374_v44 = vsel %vm6607_vm4, %v369_v31, %v373_v11  ;;  %v2175_v49 = vor.u32 %v2174_v39, %v2171_v38  ;;  %v389_v51 = vshll.u32 %v6746_v27, 16  ;;  %v395_v52 = vshll.u32 %v6749_v36, 16 }
  0x51   : > { %v2184_v50 = vrot.slane %v2182_v43, 4  ;;  %v384_v55 = vsel %vm6607_vm4, %v379_v45, %v383_v37  ;;  %v2190_v56 = vrot.slane %v2188_v47, 5  ;;  %v388_v57 = vrot.slane %v386_v48, 4  ;;  %v6781_v37 = vld [vmem:[%s6581_s11 + $0x58] sm:$0xf] }
  0x52   : > { %v399_v58 = vshrl.u32 %v6749_v36, 16  ;;  %v4970_v59 = vcombine.low %v374_v44, %v384_v55  ;;  %v2176_v61 = vrot.slane %v2175_v49, 4  ;;  %v391_v2 = vrot.slane %v389_v51, 5 }
  0x53   : > { %v2185_v0 = vor.u32 %v2184_v50, %v2180_v42  ;;  %v397_v5 = vrot.slane %v395_v52, 5  ;;  %v405_v7 = vshll.u32 %v228_v26, 16  ;;  %v2193_v9 = vshrl.u32 %v5161_v53, 16  ;;  %v229_v26 = vld [vmem:[%s6581_s11 + $0x5c] sm:$0x1] }
  0x54   : > { %v401_v6 = vrot.slane %v399_v58, 4  ;;  %5671 = vmatmul.mubr.msk.bf16.gmra.mrb[8].mxu1 %vm675_vm3, %v4970_v59  ;;  %v2181_v17 = vsel %vm6607_vm4, %v2176_v61, %v2180_v42  ;;  %v392_v11 = vor.u32 %v391_v2, %v388_v57  ;;  %v2196_v13 = vshll.u32 %v5161_v53, 16  ;;  %v5164_v53 = vld [vmem:[%s6581_s11 + $0x60] sm:$0xf]  ;;  %v6795_v59 = vld [vmem:[%s6581_s11 + $0x64] sm:$0xf] }
  0x55   : > { %v2186_v10 = vrot.slane %v2185_v0, 4  ;;  %v407_v18 = vrot.slane %v405_v7, 5  ;;  %v2195_v19 = vrot.slane %v2193_v9, 4  ;;  %v2202_v21 = vshll.u32 %v6765_v4, 16  ;;  %v6802_v9 = vld [vmem:[%s6581_s11 + $0x68] sm:$0x1] }
  0x56   : > { %v402_v14 = vor.u32 %v401_v6, %v397_v5  ;;  %v393_v29 = vrot.slane %v392_v11, 4  ;;  %v2198_v31 = vrot.slane %v2196_v13, 5  ;;  %v2206_v35 = vshrl.u32 %v6765_v4, 16 }
  0x57   : > { %v2191_v25 = vsel %vm6607_vm4, %v2186_v10, %v2190_v56  ;;  %v2204_v42 = vrot.slane %v2202_v21, 5  ;;  %v2212_v43 = vshll.u32 %v6771_v12, 16  ;;  %v410_v48 = vshrl.u32 %v6775_v24, 16 }
  0x58   : > { %v5197_v38 = vcombine.low %v2181_v17, %v2191_v25  ;;  %v403_v39 = vrot.slane %v402_v14, 4  ;;  %v398_v44 = vsel %vm6607_vm4, %v393_v29, %v397_v5  ;;  %v2199_v45 = vor.u32 %v2198_v31, %v2195_v19  ;;  %v6806_v19 = vld [vmem:[%s6581_s11 + $0x60] sm:$0xf] }
  0x59   : > { %v2208_v47 = vrot.slane %v2206_v35, 4  ;;  %v2214_v50 = vrot.slane %v2212_v43, 5  ;;  %v413_v51 = vshll.u32 %v6775_v24, 16  ;;  %v419_v52 = vshll.u32 %v6781_v37, 16  ;;  %v6812_v35 = vld [vmem:[%s6581_s11 + $0x64] sm:$0xf] }
  0x5a   : > { %5807 = vmatmul.mubr.msk.bf16.gmra.mrb[8].mxu0 %vm675_vm3, %v5197_v38  ;;  %v408_v49 = vsel %vm6607_vm4, %v403_v39, %v407_v18  ;;  %v2200_v56 = vrot.slane %v2199_v45, 4  ;;  %v412_v58 = vrot.slane %v410_v48, 4  ;;  %v423_v2 = vshrl.u32 %v6781_v37, 16 }
  0x5b   : > { %v4971_v55 = vcombine.low %v398_v44, %v408_v49  ;;  %v2209_v57 = vor.u32 %v2208_v47, %v2204_v42  ;;  %v415_v61 = vrot.slane %v413_v51, 5  ;;  %v421_v0 = vrot.slane %v419_v52, 5 }
  0x5c   : > { %v429_v5 = vshll.u32 %v229_v26, 16  ;;  %v2205_v6 = vsel %vm6607_vm4, %v2200_v56, %v2204_v42  ;;  %v2217_v17 = vshrl.u32 %v5164_v53, 16  ;;  %v2220_v10 = vshll.u32 %v5164_v53, 16 }
  0x5d   : > { %5674 = vmatprep.mubr.msk.bf16.mxu1 %vm675_vm3, %v4971_v55  ;;  %v2210_v7 = vrot.slane %v2209_v57, 4  ;;  %v416_v11 = vor.u32 %v415_v61, %v412_v58  ;;  %v425_v13 = vrot.slane %v423_v2, 4  ;;  %v2226_v18 = vshll.u32 %v6795_v59, 16  ;;  %v5224_v58 = vld [vmem:[%s6581_s11 + $0xc] sm:$0xe] }
  0x5e   : > { %v431_v14 = vrot.slane %v429_v5, 5  ;;  %v2219_v25 = vrot.slane %v2217_v17, 4  ;;  %v2222_v29 = vrot.slane %v2220_v10, 5  ;;  %v2230_v31 = vshrl.u32 %v6795_v59, 16 }
  0x5f   : > { %v2215_v21 = vsel %vm6607_vm4, %v2210_v7, %v2214_v50  ;;  %v417_v39 = vrot.slane %v416_v11, 4  ;;  %v426_v42 = vor.u32 %v425_v13, %v421_v0  ;;  %v2228_v43 = vrot.slane %v2226_v18, 5  ;;  %v230_v50 = vld [vmem:[%s6581_s11 + $0x68] sm:$0x1] }
  0x60   : > { %v5198_v38 = vcombine.low %v2205_v6, %v2215_v21  ;;  %v2223_v44 = vor.u32 %v2222_v29, %v2219_v25  ;;  %v2232_v45 = vrot.slane %v2230_v31, 4  ;;  %v2236_v47 = vshll.u32 %v6802_v9, 16  ;;  %v6840_v29 = vld [vmem:[%s6581_s11 + $0x70] sm:$0xf] }
  0x61   : > { %v434_v26 = vshrl.u32 %v6806_v19, 16  ;;  %v422_v48 = vsel %vm6607_vm4, %v417_v39, %v421_v0  ;;  %v427_v49 = vrot.slane %v426_v42, 4  ;;  %v437_v51 = vshll.u32 %v6806_v19, 16  ;;  %v6827_v0 = vld [vmem:[%s6581_s11 + $0x6c] sm:$0xf] }
  0x62   : > { %5810 = vmatprep.mubr.msk.bf16.mxu0 %vm675_vm3, %v5198_v38  ;;  %v443_v52 = vshll.u32 %v6812_v35, 16  ;;  %v2224_v53 = vrot.slane %v2223_v44, 4  ;;  %v2233_v55 = vor.u32 %v2232_v45, %v2228_v43  ;;  %v2238_v56 = vrot.slane %v2236_v47, 5 }
  0x63   : > { %v436_v57 = vrot.slane %v434_v26, 4  ;;  %v432_v61 = vsel %vm6607_vm4, %v427_v49, %v431_v14  ;;  %v439_v2 = vrot.slane %v437_v51, 5  ;;  %v447_v6 = vshrl.u32 %v6812_v35, 16  ;;  %v231_v26 = vld [vmem:[%s6581_s11 + $0x74] sm:$0x1] }
  0x64   : > { %v445_v5 = vrot.slane %v443_v52, 5  ;;  %v4972_v7 = vcombine.low %v422_v48, %v432_v61  ;;  %v2229_v17 = vsel %vm6607_vm4, %v2224_v53, %v2228_v43  ;;  %v2234_v10 = vrot.slane %v2233_v55, 4  ;;  %v5225_v48 = vld [vmem:[%s6581_s11 + $0x18] sm:$0xe] }
  0x65   : > { %v453_v11 = vshll.u32 %v230_v50, 16  ;;  %v440_v14 = vor.u32 %v439_v2, %v436_v57  ;;  %v449_v18 = vrot.slane %v447_v6, 4  ;;  %v5240_v21 = vrot.slane %v5224_v58, 9  ;;  %v6859_v53 = vld [vmem:[%s6581_s11 + $0x78] sm:$0xf] }
  0x66   : > { %v2794_v25 = vrot.slane %v2792_v62, 4  ;;  %5675 = vmatmul.mubr.msk.bf16.gmra.mrb[12].mxu1 %vm675_vm3, %v4972_v7  ;;  %v2239_v31 = vsel %vm6607_vm4, %v2234_v10, %v2238_v56  ;;  %v458_v39 = vshrl.u32 %v6827_v0, 16  ;;  %v461_v42 = vshll.u32 %v6827_v0, 16  ;;  %v232_v57 = vld [vmem:[%s6581_s11 + $0x80] sm:$0x1] }
  0x67   : > { %v455_v38 = vrot.slane %v453_v11, 5  ;;  %v5199_v43 = vcombine.low %v2229_v17, %v2239_v31  ;;  %v441_v44 = vrot.slane %v440_v14, 4  ;;  %v450_v45 = vor.u32 %v449_v18, %v445_v5  ;;  %v5226_v10 = vld [vmem:[%s6581_s11 + $0x24] sm:$0xe] }
  0x68   : > { %v2793_v47 = vsel %vm6833_vm7, %v5240_v21, %v2792_v62  ;;  %v2796_v49 = vsel %vm6833_vm7, %v2794_v25, %v2795_v63  ;;  %v460_v50 = vrot.slane %v458_v39, 4  ;;  %v463_v51 = vrot.slane %v461_v42, 5  ;;  %v6885_v39 = vld [vmem:[%s6581_s11 + $0x84] sm:$0xf] }
  0x69   : > { %v467_v52 = vshll.u32 %v6840_v29, 16  ;;  %5811 = vmatmul.mubr.msk.bf16.gmra.mrb[12].mxu0 %vm675_vm3, %v5199_v43  ;;  %v446_v15 = vsel %vm6607_vm4, %v441_v44, %v445_v5  ;;  %v451_v62 = vrot.slane %v450_v45, 4  ;;  %v5257_v55 = vcombine.low %v2793_v47, %v2796_v49  ;;  %v6893_v43 = vld [vmem:[%s6581_s11 + $0x88] sm:$0xf] }
  0x6a   : > { %v471_v56 = vshrl.u32 %v6840_v29, 16  ;;  %v464_v63 = vor.u32 %v463_v51, %v460_v50  ;;  %v477_v61 = vshll.u32 %v231_v26, 16  ;;  %v5241_v2 = vrot.slane %v5225_v48, 9 }
  0x6b   : > { %v469_v58 = vrot.slane %v467_v52, 5  ;;  %v456_v6 = vsel %vm6607_vm4, %v451_v62, %v455_v38  ;;  %5832 = vmatprep.mubr.msk.bf16.mxu0 %vm675_vm3, %v5257_v55  ;;  %v2803_v5 = vsel %vm6833_vm7, %v6650_v30, %v2802_v28  ;;  %v482_v17 = vshrl.u32 %v6859_v53, 16  ;;  %v233_v52 = vld [vmem:[%s6581_s11 + $0x8c] sm:$0x1] }
  0x6c   : > { %v473_v7 = vrot.slane %v471_v56, 4  ;;  %v4973_v11 = vcombine.low %v446_v15, %v456_v6  ;;  %v465_v14 = vrot.slane %v464_v63, 4  ;;  %v479_v18 = vrot.slane %v477_v61, 5 }
  0x6d   : > { %v2800_v21 = vsel %vm6833_vm7, %v5241_v2, %v2799_v22  ;;  %v484_v38 = vrot.slane %v482_v17, 4  ;;  %v485_v1 = vshll.u32 %v6859_v53, 16  ;;  %v491_v30 = vshll.u32 %v6866_v16, 16  ;;  %v6898_v22 = vld [vmem:[%s8401_s1 + $0xe] sm:$0x3] }
  0x6e   : > { %v474_v25 = vor.u32 %v473_v7, %v469_v58  ;;  %v5258_v31 = vcombine.low %v2800_v21, %v2803_v5  ;;  %5678 = vmatprep.mubr.msk.bf16.mxu1 %vm675_vm3, %v4973_v11  ;;  %v470_v28 = vsel %vm6607_vm4, %v465_v14, %v469_v58  ;;  %v495_v60 = vshrl.u32 %v6866_v16, 16  ;;  %v6917_v5 = vld [vmem:[%s6581_s11 + $0x90] sm:$0xf] }
  0x6f   : > { %v501_v42 = vshll.u32 %v232_v57, 16  ;;  %v487_v45 = vrot.slane %v485_v1, 5  ;;  %v5242_v47 = vrot.slane %v5226_v10, 9  ;;  %v2806_v26 = vrot.slane %v6657_v46, 5  ;;  %v5227_v57 = vld [vmem:[%s6581_s11 + $0x30] sm:$0xe] }
  0x70   : > { %v475_v44 = vrot.slane %v474_v25, 4  ;;  %v493_v48 = vrot.slane %v491_v30, 5  ;;  %v497_v49 = vrot.slane %v495_v60, 4  ;;  %v2809_v51 = vrot.slane %v6666_v54, 5  ;;  %v6929_v30 = vld [vmem:[%s6581_s11 + $0x94] sm:$0xf] }
  0x71   : > { %v503_v50 = vrot.slane %v501_v42, 5  ;;  %5833 = vmatmul.mubr.msk.bf16.vlgmr.msra.gmra.mrb[0].mxu0 %vm675_vm3, %v5258_v31  ;;  %v488_v62 = vor.u32 %v487_v45, %v484_v38  ;;  %v2807_v55 = vsel %vm6833_vm7, %v5242_v47, %v2806_v26  ;;  %v2808_v56 = vrot.slane %v2806_v26, 4  ;;  %v234_v60 = vld [vmem:[%s6581_s11 + $0x98] sm:$0x1]  ;;  %v5228_v26 = vld [vmem:[%s6581_s11 + $0x3c] sm:$0xe] }
  0x72   : > { %v480_v15 = vsel %vm6607_vm4, %v475_v44, %v479_v18  ;;  %5865 = vmatpush3.bf16.msra.mxu0 %v6617_v41  ;;  %v498_v46 = vor.u32 %v497_v49, %v493_v48  ;;  %v506_v58 = vshrl.u32 %v6885_v39, 16  ;;  %v509_v54 = vshll.u32 %v6885_v39, 16 }
  0x73   : > { %v4974_v63 = vcombine.low %v470_v28, %v480_v15  ;;  %v489_v61 = vrot.slane %v488_v62, 4  ;;  %v2810_v2 = vsel %vm6833_vm7, %v2808_v56, %v2809_v51  ;;  %v515_v6 = vshll.u32 %v6893_v43, 16  ;;  %6232 = vmatprep.subr.msk.bf16.mxu0 %vm724_vm0, %v6898_v22 }
  0x74   : > { %v519_v7 = vshrl.u32 %v6893_v43, 16  ;;  %v499_v41 = vrot.slane %v498_v46, 4  ;;  %v5259_v17 = vcombine.low %v2807_v55, %v2810_v2  ;;  %v508_v10 = vrot.slane %v506_v58, 4  ;;  %v6949_v46 = vld [vmem:[%s6581_s11 + $0xa0] sm:$0xf] }
  0x75   : > { %5679 = vmatmul.mubr.msk.bf16.gmra.mrb[16].mxu1 %vm675_vm3, %v4974_v63  ;;  %v511_v11 = vrot.slane %v509_v54, 5  ;;  %v494_v14 = vsel %vm6607_vm4, %v489_v61, %v493_v48  ;;  %v517_v18 = vrot.slane %v515_v6, 5  ;;  %v525_v25 = vshll.u32 %v233_v52, 16  ;;  %v6938_v52 = vld [vmem:[%s6581_s11 + $0x9c] sm:$0xf] }
  0x76   : > { %v521_v21 = vrot.slane %v519_v7, 4  ;;  %v504_v31 = vsel %vm6607_vm4, %v499_v41, %v503_v50  ;;  %5836 = vmatprep.mubr.msk.bf16.mxu0 %vm675_vm3, %v5259_v17  ;;  %v5243_v1 = vrot.slane %v5227_v57, 9  ;;  %v2813_v28 = vrot.slane %v6686_v33, 5 }
  0x77   : > { %v512_v38 = vor.u32 %v511_v11, %v508_v10  ;;  %v4975_v42 = vcombine.low %v494_v14, %v504_v31  ;;  %v527_v45 = vrot.slane %v525_v25, 5  ;;  %v2816_v47 = vrot.slane %v6694_v40, 5  ;;  %v235_v10 = vld [vmem:[%s6581_s11 + $0xa4] sm:$0x1]  ;;  %v5229_v11 = vld [vmem:[%s6581_s11 + $0x48] sm:$0xe] }
  0x78   : > { %v522_v44 = vor.u32 %v521_v21, %v517_v18  ;;  %v2814_v49 = vsel %vm6833_vm7, %v5243_v1, %v2813_v28  ;;  %v2815_v50 = vrot.slane %v2813_v28, 4  ;;  %v530_v51 = vshrl.u32 %v6917_v5, 16 }
  0x79   : > { %v513_v48 = vrot.slane %v512_v38, 4  ;;  %5682 = vmatprep.mubr.msk.bf16.mxu1 %vm675_vm3, %v4975_v42  ;;  %v533_v15 = vshll.u32 %v6917_v5, 16  ;;  %v539_v62 = vshll.u32 %v6929_v30, 16  ;;  %v543_v40 = vshrl.u32 %v6929_v30, 16 }
  0x7a   : > { %v523_v33 = vrot.slane %v522_v44, 4  ;;  %v2817_v56 = vsel %vm6833_vm7, %v2815_v50, %v2816_v47  ;;  %v532_v57 = vrot.slane %v530_v51, 4  ;;  %v549_v63 = vshll.u32 %v234_v60, 16 }
  0x7b   : > { %v518_v55 = vsel %vm6607_vm4, %v513_v48, %v517_v18  ;;  %v5260_v54 = vcombine.low %v2814_v49, %v2817_v56  ;;  %v535_v61 = vrot.slane %v533_v15, 5  ;;  %v541_v2 = vrot.slane %v539_v62, 5  ;;  %v6975_v56 = vld [vmem:[%s6581_s11 + $0xac] sm:$0xf] }
  0x7c   : > { %v528_v58 = vsel %vm6607_vm4, %v523_v33, %v527_v45  ;;  %v545_v7 = vrot.slane %v543_v40, 4  ;;  %v551_v41 = vrot.slane %v549_v63, 5  ;;  %v5244_v17 = vrot.slane %v5228_v26, 9  ;;  %v6970_v33 = vld [vmem:[%s6581_s11 + $0xa8] sm:$0xf] }
  0x7d   : > { %v4976_v6 = vcombine.low %v518_v55, %v528_v58  ;;  %5837 = vmatmul.mubr.msk.bf16.gmra.mrb[4].mxu0 %vm675_vm3, %v5260_v54  ;;  %v536_v14 = vor.u32 %v535_v61, %v532_v57  ;;  %v2820_v18 = vrot.slane %v6711_v20, 5  ;;  %v2823_v21 = vrot.slane %v6716_v34, 5  ;;  %v236_v61 = vld [vmem:[%s6581_s11 + $0xb0] sm:$0x1] }
  0x7e   : > { %v554_v25 = vshrl.u32 %v6938_v52, 16  ;;  %v546_v31 = vor.u32 %v545_v7, %v541_v2  ;;  %v557_v38 = vshll.u32 %v6938_v52, 16  ;;  %v563_v1 = vshll.u32 %v6949_v46, 16 }
  0x7f   : > { %5683 = vmatmul.mubr.msk.bf16.gmra.mrb[20].mxu1 %vm675_vm3, %v4976_v6  ;;  %v567_v28 = vshrl.u32 %v6949_v46, 16  ;;  %v537_v60 = vrot.slane %v536_v14, 4  ;;  %v2821_v42 = vsel %vm6833_vm7, %v5244_v17, %v2820_v18  ;;  %v2822_v20 = vrot.slane %v2820_v18, 4  ;;  %v6990_v14 = vld [vmem:[%s6581_s11 + $0xb4] sm:$0xf] }
  0x80   : > { %v556_v44 = vrot.slane %v554_v25, 4  ;;  %v547_v34 = vrot.slane %v546_v31, 4  ;;  %v559_v45 = vrot.slane %v557_v38, 5  ;;  %v565_v47 = vrot.slane %v563_v1, 5 }
  0x81   : > { %v569_v26 = vrot.slane %v567_v28, 4  ;;  %v542_v48 = vsel %vm6607_vm4, %v537_v60, %v541_v2  ;;  %v2824_v49 = vsel %vm6833_vm7, %v2822_v20, %v2823_v21  ;;  %v573_v50 = vshll.u32 %v235_v10, 16  ;;  %v5230_v2 = vld [vmem:[%s6581_s11 + $0x54] sm:$0xe] }
  0x82   : > { %v5245_v51 = vrot.slane %v5229_v11, 9  ;;  %v552_v15 = vsel %vm6607_vm4, %v547_v34, %v551_v41  ;;  %v5261_v62 = vcombine.low %v2821_v42, %v2824_v49  ;;  %v560_v40 = vor.u32 %v559_v45, %v556_v44  ;;  %v6999_v42 = vld [vmem:[%s6581_s11 + $0xb8] sm:$0xf]  ;;  %v237_v49 = vld [vmem:[%s6581_s11 + $0xbc] sm:$0x1] }
  0x83   : > { %v570_v55 = vor.u32 %v569_v26, %v565_v47  ;;  %v4977_v57 = vcombine.low %v542_v48, %v552_v15  ;;  %v575_v63 = vrot.slane %v573_v50, 5  ;;  %v2827_v58 = vrot.slane %v6734_v8, 5 }
  0x84   : > { %v2830_v54 = vrot.slane %v6742_v23, 5  ;;  %5840 = vmatprep.mubr.msk.bf16.mxu0 %vm675_vm3, %v5261_v62  ;;  %v561_v6 = vrot.slane %v560_v40, 4  ;;  %v578_v41 = vshrl.u32 %v6970_v33, 16  ;;  %v581_v17 = vshll.u32 %v6970_v33, 16 }
  0x85   : > { %v571_v7 = vrot.slane %v570_v55, 4  ;;  %5686 = vmatprep.mubr.msk.bf16.mxu1 %vm675_vm3, %v4977_v57  ;;  %v2828_v10 = vsel %vm6833_vm7, %v5245_v51, %v2827_v58  ;;  %v2829_v11 = vrot.slane %v2827_v58, 4  ;;  %v587_v8 = vshll.u32 %v6975_v56, 16  ;;  %v5231_v55 = vld [vmem:[%s6581_s11 + $0x60] sm:$0xe] }
  0x86   : > { %v591_v23 = vshrl.u32 %v6975_v56, 16  ;;  %v566_v18 = vsel %vm6607_vm4, %v561_v6, %v565_v47  ;;  %v580_v25 = vrot.slane %v578_v41, 4  ;;  %v583_v31 = vrot.slane %v581_v17, 5  ;;  %v5232_v6 = vld [vmem:[%s6581_s11 + $0x6c] sm:$0xe] }
  0x87   : > { %v576_v21 = vsel %vm6607_vm4, %v571_v7, %v575_v63  ;;  %v2831_v1 = vsel %vm6833_vm7, %v2829_v11, %v2830_v54  ;;  %v589_v28 = vrot.slane %v587_v8, 5  ;;  %v597_v34 = vshll.u32 %v236_v61, 16  ;;  %v5168_v11 = vld [vmem:[%s6581_s11 + $0x70] sm:$0xf]  ;;  %v5169_v8 = vld [vmem:[%s6581_s11 + $0x74] sm:$0x1] }
  0x88   : > { %v4978_v38 = vcombine.low %v566_v18, %v576_v21  ;;  %v593_v60 = vrot.slane %v591_v23, 4  ;;  %v5262_v20 = vcombine.low %v2828_v10, %v2831_v1  ;;  %v584_v44 = vor.u32 %v583_v31, %v580_v25 }
  0x89   : > { %v5246_v45 = vrot.slane %v5230_v2, 9  ;;  %v2834_v26 = vrot.slane %v6765_v4, 5  ;;  %v2837_v48 = vrot.slane %v6771_v12, 5  ;;  %v602_v50 = vshrl.u32 %v6990_v14, 16 }
  0x8a   : > { %5687 = vmatmul.mubr.msk.bf16.gmra.mrb[24].mxu1 %vm675_vm3, %v4978_v38  ;;  %v594_v47 = vor.u32 %v593_v60, %v589_v28  ;;  %5841 = vmatmul.mubr.msk.bf16.gmra.mrb[8].mxu0 %vm675_vm3, %v5262_v20  ;;  %v585_v51 = vrot.slane %v584_v44, 4  ;;  %v599_v15 = vrot.slane %v597_v34, 5  ;;  %v605_v62 = vshll.u32 %v6990_v14, 16 }
  0x8b   : > { %v611_v40 = vshll.u32 %v6999_v42, 16  ;;  %v2835_v4 = vsel %vm6833_vm7, %v5246_v45, %v2834_v26  ;;  %v2836_v12 = vrot.slane %v2834_v26, 4  ;;  %v604_v63 = vrot.slane %v602_v50, 4 }
  0x8c   : > { %v595_v57 = vrot.slane %v594_v47, 4  ;;  %v590_v58 = vsel %vm6607_vm4, %v585_v51, %v589_v28  ;;  %v607_v54 = vrot.slane %v605_v62, 5  ;;  %v615_v2 = vshrl.u32 %v6999_v42, 16  ;;  %v5233_v47 = vld [vmem:[%s6581_s11 + $0x78] sm:$0xe] }
  0x8d   : > { %v613_v61 = vrot.slane %v611_v40, 5  ;;  %v2838_v41 = vsel %vm6833_vm7, %v2836_v12, %v2837_v48  ;;  %v621_v17 = vshll.u32 %v237_v49, 16  ;;  %v5247_v10 = vrot.slane %v5231_v55, 9  ;;  %v6340_v51 = vld [vmem:[%s6581_s11] sm:$0xf] }
  0x8e   : > { %v600_v7 = vsel %vm6607_vm4, %v595_v57, %v599_v15  ;;  %v5263_v18 = vcombine.low %v2835_v4, %v2838_v41  ;;  %v608_v21 = vor.u32 %v607_v54, %v604_v63  ;;  %v617_v25 = vrot.slane %v615_v2, 4  ;;  %v7037_v15 = vld [vmem:[%s6581_s11 + $0x4] sm:$0xf]  ;;  %v7041_v40 = vld [vmem:[%s6581_s11 + $0x7c] sm:$0xf] }
  0x8f   : > { %v4979_v23 = vcombine.low %v590_v58, %v600_v7  ;;  %v623_v31 = vrot.slane %v621_v17, 5  ;;  %v2841_v38 = vrot.slane %v6795_v59, 5  ;;  %v2844_v1 = vrot.slane %v6802_v9, 5  ;;  %v7044_v55 = vld [vmem:[%s6581_s11 + $0x80] sm:$0x1] }
  0x90   : > { %v5248_v28 = vrot.slane %v5232_v6, 9  ;;  %5844 = vmatprep.mubr.msk.bf16.mxu0 %vm675_vm3, %v5263_v18  ;;  %v609_v60 = vrot.slane %v608_v21, 4  ;;  %v618_v20 = vor.u32 %v617_v25, %v613_v61  ;;  %v2848_v44 = vrot.slane %v5168_v11, 5  ;;  %v5174_v57 = vld [vmem:[%s6581_s11 + $0x88] sm:$0xf] }
  0x91   : > { %5690 = vmatprep.mubr.msk.bf16.mxu1 %vm675_vm3, %v4979_v23  ;;  %v2851_v34 = vrot.slane %v5169_v8, 5  ;;  %v2842_v45 = vsel %vm6833_vm7, %v5247_v10, %v2841_v38  ;;  %v2843_v59 = vrot.slane %v2841_v38, 4  ;;  %v4997_v62 = vcombine.low %v6340_v51, %v7037_v15  ;;  %v5175_v54 = vld [vmem:[%s6581_s11 + $0x8c] sm:$0x1]  ;;  %v5177_v17 = vld [vmem:[%s6581_s11 + $0x94] sm:$0xf] }
  0x92   : > { %v614_v9 = vsel %vm6607_vm4, %v609_v60, %v613_v61  ;;  %v619_v26 = vrot.slane %v618_v20, 4  ;;  %v2849_v48 = vsel %vm6833_vm7, %v5248_v28, %v2848_v44  ;;  %v2850_v49 = vrot.slane %v2848_v44, 4  ;;  %v5234_v61 = vld [vmem:[%s6581_s11 + $0x84] sm:$0xe]  ;;  %v5235_v23 = vld [vmem:[%s6581_s11 + $0x90] sm:$0xe] }
  0x93   : > { %v2845_v50 = vsel %vm6833_vm7, %v2843_v59, %v2844_v1  ;;  %v5249_v58 = vrot.slane %v5233_v47, 9  ;;  %v2855_v7 = vrot.slane %v7041_v40, 5  ;;  %v2858_v41 = vrot.slane %v7044_v55, 5  ;;  %v5178_v25 = vld [vmem:[%s6581_s11 + $0x98] sm:$0x1] }
  0x94   : > { %v624_v4 = vsel %vm6607_vm4, %v619_v26, %v623_v31  ;;  %v5264_v12 = vcombine.low %v2842_v45, %v2845_v50  ;;  %v2852_v63 = vsel %vm6833_vm7, %v2850_v49, %v2851_v34  ;;  %v5250_v10 = vrot.slane %v5234_v61, 9  ;;  %v5180_v31 = vld [vmem:[%s6581_s11 + $0xa0] sm:$0xf]  ;;  %v5181_v60 = vld [vmem:[%s6581_s11 + $0xa4] sm:$0x1] }
  0x95   : > { %v4980_v2 = vcombine.low %v614_v9, %v624_v4  ;;  %v5265_v6 = vcombine.low %v2849_v48, %v2852_v63  ;;  %v2862_v11 = vrot.slane %v5174_v57, 5  ;;  %v2865_v8 = vrot.slane %v5175_v54, 5  ;;  %v5236_v20 = vld [vmem:[%s6581_s11 + $0x9c] sm:$0xe]  ;;  %v6342_v44 = vld [vmem:[%s6581_s11 + $0xc] sm:$0xf] }
  0x96   : > { %5845 = vmatmul.mubr.msk.bf16.gmra.mrb[12].mxu0 %vm675_vm3, %v5264_v12  ;;  %v2856_v18 = vsel %vm6833_vm7, %v5249_v58, %v2855_v7  ;;  %v2857_v21 = vrot.slane %v2855_v7, 4  ;;  %v2869_v28 = vrot.slane %v5177_v17, 5  ;;  %v7071_v34 = vld [vmem:[%s6581_s11 + $0x10] sm:$0xf]  ;;  %v6344_v47 = vld [vmem:[%s6581_s11 + $0x18] sm:$0xf] }
  0x97   : > { %5691 = vmatmul.mubr.msk.bf16.gmra.mrb[28].mxu1 %vm675_vm3, %v4980_v2  ;;  %5848 = vmatprep.mubr.msk.bf16.mxu0 %vm675_vm3, %v5265_v6  ;;  %v2863_v38 = vsel %vm6833_vm7, %v5250_v10, %v2862_v11  ;;  %v2864_v1 = vrot.slane %v2862_v11, 4  ;;  %v4998_v45 = vcombine.low %v6342_v44, %v7071_v34  ;;  %v7078_v9 = vld [vmem:[%s6581_s11 + $0x1c] sm:$0xf]  ;;  %v5251_v48 = vrot.slane %v5235_v23, 9  ;;  %v5183_v57 = vld [vmem:[%s6581_s11 + $0xac] sm:$0xf] }
  0x98   : > { %5696 = vmatprep.mubr.msk.bf16.mxu1 %vm675_vm3, %v4997_v62  ;;  %v2859_v59 = vsel %vm6833_vm7, %v2857_v21, %v2858_v41  ;;  %v4999_v26 = vcombine.low %v6344_v47, %v7078_v9  ;;  %v2871_v51 = vrot.slane %v2869_v28, 4  ;;  %v2872_v62 = vrot.slane %v5178_v25, 5  ;;  %v6346_v54 = vld [vmem:[%s8401_s1 + $0x4] sm:$0x3]  ;;  %v5186_v2 = vld [vmem:[%s6581_s11 + $0xb8] sm:$0xf] }
  0x99   : > { %v5266_v49 = vcombine.low %v2856_v18, %v2859_v59  ;;  %v2866_v50 = vsel %vm6833_vm7, %v2864_v1, %v2865_v8  ;;  %v5252_v12 = vrot.slane %v5236_v20, 9  ;;  %v2876_v63 = vrot.slane %v5180_v31, 5  ;;  %v7093_v7 = vld [vmem:[%s8401_s1 + $0x6] sm:$0x3]  ;;  %v5184_v10 = vld [vmem:[%s6581_s11 + $0xb0] sm:$0x1] }
  0x9a   : > { %v5267_v4 = vcombine.low %v2863_v38, %v2866_v50  ;;  %v2879_v58 = vrot.slane %v5181_v60, 5  ;;  %v1443_v61 = vsel %vm724_vm0, %v6346_v54, 0  ;;  %v2870_v41 = vsel %vm6833_vm7, %v5251_v48, %v2869_v28  ;;  %v5237_v11 = vld [vmem:[%s6581_s11 + $0xa8] sm:$0xe]  ;;  %v5187_v25 = vld [vmem:[%s6581_s11 + $0xbc] sm:$0x1] }
  0x9b   : > { %v2878_v6 = vrot.slane %v2876_v63, 4  ;;  %v2873_v17 = vsel %vm6833_vm7, %v2871_v51, %v2872_v62  ;;  %v2883_v8 = vrot.slane %v5183_v57, 5  ;;  %v2877_v23 = vsel %vm6833_vm7, %v5252_v12, %v2876_v63  ;;  %v5238_v31 = vld [vmem:[%s6581_s11 + $0xb4] sm:$0xe]  ;;  %v6347_v38 = vld [vmem:[%s6581_s11 + $0x24] sm:$0xf] }
  0x9c   : > { %v2890_v21 = vrot.slane %v5186_v2, 5  ;;  %v7114_v1 = vld [vmem:[%s6581_s11 + $0x28] sm:$0xf]  ;;  %v5268_v60 = vcombine.low %v2870_v41, %v2873_v17  ;;  %v5253_v44 = vrot.slane %v5237_v11, 9  ;;  %v2886_v59 = vrot.slane %v5184_v10, 5 }
  0x9d   : > { %v2880_v18 = vsel %vm6833_vm7, %v2878_v6, %v2879_v58  ;;  %v5000_v28 = vcombine.low %v6347_v38, %v7114_v1  ;;  %v6349_v47 = vld [vmem:[%s6581_s11 + $0x30] sm:$0xf]  ;;  %v2893_v51 = vrot.slane %v5187_v25, 5  ;;  %v5189_v62 = vld [vmem:[%s6581_s11 + $0xc4] sm:$0xf]  ;;  %v2278_v25 = vshrl.u32 %v7041_v40, 16 }
  0x9e   : > { %5849 = vmatmul.mubr.msk.bf16.gmra.mrb[16].mxu0 %vm675_vm3, %v5266_v49  ;;  %v5269_v20 = vcombine.low %v2877_v23, %v2880_v18  ;;  %v5254_v49 = vrot.slane %v5238_v31, 9  ;;  %v2892_v50 = vrot.slane %v2890_v21, 4  ;;  %v2884_v57 = vsel %vm6833_vm7, %v5253_v44, %v2883_v8  ;;  %v5239_v12 = vld [vmem:[%s6581_s11 + $0xc0] sm:$0xe]  ;;  %v6351_v41 = vld [vmem:[%s6581_s11 + $0x3c] sm:$0xf] }
  0x9f   : > { %5697 = vmatmul.mubr.msk.bf16.vlgmr.msra.gmra.mrb[0].mxu1 %vm675_vm3, %v4998_v45  ;;  %5852 = vmatprep.mubr.msk.bf16.mxu0 %vm675_vm3, %v5267_v4  ;;  %v2885_v45 = vrot.slane %v2883_v8, 4  ;;  %v2897_v63 = vrot.slane %v5189_v62, 5  ;;  %v5255_v6 = vrot.slane %v5239_v12, 9  ;;  %v7139_v17 = vld [vmem:[%s6581_s11 + $0x40] sm:$0xf]  ;;  %v5003_v18 = vcombine.low %v6746_v27, %v6749_v36  ;;  %v6303_v62 = vld [vmem:[%s6581_s11 + $0x24] sm:$0xff]  }
  0xa0   : > { %5729 = vmatpush3.bf16.msra.mxu1 %v1443_v61  ;;  %5700 = vmatprep.mubr.msk.bf16.mxu1 %vm675_vm3, %v4999_v26  ;;  %v7119_v26 = vld [vmem:[%s6581_s11 + $0x34] sm:$0xf]  ;;  %v2891_v58 = vsel %vm6833_vm7, %v5254_v49, %v2890_v21  ;;  %v2894_v54 = vsel %vm6833_vm7, %v2892_v50, %v2893_v51  ;;  %v5190_v61 = vld [vmem:[%s6581_s11 + $0xc8] sm:$0x1]  ;;  %v5002_v10 = vcombine.low %v6351_v41, %v7139_v17  ;;  %v2274_v21 = vshll.u32 %v7041_v40, 16 }
  0xa1   : > { %6227 = vmatprep.subr.msk.bf16.mxu1 %vm724_vm0, %v7093_v7  ;;  %v5001_v48 = vcombine.low %v6349_v47, %v7119_v26  ;;  %v2887_v4 = vsel %vm6833_vm7, %v2885_v45, %v2886_v59  ;;  %v5271_v11 = vcombine.low %v2891_v58, %v2894_v54  ;;  %v2899_v8 = vrot.slane %v2897_v63, 4  ;;  %v1181_v45 = vld [vmem:[%s6581_s11] sm:$0xe]  ;;  %v1182_v59 = vld [vmem:[%s6581_s11 + $0xc] sm:$0xe] }
  0xa2   : > { %v5270_v2 = vcombine.low %v2884_v57, %v2887_v4  ;;  %v2900_v23 = vrot.slane %v5190_v61, 5  ;;  %v2898_v31 = vsel %vm6833_vm7, %v5255_v6, %v2897_v63  ;;  %v7154_v27 = vrot.slane %v2274_v21, 5  ;;  %v1185_v41 = vld [vmem:[%s6581_s11 + $0x30] sm:$0xe] }
  0xa3   : > { %v2280_v36 = vrot.slane %v2278_v25, 4  ;;  %v5005_v44 = vcombine.low %v6806_v19, %v6812_v35  ;;  %v2284_v47 = vshll.u32 %v7044_v55, 16  ;;  %v5029_v19 = vrot.slane %v1181_v45, 9 }
  0xa4   : > { %v2901_v38 = vsel %vm6833_vm7, %v2899_v8, %v2900_v23  ;;  %8424 = vst [vmem:[#allocation6_spill] sm:$0xff] %v7154_v27  ;;  %v5030_v35 = vrot.slane %v1182_v59, 9  ;;  %v1248_v4 = vrot.slane %v7078_v9, 5  ;;  %v1255_v12 = vrot.slane %v7114_v1, 5  ;;  %v1186_v8 = vld [vmem:[%s6581_s11 + $0x3c] sm:$0xe] }
  0xa5   : > { %v5272_v40 = vcombine.low %v2898_v31, %v2901_v38  ;;  %v2281_v49 = vor.u32 %v2280_v36, %v7154_v27  ;;  %v7174_v51 = vrot.slane %v2284_v47, 5  ;;  %v5006_v58 = vcombine.low %v6827_v0, %v6840_v29  ;;  %v1187_v31 = vld [vmem:[%s6581_s11 + $0x48] sm:$0xe]  ;;  %v6357_v59 = vld [vmem:[%s6581_s11 + $0x38] sm:$0x1] }
  0xa6   : > { %5853 = vmatmul.mubr.msk.bf16.gmra.mrb[20].mxu0 %vm675_vm3, %v5268_v60  ;;  %v5004_v60 = vcombine.low %v6775_v24, %v6781_v37  ;;  %v6354_v24 = vld [vmem:[%s6581_s11 + $0x14] sm:$0x1]  ;;  %v4089_v54 = vsel %vm724_vm0, %v6898_v22, 0  ;;  %v5007_v61 = vcombine.low %v6859_v53, %v6866_v16  ;;  %v5008_v6 = vcombine.low %v6885_v39, %v6893_v43  ;;  %v6355_v16 = vld [vmem:[%s6581_s11 + $0x20] sm:$0x1] }
  0xa7   : > { %5701 = vmatmul.mubr.msk.bf16.gmra.mrb[4].mxu1 %vm675_vm3, %v5000_v28  ;;  %5856 = vmatprep.mubr.msk.bf16.mxu0 %vm675_vm3, %v5269_v20  ;;  %v1241_v28 = vrot.slane %v7071_v34, 5  ;;  %v6301_v20 = vld [vmem:[%s6581_s11 + $0x18] sm:$0xff]   ;;  %v6353_v34 = vld [vmem:[%s6581_s11 + $0x8] sm:$0x1]  ;;  %v1244_v37 = vrot.slane %v6354_v24, 5  ;;  %8425 = vst [vmem:[#allocation7_spill] sm:$0xff] %v7174_v51  ;;  %v5009_v9 = vcombine.low %v6917_v5, %v6929_v30 }
  0xa8   : > { %5704 = vmatprep.mubr.msk.bf16.mxu1 %vm675_vm3, %v5001_v48  ;;  %v1234_v48 = vrot.slane %v7037_v15, 5  ;;  %v1237_v50 = vrot.slane %v6353_v34, 5  ;;  %v1183_v15 = vld [vmem:[%s6581_s11 + $0x18] sm:$0xe]  ;;  %v7179_v63 = vrot.slane %v2281_v49, 4  ;;  %v1251_v22 = vrot.slane %v6355_v16, 5 }
  0xa9   : > { %v1243_v55 = vrot.slane %v1241_v28, 4  ;;  %v5031_v1 = vrot.slane %v1183_v15, 9  ;;  %v7201_v29 = vsel %vm6833_vm7, %v5030_v35, %v1241_v28  ;;  %v1257_v25 = vrot.slane %v1255_v12, 4  ;;  %v5354_v24 = vld [vmem:[%s6581_s11 + $0x18] sm:$0xf] }
  0xaa   : > { %v1236_v57 = vrot.slane %v1234_v48, 4  ;;  %8426 = vst [vmem:[#allocation8_spill] sm:$0xff] %v7179_v63  ;;  %v7197_v0 = vsel %vm6833_vm7, %v5029_v19, %v1234_v48  ;;  %v1265_v47 = vrot.slane %v6357_v59, 5  ;;  %v7238_v49 = vsel %vm724_vm0, %v7093_v7, 0  ;;  %v5355_v7 = vld [vmem:[%s6581_s11 + $0x1c] sm:$0xf] }
  0xab   : > { %v7205_v53 = vsel %vm6833_vm7, %v1243_v55, %v1244_v37  ;;  %v7242_v34 = vsel %vm6833_vm7, %v5031_v1, %v1248_v4  ;;  %v6307_v37 = vld [vmem:[%s6581_s11 + $0x3c] sm:$0xff]   ;;  %v5034_v35 = vrot.slane %v1186_v8, 9  ;;  %v6358_v55 = vld [vmem:[%s6581_s11 + $0x44] sm:$0x1]  ;;  %v3610_v8 = vshll.u32 %v5354_v24, 16 }
  0xac   : > { %v7216_v23 = vsel %vm6833_vm7, %v1236_v57, %v1237_v50  ;;  %v1188_v50 = vld [vmem:[%s6581_s11 + $0x54] sm:$0xe]  ;;  %v1272_v15 = vrot.slane %v6358_v55, 5  ;;  %v5358_v39 = vld [vmem:[%s6581_s11 + $0x28] sm:$0xf] }
  0xad   : > { %v6365_v5 = vld [vmem:[%s6581_s11 + $0x70] sm:$0xf] }
  0xae   : > { %5857 = vmatmul.mubr.msk.bf16.gmra.mrb[24].mxu0 %vm675_vm3, %v5270_v2  ;;  %v1184_v2 = vld [vmem:[%s6581_s11 + $0x24] sm:$0xe]  ;;  %v1297_v30 = vrot.slane %v6365_v5, 5 }
  0xaf   : > { %5705 = vmatmul.mubr.msk.bf16.gmra.mrb[8].mxu1 %vm675_vm3, %v5002_v10  ;;  %5860 = vmatprep.mubr.msk.bf16.mxu0 %vm675_vm3, %v5271_v11  ;;  %v1262_v10 = vrot.slane %v7119_v26, 5  ;;  %v6305_v11 = vld [vmem:[%s6581_s11 + $0x30] sm:$0xff]   ;;  %v5032_v21 = vrot.slane %v1184_v2, 9 }
  0xb0   : > { %5708 = vmatprep.mubr.msk.bf16.mxu1 %vm675_vm3, %v5003_v18  ;;  %v7212_v26 = vld [vmem:[%s8401_s1 + $0x10] sm:$0x3]  ;;  %v1250_v18 = vrot.slane %v1248_v4, 4  ;;  %v1299_v48 = vrot.slane %v1297_v30, 4 }
  0xb1   : > { %v1264_v45 = vrot.slane %v1262_v10, 4  ;;  %v7249_v19 = vsel %vm6833_vm7, %v5032_v21, %v1255_v12  ;;  %v3620_v21 = vshrl.u32 %v5355_v7, 16 }
  0xb2   : > { %v7258_v4 = vsel %vm6833_vm7, %v1250_v18, %v1251_v22  ;;  %v3607_v22 = vshrl.u32 %v5354_v24, 16  ;;  %v3616_v18 = vshll.u32 %v5355_v7, 16  ;;  %v5357_v24 = vld [vmem:[%s6581_s11 + $0x24] sm:$0xf] }
  0xb3   : > { %v7271_v1 = vsel %vm6833_vm7, %v1264_v45, %v1265_v47 }
  0xb4   : > { %v3609_v43 = vrot.slane %v3607_v22, 4  ;;  %v7313_v7 = vrot.slane %v3616_v18, 5  ;;  %v3634_v22 = vshll.u32 %v5357_v24, 16  ;;  %v3644_v18 = vshrl.u32 %v5358_v39, 16 }
  0xb6   : > { %5861 = vmatmul.mubr.msk.bf16.gmra.mrb[28].mxu0 %vm675_vm3, %v5272_v40  ;;  %v6356_v40 = vld [vmem:[%s6581_s11 + $0x2c] sm:$0x1]  ;;  %v3636_v27 = vrot.slane %v3634_v22, 5 }
  0xb7   : > { %5709 = vmatmul.mubr.msk.bf16.gmra.mrb[12].mxu1 %vm675_vm3, %v5004_v60  ;;  %5866 = vmatprep.mubr.msk.bf16.mxu0 %vm675_vm3, %v6301_v20  ;;  %v1258_v28 = vrot.slane %v6356_v40, 5  ;;  %v1269_v60 = vrot.slane %v7139_v17, 5  ;;  %v6361_v40 = vld [vmem:[%s6581_s11 + $0x50] sm:$0x1]  ;;  %v6366_v17 = vld [vmem:[%s6581_s11 + $0x74] sm:$0x1] }
  0xb8   : > { %5712 = vmatprep.mubr.msk.bf16.mxu1 %vm675_vm3, %v5005_v44  ;;  %v5033_v44 = vrot.slane %v1185_v41, 9  ;;  %v5036_v41 = vrot.slane %v1188_v50, 9  ;;  %v1189_v50 = vld [vmem:[%s6581_s11 + $0x60] sm:$0xe]  ;;  %v5359_v20 = vld [vmem:[%s6581_s11 + $0x2c] sm:$0x1] }
  0xb9   : > { %v1271_v12 = vrot.slane %v1269_v60, 4  ;;  %v7284_v45 = vsel %vm6833_vm7, %v5034_v35, %v1269_v60  ;;  %v6362_v35 = vld [vmem:[%s6581_s11 + $0x5c] sm:$0x1] }
  0xba   : > { %v7267_v2 = vsel %vm6833_vm7, %v5033_v44, %v1262_v10  ;;  %v1286_v55 = vrot.slane %v6362_v35, 5  ;;  %v1190_v35 = vld [vmem:[%s6581_s11 + $0x6c] sm:$0xe] }
  0xbb   : > { %v7288_v59 = vsel %vm6833_vm7, %v1271_v12, %v1272_v15  ;;  %v6363_v15 = vld [vmem:[%s6581_s11 + $0x64] sm:$0xf]  ;;  %v3622_v12 = vrot.slane %v3620_v21, 4  ;;  %v5038_v5 = vrot.slane %v1190_v35, 9 }
  0xbc   : > { %v6313_v21 = vld [vmem:[%s6581_s11 + $0x60] sm:$0xff]  }
  0xbe   : > { %5867 = vmatmul.mubr.msk.bf16.vlgmr.msra.gmra.mrb[0].mxu0 %vm675_vm3, %v6303_v62  ;;  %v6359_v62 = vld [vmem:[%s6581_s11 + $0x4c] sm:$0xf] }
  0xbf   : > { %5713 = vmatmul.mubr.msk.bf16.gmra.mrb[16].mxu1 %vm675_vm3, %v5006_v58  ;;  %5899 = vmatpush3.bf16.msra.mxu0 %v4089_v54  ;;  %v1276_v57 = vrot.slane %v6359_v62, 5  ;;  %v7262_v58 = vsel %vm6833_vm7, %v1257_v25, %v1258_v28  ;;  %v5035_v54 = vrot.slane %v1187_v31, 9  ;;  %v1279_v28 = vrot.slane %v6361_v40, 5 }
  0xc0   : > { %5716 = vmatprep.mubr.msk.bf16.mxu1 %vm675_vm3, %v5007_v61  ;;  %5870 = vmatprep.mubr.msk.bf16.mxu0 %vm675_vm3, %v6305_v11  ;;  %v6309_v61 = vld [vmem:[%s6581_s11 + $0x48] sm:$0xff]   ;;  %v6360_v11 = vld [vmem:[%s6581_s11 + $0x58] sm:$0xf]  ;;  %v1290_v62 = vrot.slane %v6363_v15, 5  ;;  %v5361_v15 = vld [vmem:[%s6581_s11 + $0x34] sm:$0xf] }
  0xc1   : > { %6233 = vmatprep.subr.msk.bf16.mxu0 %vm724_vm0, %v7212_v26  ;;  %v1283_v16 = vrot.slane %v6360_v11, 5  ;;  %v1278_v31 = vrot.slane %v1276_v57, 4  ;;  %v7292_v47 = vsel %vm6833_vm7, %v5035_v54, %v1276_v57  ;;  %v5356_v57 = vld [vmem:[%s6581_s11 + $0x20] sm:$0x1]  ;;  %v5360_v54 = vld [vmem:[%s6581_s11 + $0x30] sm:$0xf] }
  0xc2   : > { %v5037_v11 = vrot.slane %v1189_v50, 9  ;;  %v3658_v50 = vshll.u32 %v5360_v54, 16  ;;  %v3626_v25 = vshll.u32 %v5356_v57, 16  ;;  %v3664_v36 = vshll.u32 %v5361_v15, 16 }
  0xc3   : > { %v7303_v60 = vsel %vm6833_vm7, %v5036_v41, %v1283_v16  ;;  %v7319_v41 = vsel %vm6833_vm7, %v1278_v31, %v1279_v28  ;;  %v1292_v31 = vrot.slane %v1290_v62, 4  ;;  %v3655_v28 = vshrl.u32 %v5360_v54, 16 }
  0xc4   : > { %v7361_v35 = vrot.slane %v3664_v36, 5 }
  0xc6   : > { %5871 = vmatmul.mubr.msk.bf16.gmra.mrb[4].mxu0 %vm675_vm3, %v6307_v37  ;;  %v1285_v37 = vrot.slane %v1283_v16, 4  ;;  %v6364_v16 = vld [vmem:[%s6581_s11 + $0x68] sm:$0x1] }
  0xc7   : > { %5717 = vmatmul.mubr.msk.bf16.gmra.mrb[20].mxu1 %vm675_vm3, %v5008_v6  ;;  %5874 = vmatprep.mubr.msk.bf16.mxu0 %vm675_vm3, %v6309_v61  ;;  %v3612_v6 = vrot.slane %v3610_v8, 5  ;;  %v6311_v61 = vld [vmem:[%s6581_s11 + $0x54] sm:$0xff]   ;;  %v1293_v40 = vrot.slane %v6364_v16, 5  ;;  %v3640_v8 = vshll.u32 %v5358_v39, 16  ;;  %v3623_v16 = vor.u32 %v3622_v12, %v7313_v7 }
  0xc8   : > { %5720 = vmatprep.mubr.msk.bf16.mxu1 %vm675_vm3, %v5009_v9  ;;  %v3631_v9 = vshrl.u32 %v5357_v24, 16  ;;  %v7328_v44 = vsel %vm6833_vm7, %v1285_v37, %v1286_v55  ;;  %v1300_v24 = vrot.slane %v6366_v17, 5  ;;  %v3668_v39 = vshrl.u32 %v5361_v15, 16 }
  0xc9   : > { %v3613_v10 = vor.u32 %v3612_v6, %v3609_v43  ;;  %v7334_v37 = vrot.slane %v3640_v8, 5  ;;  %v3646_v55 = vrot.slane %v3644_v18, 4  ;;  %v8427_v43 = vcombine.low %v6938_v52, %v6949_v46  ;;  %v6367_v8 = vld [vmem:[%s6581_s11 + $0x7c] sm:$0xf]  ;;  %v7370_v18 = vld [vmem:[%s6581_s11 + $0x38] sm:$0x1] }
  0xca   : > { %v3633_v38 = vrot.slane %v3631_v9, 4  ;;  %v7343_v17 = vsel %vm6833_vm7, %v5037_v11, %v1290_v62  ;;  %v7347_v57 = vsel %vm6833_vm7, %v1292_v31, %v1293_v40  ;;  %v3657_v6 = vrot.slane %v3655_v28, 4  ;;  %8429 = vst [vmem:[#allocation9_spill] sm:$0xff] %v7370_v18 }
  0xcb   : > { %v3660_v12 = vrot.slane %v3658_v50, 5  ;;  %v8428_v52 = vcombine.low %v6970_v33, %v6975_v56  ;;  %v3614_v46 = vrot.slane %v3613_v10, 4  ;;  %v3624_v54 = vrot.slane %v3623_v16, 4  ;;  %v6315_v33 = vld [vmem:[%s6581_s11 + $0x6c] sm:$0xff]   ;;  %v1192_v16 = vld [vmem:[%s6581_s11 + $0x84] sm:$0xe] }
  0xcc   : > { %v3650_v62 = vshll.u32 %v5359_v20, 16  ;;  %v7355_v11 = vsel %vm6833_vm7, %v5038_v5, %v1297_v30  ;;  %v7359_v40 = vsel %vm6833_vm7, %v1299_v48, %v1300_v24  ;;  %v3670_v9 = vrot.slane %v3668_v39, 4  ;;  %v6316_v48 = vld [vmem:[%s6581_s11 + $0x78] sm:$0xff]  }
  0xcd   : > { %v3637_v10 = vor.u32 %v3636_v27, %v3633_v38  ;;  %v3647_v20 = vor.u32 %v3646_v55, %v7334_v37  ;;  %v1304_v30 = vrot.slane %v6367_v8, 5  ;;  %v3661_v38 = vor.u32 %v3660_v12, %v3657_v6  ;;  %v5363_v5 = vld [vmem:[%s6581_s11 + $0x3c] sm:$0xf] }
  0xce   : > { %5875 = vmatmul.mubr.msk.bf16.gmra.mrb[8].mxu0 %vm675_vm3, %v6311_v61  ;;  %v3628_v61 = vrot.slane %v3626_v25, 5  ;;  %v1191_v25 = vld [vmem:[%s6581_s11 + $0x78] sm:$0xe]  ;;  %v7386_v50 = vrot.slane %v3650_v62, 5  ;;  %v3671_v39 = vor.u32 %v3670_v9, %v7361_v35  ;;  %v3674_v55 = vshll.u32 %v7370_v18, 16 }
  0xcf   : > { %5721 = vmatmul.mubr.msk.bf16.gmra.mrb[24].mxu1 %vm675_vm3, %v8427_v43  ;;  %5878 = vmatprep.mubr.msk.bf16.mxu0 %vm675_vm3, %v6313_v21  ;;  %v3619_v21 = vsel %vm6607_vm4, %v3614_v46, %v7313_v7  ;;  %v5039_v24 = vrot.slane %v1191_v25, 9  ;;  %v6368_v43 = vld [vmem:[%s6581_s11 + $0x88] sm:$0xf]  ;;  %v7394_v7 = vld [vmem:[%s6581_s11 + $0x40] sm:$0xf]  ;;  %v3638_v12 = vrot.slane %v3637_v10, 4  ;;  %v8431_v62 = vcombine.low %v6990_v14, %v6999_v42 }
  0xd0   : > { %5724 = vmatprep.mubr.msk.bf16.mxu1 %vm675_vm3, %v8428_v52  ;;  %v3629_v31 = vsel %vm6607_vm4, %v3624_v54, %v3628_v61  ;;  %v1311_v6 = vrot.slane %v6368_v43, 5  ;;  %8430 = vst [vmem:[#allocation10_spill] sm:$0xff] %v7394_v7  ;;  %v3648_v52 = vrot.slane %v3647_v20, 4  ;;  %v1306_v46 = vrot.slane %v1304_v30, 4  ;;  %v6369_v54 = vld [vmem:[%s6581_s11 + $0x80] sm:$0x1] }
  0xd1   : > { %v1307_v61 = vrot.slane %v6369_v54, 5  ;;  %v3662_v9 = vrot.slane %v3661_v38, 4  ;;  %v5040_v25 = vrot.slane %v1192_v16, 9  ;;  %v3679_v8 = vshrl.u32 %v5363_v5, 16  ;;  %v6317_v10 = vld [vmem:[%s6581_s11 + $0x84] sm:$0xff]  }
  0xd2   : > { %v3682_v43 = vshll.u32 %v5363_v5, 16  ;;  %v7408_v20 = vcombine.low %v3619_v21, %v3629_v31  ;;  %v7412_v14 = vsel %vm724_vm0, %v7212_v26, 0  ;;  %v3692_v38 = vshrl.u32 %v7394_v7, 16  ;;  %v6318_v21 = vld [vmem:[%s6581_s11 + $0x90] sm:$0xff]   ;;  %v6374_v18 = vld [vmem:[%s6581_s11 + $0xa0] sm:$0xf] }
  0xd3   : > { %v3672_v16 = vrot.slane %v3671_v39, 4  ;;  %v3676_v5 = vrot.slane %v3674_v55, 5  ;;  %v1313_v54 = vrot.slane %v1311_v6, 4  ;;  %v3643_v31 = vsel %vm6607_vm4, %v3638_v12, %v7334_v37 }
  0xd4   : > { %v3653_v26 = vsel %vm6607_vm4, %v3648_v52, %v7386_v50  ;;  %v7427_v39 = vsel %vm6833_vm7, %v5039_v24, %v1304_v30  ;;  %v7431_v55 = vsel %vm6833_vm7, %v1306_v46, %v1307_v61  ;;  %v3667_v37 = vsel %vm6607_vm4, %v3662_v9, %v7361_v35  ;;  %v5369_v30 = vld [vmem:[%s6581_s11 + $0x54] sm:$0xf]  ;;  %v7448_v24 = vld [vmem:[%s6581_s11 + $0x58] sm:$0xf]  ;;  %v7453_v61 = vld [vmem:[%s6581_s11 + $0x90] sm:$0xe] }
  0xd5   : > { %v7444_v12 = vsel %vm6833_vm7, %v5040_v25, %v1311_v6  ;;  %v3681_v50 = vrot.slane %v3679_v8, 4  ;;  %v3684_v52 = vrot.slane %v3682_v43, 5  ;;  %v3694_v46 = vrot.slane %v3692_v38, 4 }
  0xd6   : > { %5879 = vmatmul.mubr.msk.bf16.gmra.mrb[12].mxu0 %vm675_vm3, %v6315_v33  ;;  %v8432_v33 = vcombine.low %v7197_v0, %v7216_v23  ;;  %v6370_v0 = vld [vmem:[%s6581_s11 + $0x8c] sm:$0x1]  ;;  %v3677_v36 = vsel %vm6607_vm4, %v3672_v16, %v3676_v5  ;;  %v3727_v25 = vshrl.u32 %v5369_v30, 16  ;;  %v3730_v8 = vshll.u32 %v5369_v30, 16 }
  0xd7   : > { %5725 = vmatmul.mubr.msk.bf16.gmra.mrb[28].mxu1 %vm675_vm3, %v8431_v62  ;;  %5882 = vmatprep.mubr.msk.bf16.mxu0 %vm675_vm3, %v6316_v48  ;;  %v3688_v48 = vshll.u32 %v7394_v7, 16  ;;  %v1314_v23 = vrot.slane %v6370_v0, 5  ;;  %v5366_v62 = vld [vmem:[%s6581_s11 + $0x48] sm:$0xf]  ;;  %v7437_v0 = vld [vmem:[%s6581_s11 + $0x4c] sm:$0xf]  ;;  %v8434_v38 = vcombine.low %v7201_v29, %v7205_v53  ;;  %v7471_v16 = vcombine.low %v3643_v31, %v3653_v26 }
  0xd8   : > { %5730 = vmatprep.mubr.msk.bf16.mxu1 %vm675_vm3, %v8432_v33  ;;  %v7434_v33 = vld [vmem:[%s6581_s11 + $0x44] sm:$0x1]  ;;  %v3703_v27 = vshrl.u32 %v5366_v62, 16  ;;  %v3706_v15 = vshll.u32 %v5366_v62, 16  ;;  %v3712_v6 = vshll.u32 %v7437_v0, 16  ;;  %v3716_v9 = vshrl.u32 %v7437_v0, 16 }
  0xd9   : > { %8433 = vst [vmem:[#allocation11_spill] sm:$0xff] %v7434_v33  ;;  %v7450_v28 = vrot.slane %v3688_v48, 5  ;;  %v7459_v35 = vsel %vm6833_vm7, %v1313_v54, %v1314_v23  ;;  %v3736_v43 = vshll.u32 %v7448_v24, 16  ;;  %v3740_v48 = vshrl.u32 %v7448_v24, 16  ;;  %v5372_v31 = vld [vmem:[%s6581_s11 + $0x60] sm:$0xf] }
  0xda   : > { %v3698_v5 = vshll.u32 %v7434_v33, 16  ;;  %v5041_v54 = vrot.slane %v7453_v61, 9  ;;  %v8435_v23 = vcombine.low %v7242_v34, %v7258_v4  ;;  %v7482_v29 = vcombine.low %v3667_v37, %v3677_v36  ;;  %v6319_v26 = vld [vmem:[%s6581_s11 + $0x9c] sm:$0xff]   ;;  %v6320_v30 = vld [vmem:[%s6581_s11 + $0xa8] sm:$0xff]  }
  0xdb   : > { %v3685_v53 = vor.u32 %v3684_v52, %v3681_v50  ;;  %v3705_v62 = vrot.slane %v3703_v27, 4  ;;  %v7493_v34 = vrot.slane %v3712_v6, 5  ;;  %v3718_v4 = vrot.slane %v3716_v9, 4  ;;  %v6371_v36 = vld [vmem:[%s8401_s1 + $0x8] sm:$0x3] }
  0xdc   : > { %v3729_v27 = vrot.slane %v3727_v25, 4  ;;  %v3732_v37 = vrot.slane %v3730_v8, 5  ;;  %v7502_v50 = vrot.slane %v3736_v43, 5  ;;  %v3742_v52 = vrot.slane %v3740_v48, 4  ;;  %v6372_v6 = vld [vmem:[%s6581_s11 + $0x94] sm:$0xf] }
  0xdd   : > { %v7508_v9 = vld [vmem:[%s6581_s11 + $0x64] sm:$0xf]  ;;  %v3751_v61 = vshrl.u32 %v5372_v31, 16  ;;  %v7510_v22 = vrot.slane %v3685_v53, 4  ;;  %v1325_v25 = vrot.slane %v6374_v18, 5  ;;  %v3719_v43 = vor.u32 %v3718_v4, %v7493_v34 }
  0xde   : > { %5883 = vmatmul.mubr.msk.bf16.gmra.mrb[16].mxu0 %vm675_vm3, %v6317_v10  ;;  %8436 = vst [vmem:[#allocation12_spill] sm:$0xff] %v7508_v9  ;;  %v3754_v10 = vshll.u32 %v5372_v31, 16  ;;  %v3733_v31 = vor.u32 %v3732_v37, %v3729_v27  ;;  %v3743_v53 = vor.u32 %v3742_v52, %v7502_v50  ;;  %v8437_v18 = vcombine.low %v7249_v19, %v7262_v58  ;;  %v6321_v37 = vld [vmem:[%s6581_s11 + $0xb4] sm:$0xff]  }
  0xdf   : > { %5731 = vmatmul.mubr.msk.bf16.vlgmr.msra.gmra.mrb[0].mxu1 %vm675_vm3, %v8434_v38  ;;  %5886 = vmatprep.mubr.msk.bf16.mxu0 %vm675_vm3, %v6318_v21  ;;  %v3708_v21 = vrot.slane %v3706_v15, 5  ;;  %v7491_v38 = vld [vmem:[%s6581_s11 + $0x50] sm:$0x1]  ;;  %v7500_v15 = vld [vmem:[%s6581_s11 + $0x5c] sm:$0x1]  ;;  %v8438_v27 = vcombine.low %v7267_v2, %v7271_v1  ;;  %v1327_v52 = vrot.slane %v1325_v25, 4 }
  0xe0   : > { %5763 = vmatpush3.bf16.msra.mxu1 %v7238_v49  ;;  %5734 = vmatprep.mubr.msk.bf16.mxu1 %vm675_vm3, %v8435_v23  ;;  %v3695_v49 = vor.u32 %v3694_v46, %v7450_v28  ;;  %v7504_v46 = vrot.slane %v3698_v5, 5  ;;  %v1318_v23 = vrot.slane %v6372_v6, 5  ;;  %v3722_v48 = vshll.u32 %v7491_v38, 16  ;;  %v1194_v5 = vld [vmem:[%s6581_s11 + $0x9c] sm:$0xe] }
  0xe1   : > { %6229 = vmatprep.subr.msk.bf16.mxu1 %vm724_vm0, %v6371_v36  ;;  %v6373_v36 = vld [vmem:[%s6581_s11 + $0x98] sm:$0x1]  ;;  %v3709_v7 = vor.u32 %v3708_v21, %v3705_v62  ;;  %v3746_v6 = vshll.u32 %v7500_v15, 16  ;;  %v3764_v62 = vshrl.u32 %v7508_v9, 16  ;;  %v3756_v4 = vrot.slane %v3754_v10, 5 }
  0xe2   : > { %v1321_v33 = vrot.slane %v6373_v36, 5  ;;  %v3696_v8 = vrot.slane %v3695_v49, 4  ;;  %v3760_v36 = vshll.u32 %v7508_v9, 16  ;;  %v7529_v21 = vsel %vm6833_vm7, %v5041_v54, %v1318_v23  ;;  %v7540_v2 = vld [vmem:[%s6581_s11 + $0x68] sm:$0x1] }
  0xe3   : > { %v3753_v49 = vrot.slane %v3751_v61, 4  ;;  %v3710_v19 = vrot.slane %v3709_v7, 4  ;;  %v5042_v58 = vrot.slane %v1194_v5, 9  ;;  %v3720_v3 = vrot.slane %v3719_v43, 4  ;;  %8439 = vst [vmem:[#allocation13_spill] sm:$0xff] %v7540_v2  ;;  %v6322_v5 = vld [vmem:[%s6581_s11 + $0xc0] sm:$0xff]  }
  0xe4   : > { %v3724_v54 = vrot.slane %v3722_v48, 5  ;;  %v3748_v63 = vrot.slane %v3746_v6, 5  ;;  %v1332_v61 = vrot.slane %v6975_v56, 5  ;;  %v3734_v10 = vrot.slane %v3733_v31, 4  ;;  %v1196_v31 = vld [vmem:[%s6581_s11 + $0xb4] sm:$0xe] }
  0xe5   : > { %v3744_v51 = vrot.slane %v3743_v53, 4  ;;  %v7542_v1 = vrot.slane %v3760_v36, 5  ;;  %v3766_v7 = vrot.slane %v3764_v62, 4  ;;  %v3691_v43 = vsel %vm6607_vm4, %v7510_v22, %v7450_v28  ;;  %v6376_v62 = vld [vmem:[%s6581_s11 + $0xb0] sm:$0x1] }
  0xe6   : > { %5887 = vmatmul.mubr.msk.bf16.gmra.mrb[20].mxu0 %vm675_vm3, %v6319_v26  ;;  %v1320_v26 = vrot.slane %v1318_v23, 4  ;;  %v1195_v23 = vld [vmem:[%s6581_s11 + $0xa8] sm:$0xe]  ;;  %v3701_v48 = vsel %vm6607_vm4, %v3696_v8, %v7504_v46  ;;  %v3757_v6 = vor.u32 %v3756_v4, %v3753_v49  ;;  %v3715_v53 = vsel %vm6607_vm4, %v3710_v19, %v7493_v34  ;;  %v5375_v46 = vld [vmem:[%s6581_s11 + $0x6c] sm:$0xf] }
  0xe7   : > { %5735 = vmatmul.mubr.msk.bf16.gmra.mrb[4].mxu1 %vm675_vm3, %v8437_v18  ;;  %5890 = vmatprep.mubr.msk.bf16.mxu0 %vm675_vm3, %v6320_v30  ;;  %v6375_v18 = vld [vmem:[%s6581_s11 + $0xa4] sm:$0x1]  ;;  %v7562_v36 = vsel %vm6833_vm7, %v5042_v58, %v1325_v25  ;;  %v5043_v28 = vrot.slane %v1195_v23, 9  ;;  %v1334_v8 = vrot.slane %v1332_v61, 4  ;;  %v3770_v49 = vshll.u32 %v7540_v2, 16 }
  0xe8   : > { %5738 = vmatprep.mubr.msk.bf16.mxu1 %vm675_vm3, %v8438_v27  ;;  %v1328_v30 = vrot.slane %v6375_v18, 5  ;;  %v7554_v56 = vsel %vm6833_vm7, %v1320_v26, %v1321_v33  ;;  %v3725_v33 = vsel %vm6607_vm4, %v3720_v3, %v3724_v54  ;;  %v1335_v26 = vrot.slane %v6376_v62, 5  ;;  %v5378_v18 = vld [vmem:[%s6581_s11 + $0x78] sm:$0xf]  ;;  %v7617_v54 = vld [vmem:[%s6581_s11 + $0xbc] sm:$0x1] }
  0xe9   : > { %v3739_v34 = vsel %vm6607_vm4, %v3734_v10, %v7502_v50  ;;  %v3749_v25 = vsel %vm6607_vm4, %v3744_v51, %v3748_v63  ;;  %v3767_v4 = vor.u32 %v3766_v7, %v7542_v1  ;;  %v5044_v27 = vrot.slane %v1196_v31, 9  ;;  %v7591_v51 = vld [vmem:[%s6581_s11 + $0x70] sm:$0xf]  ;;  %v7621_v10 = vld [vmem:[%s6581_s11 + $0x7c] sm:$0xf] }
  0xea   : > { %v7566_v22 = vsel %vm6833_vm7, %v1327_v52, %v1328_v30  ;;  %v8441_v3 = vcombine.low %v7284_v45, %v7288_v59  ;;  %v7587_v19 = vrot.slane %v3757_v6, 4  ;;  %v1339_v50 = vrot.slane %v6999_v42, 5  ;;  %8442 = vst [vmem:[#allocation15_spill] sm:$0xff] %v7591_v51  ;;  %8444 = vst [vmem:[#allocation16_spill] sm:$0xff] %v7621_v10  ;;  %v5381_v7 = vld [vmem:[%s6581_s11 + $0x84] sm:$0xf] }
  0xeb   : > { %8440 = vst [vmem:[#allocation14_spill] sm:$0xff] %v7566_v22  ;;  %v3775_v63 = vshrl.u32 %v5375_v46, 16  ;;  %v8443_v45 = vcombine.low %v7292_v47, %v7319_v41  ;;  %v7599_v58 = vcombine.low %v3715_v53, %v3725_v33  ;;  %v7605_v42 = vsel %vm6833_vm7, %v5043_v28, %v1332_v61  ;;  %v6323_v61 = vld [vmem:[%s6581_s11 + $0xcc] sm:$0xff]   ;;  %v7633_v31 = vld [vmem:[%s6581_s11 + $0x88] sm:$0xf] }
  0xec   : > { %v7608_v30 = vcombine.low %v3739_v34, %v3749_v25  ;;  %v7612_v47 = vsel %vm6833_vm7, %v1334_v8, %v1335_v26  ;;  %v7614_v41 = vrot.slane %v3770_v49, 5  ;;  %v3784_v6 = vshll.u32 %v7591_v51, 16  ;;  %8445 = vst [vmem:[#allocation17_spill] sm:$0xff] %v7633_v31  ;;  %v5384_v62 = vld [vmem:[%s6581_s11 + $0x90] sm:$0xf] }
  0xed   : > { %v7639_v28 = vrot.slane %v1339_v50, 4  ;;  %v7641_v33 = vrot.slane %v3775_v63, 4  ;;  %v3788_v8 = vshrl.u32 %v7591_v51, 16  ;;  %v3799_v26 = vshrl.u32 %v5378_v18, 16  ;;  %v7648_v25 = vld [vmem:[%s6581_s11 + $0x94] sm:$0xf] }
  0xee   : > { %5891 = vmatmul.mubr.msk.bf16.gmra.mrb[24].mxu0 %vm675_vm3, %v6321_v37  ;;  %v7585_v37 = vcombine.low %v3691_v43, %v3701_v48  ;;  %v7629_v43 = vsel %vm6833_vm7, %v5044_v27, %v1339_v50  ;;  %v3778_v48 = vshll.u32 %v5375_v46, 16  ;;  %v3802_v49 = vshll.u32 %v5378_v18, 16  ;;  %8446 = vst [vmem:[#allocation18_spill] sm:$0xff] %v7648_v25  ;;  %v7686_v2 = vld [vmem:[%s6581_s11 + $0x8c] sm:$0x1] }
  0xef   : > { %5739 = vmatmul.mubr.msk.bf16.gmra.mrb[8].mxu1 %vm675_vm3, %v8441_v3  ;;  %5894 = vmatprep.mubr.msk.bf16.mxu0 %vm675_vm3, %v6322_v5  ;;  %v7625_v5 = vrot.slane %v3767_v4, 4  ;;  %v3808_v46 = vshll.u32 %v7621_v10, 16  ;;  %v3812_v34 = vshrl.u32 %v7621_v10, 16  ;;  %v3823_v4 = vshrl.u32 %v5381_v7, 16 }
  0xf0   : > { %5742 = vmatprep.mubr.msk.bf16.mxu1 %vm675_vm3, %v8443_v45  ;;  %v3826_v27 = vshll.u32 %v5381_v7, 16  ;;  %v3832_v3 = vshll.u32 %v7633_v31, 16  ;;  %v3836_v50 = vshrl.u32 %v7633_v31, 16  ;;  %v7658_v45 = vld [vmem:[%s6581_s11 + $0x74] sm:$0x1]  ;;  %v3780_v18 = vrot.slane %v3778_v48, 5 }
  0xf1   : > { %v3847_v52 = vshrl.u32 %v5384_v62, 16  ;;  %v3850_v53 = vshll.u32 %v5384_v62, 16  ;;  %v8447_v7 = vcombine.low %v7303_v60, %v7328_v44  ;;  %v3790_v59 = vrot.slane %v3788_v8, 4  ;;  %v5387_v48 = vld [vmem:[%s6581_s11 + $0x9c] sm:$0xf] }
  0xf2   : > { %v3856_v63 = vshll.u32 %v7648_v25, 16  ;;  %v3860_v23 = vshrl.u32 %v7648_v25, 16  ;;  %v8448_v62 = vcombine.low %v7343_v17, %v7347_v57  ;;  %v7676_v44 = vld [vmem:[%s6581_s11 + $0x80] sm:$0x1]  ;;  %v3801_v60 = vrot.slane %v3799_v26, 4 }
  0xf3   : > { %8449 = vst [vmem:[#allocation19_spill] sm:$0xff] %v7676_v44  ;;  %v3825_v31 = vrot.slane %v3823_v4, 4  ;;  %v3828_v8 = vrot.slane %v3826_v27, 5  ;;  %v7680_v10 = vrot.slane %v3832_v3, 5  ;;  %v3838_v51 = vrot.slane %v3836_v50, 4 }
  0xf4   : > { %v7683_v25 = vld [vmem:[%s6581_s11 + $0xa0] sm:$0xf]  ;;  %v3849_v17 = vrot.slane %v3847_v52, 4  ;;  %v3852_v57 = vrot.slane %v3850_v53, 5  ;;  %v3874_v9 = vshll.u32 %v5387_v48, 16  ;;  %v3781_v26 = vor.u32 %v3780_v18, %v7641_v33 }
  0xf5   : > { %v3818_v27 = vshll.u32 %v7676_v44, 16  ;;  %v7695_v3 = vld [vmem:[%s6581_s11 + $0x98] sm:$0x1]  ;;  %v3880_v50 = vshll.u32 %v7683_v25, 16  ;;  %v3884_v52 = vshrl.u32 %v7683_v25, 16  ;;  %v3829_v22 = vor.u32 %v3828_v8, %v3825_v31 }
  0xf6   : > { %5895 = vmatmul.mubr.msk.bf16.gmra.mrb[28].mxu0 %vm675_vm3, %v6323_v61  ;;  %v7666_v61 = vrot.slane %v3784_v6, 5  ;;  %v3814_v6 = vrot.slane %v3812_v34, 4  ;;  %v3862_v34 = vrot.slane %v3860_v23, 4  ;;  %v3842_v33 = vshll.u32 %v7686_v2, 16 }
  0xf7   : > { %5743 = vmatmul.mubr.msk.bf16.gmra.mrb[12].mxu1 %vm675_vm3, %v8447_v7  ;;  %5900 = vmatprep.mubr.msk.bf16.mxu0 %vm675_vm3, %v7408_v20  ;;  %v3804_v7 = vrot.slane %v3802_v49, 5  ;;  %v7678_v20 = vrot.slane %v3808_v46, 5  ;;  %v3794_v49 = vshll.u32 %v7658_v45, 16  ;;  %v7690_v46 = vrot.slane %v3856_v63, 5 }
  0xf8   : > { %5746 = vmatprep.mubr.msk.bf16.mxu1 %vm675_vm3, %v8448_v62  ;;  %v3871_v62 = vshrl.u32 %v5387_v48, 16  ;;  %v3791_v4 = vor.u32 %v3790_v59, %v7666_v61  ;;  %v3839_v23 = vor.u32 %v3838_v51, %v7680_v10  ;;  %v3853_v59 = vor.u32 %v3852_v57, %v3849_v17  ;;  %v7728_v57 = vld [vmem:[%s6581_s11 + $0xa4] sm:$0x1] }
  0xf9   : > { %v3805_v53 = vor.u32 %v3804_v7, %v3801_v60  ;;  %v3815_v48 = vor.u32 %v3814_v6, %v7678_v20  ;;  %v3876_v18 = vrot.slane %v3874_v9, 5  ;;  %v8450_v44 = vcombine.low %v7355_v11, %v7359_v40 }
  0xfa   : > { %v3873_v63 = vrot.slane %v3871_v62, 4  ;;  %v8451_v31 = vrot.slane %v7617_v54, 5  ;;  %v3796_v51 = vrot.slane %v3794_v49, 5  ;;  %v3863_v60 = vor.u32 %v3862_v34, %v7690_v46  ;;  %v7731_v34 = vld [vmem:[%s6581_s11 + $0xac] sm:$0xf] }
  0xfb   : > { %v3866_v9 = vshll.u32 %v7695_v3, 16  ;;  %v8452_v11 = vcombine.low %v7427_v39, %v7431_v55  ;;  %v3782_v40 = vrot.slane %v3781_v26, 4  ;;  %v7724_v54 = vrot.slane %v3880_v50, 5 }
  0xfc   : > { %v3806_v7 = vrot.slane %v3805_v53, 4  ;;  %v3816_v6 = vrot.slane %v3815_v48, 4  ;;  %v3820_v8 = vrot.slane %v3818_v27, 5  ;;  %v3844_v17 = vrot.slane %v3842_v33, 5  ;;  %v7741_v48 = vld [vmem:[%s6581_s11 + $0xb0] sm:$0x1] }
  0xfd   : > { %v3830_v39 = vrot.slane %v3829_v22, 4  ;;  %v3840_v55 = vrot.slane %v3839_v23, 4  ;;  %v3854_v62 = vrot.slane %v3853_v59, 4  ;;  %v3877_v49 = vor.u32 %v3876_v18, %v3873_v63 }
  0xfe   : > { %5901 = vmatmul.mubr.msk.bf16.vlgmr.msra.gmra.mrb[0].mxu0 %vm675_vm3, %v7471_v16  ;;  %v7714_v16 = vsel %vm6833_vm7, %v7639_v28, %v8451_v31  ;;  %v3886_v28 = vrot.slane %v3884_v52, 4  ;;  %v3868_v26 = vrot.slane %v3866_v9, 5  ;;  %v3787_v52 = vsel %vm6607_vm4, %v3782_v40, %v7666_v61 }
  0xff   : > { %5747 = vmatmul.mubr.msk.bf16.gmra.mrb[16].mxu1 %vm675_vm3, %v8450_v44  ;;  %5933 = vmatpush3.bf16.msra.mxu0 %v7412_v14  ;;  %v3792_v14 = vrot.slane %v3791_v4, 4  ;;  %v5390_v44 = vld [vmem:[%s6581_s11 + $0xa8] sm:$0xf]  ;;  %v3890_v22 = vshll.u32 %v7728_v57, 16  ;;  %v3811_v33 = vsel %vm6607_vm4, %v3806_v7, %v7678_v20  ;;  %v3821_v23 = vsel %vm6607_vm4, %v3816_v6, %v3820_v8 }
 0x100   : > { %5750 = vmatprep.mubr.msk.bf16.mxu1 %vm675_vm3, %v8452_v11  ;;  %5904 = vmatprep.mubr.msk.bf16.mxu0 %vm675_vm3, %v7482_v29  ;;  %v3864_v29 = vrot.slane %v3863_v60, 4  ;;  %v3895_v4 = vshrl.u32 %v5390_v44, 16  ;;  %v3898_v50 = vshll.u32 %v5390_v44, 16  ;;  %v3887_v53 = vor.u32 %v3886_v28, %v7724_v54  ;;  %v5439_v11 = vld [vmem:[%s6581_s11 + $0x48] sm:$0xe] }
 0x101   : > { %v3797_v27 = vsel %vm6607_vm4, %v3792_v14, %v3796_v51  ;;  %v3904_v59 = vshll.u32 %v7731_v34, 16  ;;  %v3908_v61 = vshrl.u32 %v7731_v34, 16  ;;  %v3835_v63 = vsel %vm6607_vm4, %v3830_v39, %v7680_v10  ;;  %v7806_v39 = vld [vmem:[%s6581_s11 + $0xb8] sm:$0xf] }
 0x102   : > { %v3845_v18 = vsel %vm6607_vm4, %v3840_v55, %v3844_v17  ;;  %v3859_v20 = vsel %vm6607_vm4, %v3854_v62, %v7690_v46  ;;  %v3878_v31 = vrot.slane %v3877_v49, 4  ;;  %v8453_v51 = vcombine.low %v7444_v12, %v7459_v35 }
 0x103   : > { %v3897_v10 = vrot.slane %v3895_v4, 4  ;;  %v3900_v60 = vrot.slane %v3898_v50, 5  ;;  %v3914_v9 = vshll.u32 %v7741_v48, 16  ;;  %v8454_v46 = vcombine.low %v7529_v21, %v7554_v56  ;;  %v5393_v21 = vld [vmem:[%s6581_s11 + $0xb4] sm:$0xf] }
 0x104   : > { %v5060_v12 = vcombine.low %v7605_v42, %v7612_v47  ;;  %v8455_v35 = vsel %vm6607_vm4, %v7625_v5, %v7614_v41  ;;  %v3888_v14 = vrot.slane %v3887_v53, 4  ;;  %v3892_v28 = vrot.slane %v3890_v22, 5  ;;  %v5441_v4 = vld [vmem:[%s6581_s11 + $0x60] sm:$0xe]  ;;  %v5442_v53 = vld [vmem:[%s6581_s11 + $0x6c] sm:$0xe] }
 0x105   : > { %v5061_v56 = vcombine.low %v7629_v43, %v7714_v16  ;;  %v7789_v44 = vcombine.low %v3787_v52, %v3797_v27  ;;  %v7791_v42 = vrot.slane %v3904_v59, 5  ;;  %v3910_v47 = vrot.slane %v3908_v61, 4  ;;  %v8464_v16 = vld [vmem:[#allocation7_spill] sm:$0xff] }
 0x106   : > { %5905 = vmatmul.mubr.msk.bf16.gmra.mrb[4].mxu0 %vm675_vm3, %v7585_v37  ;;  %v3869_v37 = vsel %vm6607_vm4, %v3864_v29, %v3868_v26  ;;  %v7793_v41 = vcombine.low %v3811_v33, %v3821_v23  ;;  %v7795_v5 = vcombine.low %v3835_v63, %v3845_v18  ;;  %v3883_v6 = vsel %vm6607_vm4, %v3878_v31, %v7724_v54  ;;  %v8457_v23 = vld [vmem:[#allocation14_spill] sm:$0xff]  ;;  %v5396_v63 = vld [vmem:[%s6581_s11 + $0xc0] sm:$0xf]  ;;  %v8459_v18 = vld [vmem:[#allocation12_spill] sm:$0xff] }
 0x107   : > { %5751 = vmatmul.mubr.msk.bf16.gmra.mrb[20].mxu1 %vm675_vm3, %v8453_v51  ;;  %5908 = vmatprep.mubr.msk.bf16.mxu0 %vm675_vm3, %v7599_v58  ;;  %v8456_v58 = vsel %vm6607_vm4, %v7587_v19, %v7542_v1  ;;  %v7797_v7 = vcombine.low %v3859_v20, %v3869_v37  ;;  %v5455_v1 = vrot.slane %v5439_v11, 9  ;;  %v5440_v19 = vld [vmem:[%s6581_s11 + $0x54] sm:$0xe]  ;;  %v3901_v8 = vor.u32 %v3900_v60, %v3897_v10 }
 0x108   : > { %5754 = vmatprep.mubr.msk.bf16.mxu1 %vm675_vm3, %v8454_v46  ;;  %v5409_v40 = vcombine.low %v8456_v58, %v8455_v35  ;;  %v7803_v17 = vrot.slane %v3914_v9, 5  ;;  %v3919_v55 = vshrl.u32 %v5393_v21, 16  ;;  %v3893_v62 = vsel %vm6607_vm4, %v3888_v14, %v3892_v28  ;;  %v8460_v31 = vld [vmem:[#allocation13_spill] sm:$0xff]  ;;  %v8461_v9 = vld [vmem:[#allocation15_spill] sm:$0xff]  ;;  %v7855_v35 = vld [vmem:[%s6581_s11 + $0xbc] sm:$0x1] }
 0x109   : > { %v3922_v49 = vshll.u32 %v5393_v21, 16  ;;  %v4378_v29 = vrot.slane %v7437_v0, 5  ;;  %v4381_v26 = vrot.slane %v7491_v38, 5  ;;  %v3911_v50 = vor.u32 %v3910_v47, %v7791_v42  ;;  %v7858_v58 = vld [vmem:[%s6581_s11 + $0xc4] sm:$0xf] }
 0x10a   : > { %v5456_v52 = vrot.slane %v5440_v19, 9  ;;  %v4385_v54 = vrot.slane %v7448_v24, 5  ;;  %v4388_v27 = vrot.slane %v7500_v15, 5  ;;  %v3928_v22 = vshll.u32 %v7806_v39, 16  ;;  %v5443_v19 = vld [vmem:[%s6581_s11 + $0x78] sm:$0xe] }
 0x10b   : > { %v3932_v33 = vshrl.u32 %v7806_v39, 16  ;;  %v7823_v0 = vsel %vm6833_vm7, %v5455_v1, %v4378_v29  ;;  %v4380_v38 = vrot.slane %v4378_v29, 4  ;;  %v8458_v59 = vcombine.low %v7562_v36, %v8457_v23  ;;  %v8462_v23 = vld [vmem:[#allocation16_spill] sm:$0xff] }
 0x10c   : > { %v7830_v24 = vcombine.low %v3883_v6, %v3893_v62  ;;  %v7834_v15 = vsel %vm6833_vm7, %v5456_v52, %v4385_v54  ;;  %v5457_v61 = vrot.slane %v5441_v4, 9  ;;  %v4392_v20 = vrot.slane %v8459_v18, 5  ;;  %v6324_v6 = vld [vmem:[%s6581_s11 + $0xc] sm:$0xff]  }
 0x10d   : > { %v7840_v36 = vsel %vm6833_vm7, %v4380_v38, %v4381_v26  ;;  %v4395_v51 = vrot.slane %v8460_v31, 5  ;;  %v5458_v37 = vrot.slane %v5442_v53, 9  ;;  %v4399_v11 = vrot.slane %v8461_v9, 5 }
 0x10e   : > { %5909 = vmatmul.mubr.msk.bf16.gmra.mrb[8].mxu0 %vm675_vm3, %v7608_v30  ;;  %v4387_v30 = vrot.slane %v4385_v54, 4  ;;  %v5472_v10 = vcombine.low %v7823_v0, %v7840_v36  ;;  %v4402_v46 = vrot.slane %v7658_v45, 5  ;;  %v7864_v14 = vsel %vm6833_vm7, %v5457_v61, %v4392_v20 }
 0x10f   : > { %5755 = vmatmul.mubr.msk.bf16.gmra.mrb[24].mxu1 %vm675_vm3, %v8458_v59  ;;  %5912 = vmatprep.mubr.msk.bf16.mxu0 %vm675_vm3, %v5409_v40  ;;  %v4394_v28 = vrot.slane %v4392_v20, 4  ;;  %v7866_v21 = vrot.slane %v3919_v55, 4  ;;  %v3943_v47 = vshrl.u32 %v5396_v63, 16  ;;  %v7870_v45 = vsel %vm6833_vm7, %v5458_v37, %v4399_v11  ;;  %v5170_v55 = vld [vmem:[%s6581_s11 + $0x78] sm:$0xf]  ;;  %v8463_v59 = vld [vmem:[#allocation19_spill] sm:$0xff] }
 0x110   : > { %5758 = vmatprep.mubr.msk.bf16.mxu1 %vm675_vm3, %v5060_v12  ;;  %v7848_v60 = vsel %vm6833_vm7, %v4387_v30, %v4388_v27  ;;  %v7852_v12 = vrot.slane %v3901_v8, 4  ;;  %v4401_v1 = vrot.slane %v4399_v11, 4  ;;  %v7874_v8 = vrot.slane %v3911_v50, 4 }
 0x111   : > { %v5473_v40 = vcombine.low %v7834_v15, %v7848_v60  ;;  %v7876_v62 = vrot.slane %v3922_v49, 5  ;;  %v3946_v29 = vshll.u32 %v5396_v63, 16  ;;  %v7880_v26 = vsel %vm6833_vm7, %v4394_v28, %v4395_v51  ;;  %v8466_v28 = vld [vmem:[#allocation17_spill] sm:$0xff]  ;;  %v6387_v60 = vld [vmem:[%s6581_s11 + $0xa0] sm:$0xf] }
 0x112   : > { %v7883_v4 = vrot.slane %v3928_v22, 5  ;;  %v7885_v52 = vrot.slane %v3932_v33, 4  ;;  %v5474_v54 = vcombine.low %v7864_v14, %v7880_v26  ;;  %v7891_v27 = vsel %vm6833_vm7, %v4401_v1, %v4402_v46  ;;  %v5444_v33 = vld [vmem:[%s6581_s11 + $0x84] sm:$0xe]  ;;  %v6325_v1 = vld [vmem:[%s6581_s11 + $0x18] sm:$0xff]  }
 0x113   : > { %v3938_v49 = vshll.u32 %v7855_v35, 16  ;;  %v3952_v50 = vshll.u32 %v7858_v58, 16  ;;  %v5475_v53 = vcombine.low %v7870_v45, %v7891_v27  ;;  %v5459_v22 = vrot.slane %v5443_v19, 9  ;;  %v6391_v27 = vld [vmem:[%s6581_s11 + $0xac] sm:$0xf] }
 0x114   : > { %v3945_v38 = vrot.slane %v3943_v47, 4  ;;  %v4409_v30 = vrot.slane %v8463_v59, 5  ;;  %v2265_v61 = vshrl.u32 %v5170_v55, 16  ;;  %v3948_v63 = vrot.slane %v3946_v29, 5  ;;  %v5399_v29 = vld [vmem:[%s6581_s11 + $0xcc] sm:$0xf] }
 0x115   : > { %v3956_v18 = vshrl.u32 %v7858_v58, 16  ;;  %v2268_v43 = vshll.u32 %v5170_v55, 16  ;;  %v5460_v37 = vrot.slane %v5444_v33, 9  ;;  %v3907_v9 = vsel %vm6607_vm4, %v7852_v12, %v7791_v42  ;;  %v7934_v55 = vld [vmem:[%s6581_s11 + $0xd0] sm:$0xf] }
 0x116   : > { %5913 = vmatmul.mubr.msk.bf16.gmra.mrb[12].mxu0 %vm675_vm3, %v7789_v44  ;;  %v4406_v44 = vrot.slane %v8462_v23, 5  ;;  %v2267_v51 = vrot.slane %v2265_v61, 4  ;;  %v3925_v11 = vor.u32 %v7876_v62, %v7866_v21  ;;  %v4413_v47 = vrot.slane %v8466_v28, 5  ;;  %v6326_v21 = vld [vmem:[%s6581_s11 + $0x24] sm:$0xff]  }
 0x117   : > { %5759 = vmatmul.mubr.msk.bf16.gmra.mrb[28].mxu1 %vm675_vm3, %v5061_v56  ;;  %5916 = vmatprep.mubr.msk.bf16.mxu0 %vm675_vm3, %v7793_v41  ;;  %v8465_v56 = vld [vmem:[#allocation8_spill] sm:$0xff]  ;;  %v2270_v46 = vrot.slane %v2268_v43, 5  ;;  %v3917_v19 = vsel %vm6607_vm4, %v7874_v8, %v7803_v17  ;;  %v4416_v12 = vrot.slane %v7686_v2, 5  ;;  %v7942_v62 = vrot.slane %v3952_v50, 5  ;;  %v5445_v8 = vld [vmem:[%s6581_s11 + $0x90] sm:$0xe] }
 0x118   : > { %5764 = vmatprep.mubr.msk.bf16.mxu1 %vm675_vm3, %v6324_v6  ;;  %v2287_v41 = vsel %vm6607_vm4, %v8465_v56, %v8464_v16  ;;  %v7916_v20 = vsel %vm6833_vm7, %v5459_v22, %v4406_v44  ;;  %v4408_v31 = vrot.slane %v4406_v44, 4  ;;  %v3935_v6 = vor.u32 %v7885_v52, %v7883_v4  ;;  %v7948_v52 = vld [vmem:[%s6581_s11 + $0xc8] sm:$0x1]  ;;  %v8468_v16 = vld [vmem:[#allocation5_spill] sm:$0xff] }
 0x119   : > { %v3958_v22 = vrot.slane %v3956_v18, 4  ;;  %v2271_v17 = vor.u32 %v2270_v46, %v2267_v51  ;;  %v3940_v23 = vrot.slane %v3938_v49, 5  ;;  %v3949_v44 = vor.u32 %v3948_v63, %v3945_v38  ;;  %v8469_v51 = vld [vmem:[#allocation6_spill] sm:$0xff] }
 0x11a   : > { %v7938_v42 = vsel %vm6833_vm7, %v4408_v31, %v4409_v30  ;;  %v7952_v59 = vsel %vm6833_vm7, %v5460_v37, %v4413_v47  ;;  %v4415_v30 = vrot.slane %v4413_v47, 4  ;;  %v3967_v2 = vshrl.u32 %v5399_v29, 16 }
 0x11b   : > { %v5476_v33 = vcombine.low %v7916_v20, %v7938_v42  ;;  %v3970_v50 = vshll.u32 %v5399_v29, 16  ;;  %v3976_v61 = vshll.u32 %v7934_v55, 16  ;;  %v2272_v18 = vrot.slane %v2271_v17, 4  ;;  %v6327_v29 = vld [vmem:[%s6581_s11 + $0x30] sm:$0xff]  }
 0x11c   : > { %v3980_v49 = vshrl.u32 %v7934_v55, 16  ;;  %v7963_v38 = vsel %vm6833_vm7, %v4415_v30, %v4416_v12  ;;  %v5461_v63 = vrot.slane %v5445_v8, 9  ;;  %v3959_v56 = vor.u32 %v3958_v22, %v7942_v62 }
 0x11d   : > { %v3962_v31 = vshll.u32 %v7948_v52, 16  ;;  %v5477_v37 = vcombine.low %v7952_v59, %v7963_v38  ;;  %v5415_v46 = vcombine.low %v3907_v9, %v3917_v19  ;;  %v3926_v28 = vrot.slane %v3925_v11, 4  ;;  %v5446_v11 = vld [vmem:[%s6581_s11 + $0x9c] sm:$0xe] }
 0x11e   : > { %5917 = vmatmul.mubr.msk.bf16.gmra.mrb[16].mxu0 %vm675_vm3, %v7795_v5  ;;  %v8467_v5 = vld [vmem:[#allocation18_spill] sm:$0xff]  ;;  %v3936_v47 = vrot.slane %v3935_v6, 4  ;;  %v3950_v12 = vrot.slane %v3949_v44, 4  ;;  %v4423_v8 = vrot.slane %v7695_v3, 5  ;;  %v3969_v30 = vrot.slane %v3967_v2, 4 }
 0x11f   : > { %5765 = vmatmul.mubr.msk.bf16.vlgmr.msra.gmra.mrb[0].mxu1 %vm675_vm3, %v6325_v1  ;;  %5920 = vmatprep.mubr.msk.bf16.mxu0 %vm675_vm3, %v7797_v7  ;;  %v4420_v43 = vrot.slane %v8467_v5, 5  ;;  %v2277_v7 = vsel %vm6607_vm4, %v2272_v18, %v8469_v51  ;;  %v3972_v18 = vrot.slane %v3970_v50, 5  ;;  %v7986_v5 = vrot.slane %v3976_v61, 5  ;;  %v6328_v19 = vld [vmem:[%s6581_s11 + $0x3c] sm:$0xff]  }
 0x120   : > { %5967 = vmatpush3.bf16.msra.mxu1 %v8468_v16  ;;  %5768 = vmatprep.mubr.msk.bf16.mxu1 %vm675_vm3, %v6326_v21  ;;  %v7975_v1 = vcombine.low %v2277_v7, %v2287_v41  ;;  %v7979_v21 = vld [vmem:[%s6581_s11 + $0xd4] sm:$0x1]  ;;  %v3982_v9 = vrot.slane %v3980_v49, 4  ;;  %v3960_v41 = vrot.slane %v3959_v56, 4  ;;  %v3964_v6 = vrot.slane %v3962_v31, 5 }
 0x121   : > { %v7983_v22 = vsel %vm6833_vm7, %v5461_v63, %v4420_v43  ;;  %v4422_v17 = vrot.slane %v4420_v43, 4  ;;  %v3931_v63 = vsel %vm6607_vm4, %v3926_v28, %v7883_v4  ;;  %v3941_v2 = vsel %vm6607_vm4, %v3936_v47, %v3940_v23  ;;  %v6378_v16 = vld [vmem:[%s6581_s11 + $0x1c] sm:$0xf]  ;;  %v5447_v28 = vld [vmem:[%s6581_s11 + $0xa8] sm:$0xe] }
 0x122   : > { %v3986_v50 = vshll.u32 %v7979_v21, 16  ;;  %v5462_v61 = vrot.slane %v5446_v11, 9  ;;  %v4427_v49 = vrot.slane %v7683_v25, 5  ;;  %v3955_v4 = vsel %vm6607_vm4, %v3950_v12, %v7942_v62  ;;  %v5435_v62 = vld [vmem:[%s6581_s11 + $0x18] sm:$0xe]  ;;  %v6329_v47 = vld [vmem:[%s6581_s11 + $0x48] sm:$0xff]  }
 0x123   : > { %v7992_v44 = vsel %vm6833_vm7, %v4422_v17, %v4423_v8  ;;  %v3983_v43 = vor.u32 %v3982_v9, %v7986_v5  ;;  %v4430_v23 = vrot.slane %v7728_v57, 5  ;;  %v3965_v25 = vsel %vm6607_vm4, %v3960_v41, %v3964_v6  ;;  %v6379_v11 = vld [vmem:[%s6581_s11 + $0x20] sm:$0x1] }
 0x124   : > { %v5478_v3 = vcombine.low %v7983_v22, %v7992_v44  ;;  %v4350_v56 = vrot.slane %v6378_v16, 5  ;;  %v8018_v31 = vsel %vm6833_vm7, %v5462_v61, %v4427_v49  ;;  %v4429_v51 = vrot.slane %v4427_v49, 4  ;;  %v5448_v49 = vld [vmem:[%s6581_s11 + $0xb4] sm:$0xe] }
 0x125   : > { %v5416_v7 = vcombine.low %v3931_v63, %v3941_v2  ;;  %v3984_v17 = vrot.slane %v3983_v43, 4  ;;  %v5463_v41 = vrot.slane %v5447_v28, 9  ;;  %v4434_v6 = vrot.slane %v7731_v34, 5  ;;  %v5436_v2 = vld [vmem:[%s6581_s11 + $0x24] sm:$0xe] }
 0x126   : > { %5921 = vmatmul.mubr.msk.bf16.gmra.mrb[20].mxu0 %vm675_vm3, %v7830_v24  ;;  %v3973_v24 = vor.u32 %v3972_v18, %v3969_v30  ;;  %v8023_v57 = vsel %vm6833_vm7, %v4429_v51, %v4430_v23  ;;  %v6330_v30 = vld [vmem:[%s6581_s11 + $0x54] sm:$0xff]   ;;  %v5451_v18 = vrot.slane %v5435_v62, 9  ;;  %v4352_v9 = vrot.slane %v4350_v56, 4  ;;  %v6382_v28 = vld [vmem:[%s6581_s11 + $0x2c] sm:$0x1] }
 0x127   : > { %5769 = vmatmul.mubr.msk.bf16.gmra.mrb[4].mxu1 %vm675_vm3, %v6327_v29  ;;  %5924 = vmatprep.mubr.msk.bf16.mxu0 %vm675_vm3, %v5415_v46  ;;  %v3988_v46 = vrot.slane %v3986_v50, 5  ;;  %v5417_v29 = vcombine.low %v3955_v4, %v3965_v25  ;;  %v5479_v8 = vcombine.low %v8018_v31, %v8023_v57  ;;  %v4437_v63 = vrot.slane %v7741_v48, 5  ;;  %v6380_v50 = vld [vmem:[%s6581_s11 + $0x28] sm:$0xf]  ;;  %v5437_v25 = vld [vmem:[%s6581_s11 + $0x30] sm:$0xe] }
 0x128   : > { %5772 = vmatprep.mubr.msk.bf16.mxu1 %vm675_vm3, %v6328_v19  ;;  %v3974_v12 = vrot.slane %v3973_v24, 4  ;;  %v4353_v19 = vrot.slane %v6379_v11, 5  ;;  %v4357_v61 = vrot.slane %v6380_v50, 5  ;;  %v8046_v48 = vsel %vm6833_vm7, %v5463_v41, %v4434_v6  ;;  %v6332_v11 = vld [vmem:[%s6581_s11 + $0x6c] sm:$0xff]   ;;  %v5449_v50 = vld [vmem:[%s6581_s11 + $0xc0] sm:$0xe] }
 0x129   : > { %v3989_v34 = vsel %vm6607_vm4, %v3984_v17, %v3988_v46  ;;  %v4436_v24 = vrot.slane %v4434_v6, 4  ;;  %v4351_v43 = vsel %vm6833_vm7, %v5451_v18, %v4350_v56  ;;  %v5452_v51 = vrot.slane %v5436_v2, 9  ;;  %v8470_v41 = vld [vmem:[#allocation9_spill] sm:$0xff]  ;;  %v6396_v31 = vld [vmem:[%s6581_s11 + $0xc8] sm:$0x1] }
 0x12a   : > { %v3979_v4 = vsel %vm6607_vm4, %v3974_v12, %v7986_v5  ;;  %v4354_v23 = vsel %vm6833_vm7, %v4352_v9, %v4353_v19  ;;  %v6381_v5 = vld [vmem:[%s6581_s11 + $0x34] sm:$0xf]  ;;  %v6331_v12 = vld [vmem:[%s6581_s11 + $0x60] sm:$0xff]   ;;  %v5453_v18 = vrot.slane %v5437_v25, 9  ;;  %v4444_v9 = vrot.slane %v7855_v35, 5 }
 0x12b   : > { %v4364_v16 = vrot.slane %v6381_v5, 5  ;;  %v8057_v62 = vsel %vm6833_vm7, %v4436_v24, %v4437_v63  ;;  %v5418_v46 = vcombine.low %v3979_v4, %v3989_v34  ;;  %v5468_v17 = vcombine.low %v4351_v43, %v4354_v23  ;;  %v5438_v24 = vld [vmem:[%s6581_s11 + $0x3c] sm:$0xe] }
 0x12c   : > { %v5480_v56 = vcombine.low %v8046_v48, %v8057_v62  ;;  %v4367_v6 = vrot.slane %v8470_v41, 5  ;;  %v4358_v35 = vsel %vm6833_vm7, %v5452_v51, %v4357_v61  ;;  %v5465_v5 = vrot.slane %v5449_v50, 9 }
 0x12d   : > { %v4366_v19 = vrot.slane %v4364_v16, 4  ;;  %v4365_v23 = vsel %vm6833_vm7, %v5453_v18, %v4364_v16  ;;  %v4451_v51 = vrot.slane %v7948_v52, 5  ;;  %v2428_v57 = vshll.u32 %v6396_v31, 16 }
 0x12e   : > { %5925 = vmatmul.mubr.msk.bf16.gmra.mrb[24].mxu0 %vm675_vm3, %v5416_v7  ;;  %v5464_v7 = vrot.slane %v5448_v49, 9 }
 0x12f   : > { %5773 = vmatmul.mubr.msk.bf16.gmra.mrb[8].mxu1 %vm675_vm3, %v6329_v47  ;;  %5928 = vmatprep.mubr.msk.bf16.mxu0 %vm675_vm3, %v5417_v29  ;;  %v4360_v47 = vrot.slane %v6382_v28, 5  ;;  %v4441_v29 = vrot.slane %v7806_v39, 5  ;;  %v8471_v39 = vld [vmem:[#allocation10_spill] sm:$0xff]  ;;  %v4368_v25 = vsel %vm6833_vm7, %v4366_v19, %v4367_v6  ;;  %v5454_v28 = vrot.slane %v5438_v24, 9 }
 0x130   : > { %5776 = vmatprep.mubr.msk.bf16.mxu1 %vm675_vm3, %v6330_v30  ;;  %v4359_v30 = vrot.slane %v4357_v61, 4  ;;  %v4371_v49 = vrot.slane %v8471_v39, 5  ;;  %v4448_v61 = vrot.slane %v7858_v58, 5  ;;  %v6383_v39 = vld [vmem:[%s6581_s11 + $0x70] sm:$0xf]  ;;  %v4455_v24 = vrot.slane %v7934_v55, 5 }
 0x131   : > { %v8069_v63 = vsel %vm6833_vm7, %v5464_v7, %v4441_v29  ;;  %v4443_v2 = vrot.slane %v4441_v29, 4  ;;  %v5167_v7 = vld [vmem:[%s6581_s11 + $0x6c] sm:$0xf]  ;;  %v8472_v29 = vld [vmem:[#allocation11_spill] sm:$0xff] }
 0x132   : > { %v4361_v34 = vsel %vm6833_vm7, %v4359_v30, %v4360_v47  ;;  %v4373_v47 = vrot.slane %v4371_v49, 4  ;;  %v6333_v30 = vld [vmem:[%s6581_s11 + $0x78] sm:$0xff]   ;;  %v8100_v16 = vsel %vm6833_vm7, %v5465_v5, %v4448_v61  ;;  %v4450_v18 = vrot.slane %v4448_v61, 4 }
 0x133   : > { %v8076_v4 = vsel %vm6833_vm7, %v4443_v2, %v4444_v9  ;;  %v5470_v9 = vcombine.low %v4365_v23, %v4368_v25  ;;  %v2241_v19 = vshrl.u32 %v5167_v7, 16  ;;  %v2244_v41 = vshll.u32 %v5167_v7, 16 }
 0x134   : > { %v5481_v43 = vcombine.low %v8069_v63, %v8076_v4  ;;  %v8105_v58 = vsel %vm6833_vm7, %v4450_v18, %v4451_v51  ;;  %v4372_v6 = vsel %vm6833_vm7, %v5454_v28, %v4371_v49  ;;  %v4458_v49 = vrot.slane %v7979_v21, 5  ;;  %v6335_v51 = vld [vmem:[%s6581_s11 + $0x90] sm:$0xff]   ;;  %v6336_v21 = vld [vmem:[%s6581_s11 + $0x9c] sm:$0xff]  }
 0x135   : > { %v5482_v50 = vcombine.low %v8100_v16, %v8105_v58  ;;  %v2243_v23 = vrot.slane %v2241_v19, 4  ;;  %v2246_v25 = vrot.slane %v2244_v41, 5  ;;  %v4457_v7 = vrot.slane %v4455_v24, 4 }
 0x136   : > { %5929 = vmatmul.mubr.msk.bf16.gmra.mrb[28].mxu0 %vm675_vm3, %v5418_v46  ;;  %v5469_v46 = vcombine.low %v4358_v35, %v4361_v34  ;;  %v2250_v35 = vshll.u32 %v6383_v39, 16  ;;  %v2254_v34 = vshrl.u32 %v6383_v39, 16 }
 0x137   : > { %5777 = vmatmul.mubr.msk.bf16.gmra.mrb[12].mxu1 %vm675_vm3, %v6331_v12  ;;  %5934 = vmatprep.mubr.msk.bf16.mxu0 %vm675_vm3, %v5468_v17  ;;  %v4374_v12 = vrot.slane %v8472_v29, 5  ;;  %v5450_v17 = vld [vmem:[%s6581_s11 + $0xcc] sm:$0xe]  ;;  %v8127_v55 = vsel %vm6833_vm7, %v4457_v7, %v4458_v49 }
 0x138   : > { %5780 = vmatprep.mubr.msk.bf16.mxu1 %vm675_vm3, %v6332_v11  ;;  %v6334_v11 = vld [vmem:[%s6581_s11 + $0x84] sm:$0xff]   ;;  %v5466_v52 = vrot.slane %v5450_v17, 9  ;;  %v2256_v28 = vrot.slane %v2254_v34, 4  ;;  %v6384_v17 = vld [vmem:[%s6581_s11 + $0x74] sm:$0x1] }
 0x139   : > { %v4375_v2 = vsel %vm6833_vm7, %v4373_v47, %v4374_v12  ;;  %v5173_v47 = vld [vmem:[%s6581_s11 + $0x84] sm:$0xf]  ;;  %v2247_v12 = vor.u32 %v2246_v25, %v2243_v23  ;;  %v6338_v34 = vld [vmem:[%s6581_s11 + $0xb4] sm:$0xff]  }
 0x13a   : > { %v8122_v5 = vsel %vm6833_vm7, %v5466_v52, %v4455_v24  ;;  %v5471_v61 = vcombine.low %v4372_v6, %v4375_v2  ;;  %v2292_v18 = vshll.u32 %v5173_v47, 16  ;;  %v5176_v6 = vld [vmem:[%s6581_s11 + $0x90] sm:$0xf]  ;;  %v6337_v2 = vld [vmem:[%s6581_s11 + $0xa8] sm:$0xff]  }
 0x13b   : > { %v5483_v29 = vcombine.low %v8122_v5, %v8127_v55  ;;  %v2248_v52 = vrot.slane %v2247_v12, 4  ;;  %v2313_v23 = vshrl.u32 %v5176_v6, 16  ;;  %v2316_v25 = vshll.u32 %v5176_v6, 16 }
 0x13c   : > { %v2346_v12 = vshll.u32 %v6387_v60, 16 }
 0x13d   : > { %v2318_v14 = vrot.slane %v2316_v25, 5  ;;  %v6390_v25 = vld [vmem:[%s6581_s11 + $0xa4] sm:$0x1] }
 0x13e   : > { %5935 = vmatmul.mubr.msk.bf16.vlgmr.msra.gmra.mrb[0].mxu0 %vm675_vm3, %v5469_v46  ;;  %v2252_v46 = vrot.slane %v2250_v35, 5  ;;  %v5179_v35 = vld [vmem:[%s6581_s11 + $0x9c] sm:$0xf]  ;;  %v8169_v6 = vrot.slane %v2346_v12, 5 }
 0x13f   : > { %5781 = vmatmul.mubr.msk.bf16.gmra.mrb[16].mxu1 %vm675_vm3, %v6333_v30  ;;  %5938 = vmatprep.mubr.msk.bf16.mxu0 %vm675_vm3, %v5470_v9  ;;  %v2260_v30 = vshll.u32 %v6384_v17, 16  ;;  %v2289_v9 = vshrl.u32 %v5173_v47, 16  ;;  %v2340_v47 = vshll.u32 %v5179_v35, 16  ;;  %v6388_v17 = vld [vmem:[%s6581_s11 + $0x8c] sm:$0x1] }
 0x140   : > { %5784 = vmatprep.mubr.msk.bf16.mxu1 %vm675_vm3, %v6334_v11  ;;  %v2257_v13 = vor.u32 %v2256_v28, %v2252_v46  ;;  %v6385_v11 = vld [vmem:[%s6581_s11 + $0x88] sm:$0xf]  ;;  %v2253_v7 = vsel %vm6607_vm4, %v2248_v52, %v2252_v46 }
 0x141   : > { %v2298_v19 = vshll.u32 %v6385_v11, 16  ;;  %v2302_v41 = vshrl.u32 %v6385_v11, 16  ;;  %v2262_v0 = vrot.slane %v2260_v30, 5  ;;  %v2291_v36 = vrot.slane %v2289_v9, 4 }
 0x142   : > { %v2258_v39 = vrot.slane %v2257_v13, 4  ;;  %v2308_v30 = vshll.u32 %v6388_v17, 16  ;;  %v2315_v9 = vrot.slane %v2313_v23, 4  ;;  %v2342_v11 = vrot.slane %v2340_v47, 5 }
 0x143   : > { %v8146_v24 = vrot.slane %v2298_v19, 5  ;;  %v2304_v49 = vrot.slane %v2302_v41, 4  ;;  %v6339_v19 = vld [vmem:[%s6581_s11 + $0xc0] sm:$0xff]  }
 0x144   : > { %v2263_v46 = vsel %vm6607_vm4, %v2258_v39, %v2262_v0  ;;  %v5182_v39 = vld [vmem:[%s6581_s11 + $0xa8] sm:$0xf] }
 0x145   : > { %v2305_v13 = vor.u32 %v2304_v49, %v8146_v24  ;;  %v5200_v41 = vcombine.low %v2253_v7, %v2263_v46  ;;  %v2356_v7 = vshll.u32 %v6390_v25, 16  ;;  %v2364_v45 = vshll.u32 %v5182_v39, 16 }
 0x146   : > { %5939 = vmatmul.mubr.msk.bf16.gmra.mrb[4].mxu0 %vm675_vm3, %v5471_v61  ;;  %v6386_v61 = vld [vmem:[%s6581_s11 + $0x94] sm:$0xf] }
 0x147   : > { %5785 = vmatmul.mubr.msk.bf16.gmra.mrb[20].mxu1 %vm675_vm3, %v6335_v51  ;;  %5942 = vmatprep.mubr.msk.bf16.mxu0 %vm675_vm3, %v5472_v10  ;;  %v2294_v10 = vrot.slane %v2292_v18, 5  ;;  %v2322_v51 = vshll.u32 %v6386_v61, 16  ;;  %v2326_v28 = vshrl.u32 %v6386_v61, 16  ;;  %v2306_v0 = vrot.slane %v2305_v13, 4 }
 0x148   : > { %5788 = vmatprep.mubr.msk.bf16.mxu1 %vm675_vm3, %v6336_v21  ;;  %v2337_v21 = vshrl.u32 %v5179_v35, 16  ;;  %v6389_v35 = vld [vmem:[%s6581_s11 + $0x98] sm:$0x1]  ;;  %v2361_v61 = vshrl.u32 %v5182_v39, 16  ;;  %v5188_v39 = vld [vmem:[%s6581_s11 + $0xc0] sm:$0xf] }
 0x149   : > { %v2295_v15 = vor.u32 %v2294_v10, %v2291_v36  ;;  %v8166_v26 = vrot.slane %v2322_v51, 5  ;;  %v2310_v36 = vrot.slane %v2308_v30, 5  ;;  %v2319_v10 = vor.u32 %v2318_v14, %v2315_v9  ;;  %v5185_v51 = vld [vmem:[%s6581_s11 + $0xb4] sm:$0xf] }
 0x14a   : > { %v2339_v18 = vrot.slane %v2337_v21, 4  ;;  %v2374_v21 = vshrl.u32 %v6391_v27, 16  ;;  %v2385_v20 = vshrl.u32 %v5185_v51, 16  ;;  %v2388_v42 = vshll.u32 %v5185_v51, 16 }
 0x14b   : > { %v2296_v52 = vrot.slane %v2295_v15, 4  ;;  %v2311_v46 = vsel %vm6607_vm4, %v2306_v0, %v2310_v36  ;;  %v2320_v15 = vrot.slane %v2319_v10, 4  ;;  %v2358_v30 = vrot.slane %v2356_v7, 5 }
 0x14c   : > { %v2343_v23 = vor.u32 %v2342_v11, %v2339_v18  ;;  %v2363_v9 = vrot.slane %v2361_v61, 4  ;;  %v2376_v11 = vrot.slane %v2374_v21, 4  ;;  %v6395_v61 = vld [vmem:[%s6581_s11 + $0xbc] sm:$0x1] }
 0x14d   : > { %v2301_v47 = vsel %vm6607_vm4, %v2296_v52, %v8146_v24  ;;  %v2325_v0 = vsel %vm6607_vm4, %v2320_v15, %v8166_v26  ;;  %v2404_v22 = vshll.u32 %v6395_v61, 16 }
 0x14e   : > { %5943 = vmatmul.mubr.msk.bf16.gmra.mrb[8].mxu0 %vm675_vm3, %v5473_v40  ;;  %v2350_v40 = vshrl.u32 %v6387_v60, 16  ;;  %v2344_v17 = vrot.slane %v2343_v23, 4  ;;  %v5202_v24 = vcombine.low %v2301_v47, %v2311_v46 }
 0x14f   : > { %5789 = vmatmul.mubr.msk.bf16.gmra.mrb[24].mxu1 %vm675_vm3, %v6337_v2  ;;  %5946 = vmatprep.mubr.msk.bf16.mxu0 %vm675_vm3, %v5474_v54  ;;  %v2328_v54 = vrot.slane %v2326_v28, 4 }
 0x150   : > { %5792 = vmatprep.mubr.msk.bf16.mxu1 %vm675_vm3, %v6338_v34  ;;  %v2352_v2 = vrot.slane %v2350_v40, 4  ;;  %v2332_v34 = vshll.u32 %v6389_v35, 16  ;;  %v2349_v10 = vsel %vm6607_vm4, %v2344_v17, %v8169_v6  ;;  %v2430_v17 = vrot.slane %v2428_v57, 5 }
 0x151   : > { %v2329_v49 = vor.u32 %v2328_v54, %v8166_v26  ;;  %v2366_v54 = vrot.slane %v2364_v45, 5  ;;  %v6393_v26 = vld [vmem:[%s6581_s11 + $0xb0] sm:$0x1] }
 0x152   : > { %v2353_v28 = vor.u32 %v2352_v2, %v8169_v6  ;;  %v2334_v60 = vrot.slane %v2332_v34, 5  ;;  %v2380_v35 = vshll.u32 %v6393_v26, 16  ;;  %v2409_v34 = vshrl.u32 %v5188_v39, 16 }
 0x153   : > { %v2330_v13 = vrot.slane %v2329_v49, 4  ;;  %v2367_v38 = vor.u32 %v2366_v54, %v2363_v9  ;;  %v2412_v6 = vshll.u32 %v5188_v39, 16  ;;  %v6394_v49 = vld [vmem:[%s6581_s11 + $0xc4] sm:$0xf] }
 0x154   : > { %v2354_v14 = vrot.slane %v2353_v28, 4  ;;  %v2418_v23 = vshll.u32 %v6394_v49, 16  ;;  %v2422_v25 = vshrl.u32 %v6394_v49, 16  ;;  %v2382_v45 = vrot.slane %v2380_v35, 5 }
 0x155   : > { %v2335_v36 = vsel %vm6607_vm4, %v2330_v13, %v2334_v60  ;;  %v2368_v51 = vrot.slane %v2367_v38, 4  ;;  %v2406_v60 = vrot.slane %v2404_v22, 5 }
 0x156   : > { %5947 = vmatmul.mubr.msk.bf16.gmra.mrb[12].mxu0 %vm675_vm3, %v5475_v53  ;;  %v2370_v53 = vshll.u32 %v6391_v27, 16  ;;  %v2359_v59 = vsel %vm6607_vm4, %v2354_v14, %v2358_v30  ;;  %v5203_v44 = vcombine.low %v2325_v0, %v2335_v36  ;;  %v2411_v27 = vrot.slane %v2409_v34, 4 }
 0x157   : > { %5793 = vmatmul.mubr.msk.bf16.gmra.mrb[28].mxu1 %vm675_vm3, %v6339_v19  ;;  %5950 = vmatprep.mubr.msk.bf16.mxu0 %vm675_vm3, %v5476_v33  ;;  %v6392_v33 = vld [vmem:[%s6581_s11 + $0xb8] sm:$0xf]  ;;  %v2387_v19 = vrot.slane %v2385_v20, 4  ;;  %v2420_v21 = vrot.slane %v2418_v23, 5  ;;  %v2424_v47 = vrot.slane %v2422_v25, 4 }
 0x158   : > { %5814 = vmatprep.mubr.msk.bf16.mxu1 %vm675_vm3, %v5200_v41  ;;  %v2394_v12 = vshll.u32 %v6392_v33, 16  ;;  %v2398_v40 = vshrl.u32 %v6392_v33, 16  ;;  %v2372_v18 = vrot.slane %v2370_v53, 5  ;;  %v2390_v41 = vrot.slane %v2388_v42, 5 }
 0x159   : > { %v2414_v53 = vrot.slane %v2412_v6, 5 }
 0x15a   : > { %v2396_v52 = vrot.slane %v2394_v12, 5  ;;  %v2400_v2 = vrot.slane %v2398_v40, 4  ;;  %v2373_v20 = vsel %vm6607_vm4, %v2368_v51, %v2372_v18  ;;  %v2425_v12 = vor.u32 %v2424_v47, %v2420_v21 }
 0x15b   : > { %v2415_v33 = vor.u32 %v2414_v53, %v2411_v27 }
 0x15c   : > { %v2401_v7 = vor.u32 %v2400_v2, %v2396_v52  ;;  %v2426_v13 = vrot.slane %v2425_v12, 4  ;;  %v8269_v2 = vld [vmem:[%s8402_s2] ss:$0 sm:$0xff] }
 0x15d   : > { %v2416_v40 = vrot.slane %v2415_v33, 4 }
 0x15e   : > { %5951 = vmatmul.mubr.msk.bf16.gmra.mrb[16].mxu0 %vm675_vm3, %v5477_v37  ;;  %v2377_v37 = vor.u32 %v2376_v11, %v2372_v18  ;;  %v2402_v15 = vrot.slane %v2401_v7, 4  ;;  %v2431_v9 = vsel %vm6607_vm4, %v2426_v13, %v2430_v17 }
 0x15f   : > { %5815 = vmatmul.mubr.msk.bf16.vlgmr.msra.gmra.mrb[16].mxu1 %vm675_vm3, %v7975_v1  ;;  %5954 = vmatprep.mubr.msk.bf16.mxu0 %vm675_vm3, %v5478_v3  ;;  %v2391_v1 = vor.u32 %v2390_v41, %v2387_v19  ;;  %v5204_v3 = vcombine.low %v2349_v10, %v2359_v59  ;;  %v2421_v30 = vsel %vm6607_vm4, %v2416_v40, %v2420_v21 }
 0x160   : > { %5818 = vmatprep.mubr.msk.bf16.mxu1 %vm675_vm3, %v5202_v24  ;;  %v2378_v28 = vrot.slane %v2377_v37, 4  ;;  %v2407_v48 = vsel %vm6607_vm4, %v2402_v15, %v2406_v60  ;;  %v5207_v14 = vcombine.low %v2421_v30, %v2431_v9 }
 0x161   : > { %v2392_v46 = vrot.slane %v2391_v1, 4 }
 0x162   : > { %v2383_v42 = vsel %vm6607_vm4, %v2378_v28, %v2382_v45 }
 0x163   : > { %v5205_v62 = vcombine.low %v2373_v20, %v2383_v42 }
 0x166   : > { %5955 = vmatmul.mubr.msk.bf16.gmra.mrb[20].mxu0 %vm675_vm3, %v5479_v8  ;;  %v2397_v8 = vsel %vm6607_vm4, %v2392_v46, %v2396_v52 }
 0x167   : > { %5819 = vmatmul.mubr.msk.bf16.gmra.mrb[20].mxu1 %vm675_vm3, %v5203_v44  ;;  %5958 = vmatprep.mubr.msk.bf16.mxu0 %vm675_vm3, %v5480_v56  ;;  %v5206_v56 = vcombine.low %v2397_v8, %v2407_v48 }
 0x168   : > { %5822 = vmatprep.mubr.msk.bf16.mxu1 %vm675_vm3, %v5204_v3 }
 0x16e   : > { %5959 = vmatmul.mubr.msk.bf16.gmra.mrb[24].mxu0 %vm675_vm3, %v5481_v43 }
 0x16f   : > { %5823 = vmatmul.mubr.msk.bf16.gmra.mrb[24].mxu1 %vm675_vm3, %v5205_v62  ;;  %5962 = vmatprep.mubr.msk.bf16.mxu0 %vm675_vm3, %v5482_v50 }
 0x170   : > { %5826 = vmatprep.mubr.msk.bf16.mxu1 %vm675_vm3, %v5206_v56 }
 0x176   : > { %5963 = vmatmul.mubr.msk.bf16.gmra.mrb[28].mxu0 %vm675_vm3, %v5483_v29 }
 0x177   : > { %5827 = vmatmul.mubr.msk.bf16.gmra.mrb[28].mxu1 %vm675_vm3, %v5207_v14 }
 0x1f2   : > { %v5766_v63 = vpop.f32.mrb[0].mxu1 }
 0x1f3   : > { %v1841_v4 = vpop.f32.mrb[1].mxu1 }
 0x1f4   : > { %v5767_v43 = vpop.f32.mrb[2].mxu1 }
 0x1f5   : > { %v1844_v16 = vpop.f32.mrb[3].mxu1 }
 0x1fa   : > { %v5770_v58 = vpop.f32.mrb[4].mxu1 }
 0x1fb   : > { %v1857_v50 = vpop.f32.mrb[5].mxu1 }
 0x1fc   : > { %v5771_v54 = vpop.f32.mrb[6].mxu1 }
 0x1fd   : > { %v1860_v18 = vpop.f32.mrb[7].mxu1 }
 0x202   : > { %v5774_v32 = vpop.f32.mrb[8].mxu1 }
 0x203   : > { %v1873_v11 = vpop.f32.mrb[9].mxu1 }
 0x204   : > { %v5775_v24 = vpop.f32.mrb[10].mxu1 }
 0x205   : > { %v1876_v19 = vpop.f32.mrb[11].mxu1 }
 0x20a   : > { %v8257_v41 = vpop.f32.mrb[12].mxu1 }
 0x20b   : > { %v8259_v5 = vpop.f32.mrb[13].mxu1 }
 0x20c   : > { %v8261_v55 = vpop.f32.mrb[14].mxu1 }
 0x20d   : > { %v8263_v29 = vpop.f32.mrb[15].mxu1 }
 0x211   : > { %v5936_v52 = vpop.f32.mrb[0].mxu0 }
 0x212   : > { %v5968_v39 = vadd.f32 %v5936_v52, %v5766_v63  ;;  %v4595_v0 = vpop.f32.mrb[1].mxu0 }
 0x213   : > { %v5969_v36 = vadd.f32 %v4595_v0, %v1841_v4  ;;  %v5937_v10 = vpop.f32.mrb[2].mxu0 }
 0x214   : > { %v4763_v59 = vadd.f32 %v5968_v39, %v8269_v2  ;;  %v5970_v38 = vadd.f32 %v5937_v10, %v5767_v43  ;;  %v4598_v37 = vpop.f32.mrb[3].mxu0 }
 0x215   : > { %v4761_v26 = vadd.f32 %v5969_v36, %v8269_v2  ;;  %v5971_v35 = vadd.f32 %v4598_v37, %v1844_v16 }
 0x216   : > { %v4795_v34 = vmax.f32 %v4763_v59, 0.0  ;;  %v4764_v6 = vadd.f32 %v5970_v38, %v8269_v2 }
 0x217   : > { %v4793_v49 = vmax.f32 %v4761_v26, 0.0  ;;  %v4762_v23 = vadd.f32 %v5971_v35, %v8269_v2 }
 0x218   : > { %4827 = vst [vmem:[%s8277_s19 + $0x10] sm:$0xff] %v4795_v34  ;;  %v4796_v25 = vmax.f32 %v4764_v6, 0.0 }
 0x219   : > { %4825 = vst [vmem:[%s8277_s19] sm:$0xff] %v4793_v49  ;;  %v4794_v1 = vmax.f32 %v4762_v23, 0.0  ;;  %v5940_v7 = vpop.f32.mrb[4].mxu0 }
 0x21a   : > { %4828 = vst [vmem:[%s8277_s19 + $0x18] sm:$0xff] %v4796_v25  ;;  %v5972_v61 = vadd.f32 %v5940_v7, %v5770_v58  ;;  %v4611_v22 = vpop.f32.mrb[5].mxu0 }
 0x21b   : > { %4826 = vst [vmem:[%s8277_s19 + $0x8] sm:$0xff] %v4794_v1  ;;  %v5973_v44 = vadd.f32 %v4611_v22, %v1857_v50  ;;  %v5941_v3 = vpop.f32.mrb[6].mxu0 }
 0x21c   : > { %v4767_v51 = vadd.f32 %v5972_v61, %v8269_v2  ;;  %v5974_v28 = vadd.f32 %v5941_v3, %v5771_v54  ;;  %v4614_v45 = vpop.f32.mrb[7].mxu0 }
 0x21d   : > { %v4765_v27 = vadd.f32 %v5973_v44, %v8269_v2  ;;  %v5975_v53 = vadd.f32 %v4614_v45, %v1860_v18 }
 0x21e   : > { %v4799_v21 = vmax.f32 %v4767_v51, 0.0  ;;  %v4768_v47 = vadd.f32 %v5974_v28, %v8269_v2 }
 0x21f   : > { %v4797_v46 = vmax.f32 %v4765_v27, 0.0  ;;  %v4766_v15 = vadd.f32 %v5975_v53, %v8269_v2 }
 0x220   : > { %4831 = vst [vmem:[%s8277_s19 + $0x30] sm:$0xff] %v4799_v21  ;;  %v4800_v60 = vmax.f32 %v4768_v47, 0.0 }
 0x221   : > { %4829 = vst [vmem:[%s8277_s19 + $0x20] sm:$0xff] %v4797_v46  ;;  %v4798_v20 = vmax.f32 %v4766_v15, 0.0  ;;  %v5944_v42 = vpop.f32.mrb[8].mxu0 }
 0x222   : > { %4832 = vst [vmem:[%s8277_s19 + $0x38] sm:$0xff] %v4800_v60  ;;  %v5976_v33 = vadd.f32 %v5944_v42, %v5774_v32  ;;  %v4627_v12 = vpop.f32.mrb[9].mxu0 }
 0x223   : > { %4830 = vst [vmem:[%s8277_s19 + $0x28] sm:$0xff] %v4798_v20  ;;  %v5977_v31 = vadd.f32 %v4627_v12, %v1873_v11  ;;  %v5945_v57 = vpop.f32.mrb[10].mxu0 }
 0x224   : > { %v4771_v8 = vadd.f32 %v5976_v33, %v8269_v2  ;;  %v5978_v48 = vadd.f32 %v5945_v57, %v5775_v24  ;;  %v4630_v62 = vpop.f32.mrb[11].mxu0 }
 0x225   : > { %v4769_v56 = vadd.f32 %v5977_v31, %v8269_v2  ;;  %v5979_v40 = vadd.f32 %v4630_v62, %v1876_v19 }
 0x226   : > { %v4803_v13 = vmax.f32 %v4771_v8, 0.0  ;;  %v4772_v17 = vadd.f32 %v5978_v48, %v8269_v2 }
 0x227   : > { %v4801_v30 = vmax.f32 %v4769_v56, 0.0  ;;  %v4770_v9 = vadd.f32 %v5979_v40, %v8269_v2 }
 0x228   : > { %4835 = vst [vmem:[%s8277_s19 + $0x50] sm:$0xff] %v4803_v13  ;;  %v4804_v14 = vmax.f32 %v4772_v17, 0.0 }
 0x229   : > { %4833 = vst [vmem:[%s8277_s19 + $0x40] sm:$0xff] %v4801_v30  ;;  %v4802_v63 = vmax.f32 %v4770_v9, 0.0  ;;  %v5948_v4 = vpop.f32.mrb[12].mxu0 }
 0x22a   : > { %4836 = vst [vmem:[%s8277_s19 + $0x58] sm:$0xff] %v4804_v14  ;;  %v5980_v43 = vadd.f32 %v5948_v4, %v8257_v41  ;;  %v4643_v16 = vpop.f32.mrb[13].mxu0 }
 0x22b   : > { %4834 = vst [vmem:[%s8277_s19 + $0x48] sm:$0xff] %v4802_v63  ;;  %v5981_v58 = vadd.f32 %v4643_v16, %v8259_v5  ;;  %v5949_v50 = vpop.f32.mrb[14].mxu0 }
 0x22c   : > { %v4775_v54 = vadd.f32 %v5980_v43, %v8269_v2  ;;  %v5982_v18 = vadd.f32 %v5949_v50, %v8261_v55  ;;  %v4646_v32 = vpop.f32.mrb[15].mxu0 }
 0x22d   : > { %v4773_v11 = vadd.f32 %v5981_v58, %v8269_v2  ;;  %v5983_v24 = vadd.f32 %v4646_v32, %v8263_v29 }
 0x22e   : > { %v4807_v19 = vmax.f32 %v4775_v54, 0.0  ;;  %v4776_v41 = vadd.f32 %v5982_v18, %v8269_v2 }
 0x22f   : > { %v4805_v52 = vmax.f32 %v4773_v11, 0.0  ;;  %v4774_v39 = vadd.f32 %v5983_v24, %v8269_v2 }
 0x230   : > { %4839 = vst [vmem:[%s8277_s19 + $0x70] sm:$0xff] %v4807_v19  ;;  %v4808_v5 = vmax.f32 %v4776_v41, 0.0 }
 0x231   : > { %4837 = vst [vmem:[%s8277_s19 + $0x60] sm:$0xff] %v4805_v52  ;;  %v4806_v0 = vmax.f32 %v4774_v39, 0.0  ;;  %v5952_v36 = vpop.f32.mrb[16].mxu0 }
 0x232   : > { %4840 = vst [vmem:[%s8277_s19 + $0x78] sm:$0xff] %v4808_v5  ;;  %v5816_v10 = vpop.f32.mrb[16].mxu1  ;;  %v4659_v55 = vpop.f32.mrb[17].mxu0 }
 0x233   : > { %4838 = vst [vmem:[%s8277_s19 + $0x68] sm:$0xff] %v4806_v0  ;;  %v5984_v59 = vadd.f32 %v5952_v36, %v5816_v10  ;;  %v2631_v38 = vpop.f32.mrb[17].mxu1  ;;  %v5953_v37 = vpop.f32.mrb[18].mxu0 }
 0x234   : > { %v5985_v29 = vadd.f32 %v4659_v55, %v2631_v38  ;;  %v5817_v26 = vpop.f32.mrb[18].mxu1  ;;  %v4662_v35 = vpop.f32.mrb[19].mxu0 }
 0x235   : > { %v4779_v34 = vadd.f32 %v5984_v59, %v8269_v2  ;;  %v5986_v6 = vadd.f32 %v5953_v37, %v5817_v26  ;;  %v2634_v49 = vpop.f32.mrb[19].mxu1 }
 0x236   : > { %v4777_v23 = vadd.f32 %v5985_v29, %v8269_v2  ;;  %v5987_v25 = vadd.f32 %v4662_v35, %v2634_v49 }
 0x237   : > { %v4811_v1 = vmax.f32 %v4779_v34, 0.0  ;;  %v4780_v7 = vadd.f32 %v5986_v6, %v8269_v2 }
 0x238   : > { %v4809_v61 = vmax.f32 %v4777_v23, 0.0  ;;  %v4778_v22 = vadd.f32 %v5987_v25, %v8269_v2 }
 0x239   : > { %4843 = vst [vmem:[%s8277_s19 + $0x90] sm:$0xff] %v4811_v1  ;;  %v4812_v44 = vmax.f32 %v4780_v7, 0.0  ;;  %v5956_v3 = vpop.f32.mrb[20].mxu0 }
 0x23a   : > { %4841 = vst [vmem:[%s8277_s19 + $0x80] sm:$0xff] %v4809_v61  ;;  %v4810_v51 = vmax.f32 %v4778_v22, 0.0  ;;  %v5820_v28 = vpop.f32.mrb[20].mxu1  ;;  %v4675_v45 = vpop.f32.mrb[21].mxu0 }
 0x23b   : > { %4844 = vst [vmem:[%s8277_s19 + $0x98] sm:$0xff] %v4812_v44  ;;  %v5988_v27 = vadd.f32 %v5956_v3, %v5820_v28  ;;  %v2647_v53 = vpop.f32.mrb[21].mxu1  ;;  %v5957_v21 = vpop.f32.mrb[22].mxu0 }
 0x23c   : > { %4842 = vst [vmem:[%s8277_s19 + $0x88] sm:$0xff] %v4810_v51  ;;  %v5989_v47 = vadd.f32 %v4675_v45, %v2647_v53  ;;  %v5821_v46 = vpop.f32.mrb[22].mxu1  ;;  %v4678_v15 = vpop.f32.mrb[23].mxu0 }
 0x23d   : > { %v4783_v60 = vadd.f32 %v5988_v27, %v8269_v2  ;;  %v5990_v20 = vadd.f32 %v5957_v21, %v5821_v46  ;;  %v2650_v42 = vpop.f32.mrb[23].mxu1 }
 0x23e   : > { %v4781_v33 = vadd.f32 %v5989_v47, %v8269_v2  ;;  %v5991_v12 = vadd.f32 %v4678_v15, %v2650_v42 }
 0x23f   : > { %v4815_v31 = vmax.f32 %v4783_v60, 0.0  ;;  %v4784_v57 = vadd.f32 %v5990_v20, %v8269_v2 }
 0x240   : > { %v4813_v8 = vmax.f32 %v4781_v33, 0.0  ;;  %v4782_v48 = vadd.f32 %v5991_v12, %v8269_v2 }
 0x241   : > { %4847 = vst [vmem:[%s8277_s19 + $0xb0] sm:$0xff] %v4815_v31  ;;  %v4816_v62 = vmax.f32 %v4784_v57, 0.0  ;;  %v5960_v56 = vpop.f32.mrb[24].mxu0 }
 0x242   : > { %4845 = vst [vmem:[%s8277_s19 + $0xa0] sm:$0xff] %v4813_v8  ;;  %v4814_v40 = vmax.f32 %v4782_v48, 0.0  ;;  %v5824_v13 = vpop.f32.mrb[24].mxu1  ;;  %v4691_v17 = vpop.f32.mrb[25].mxu0 }
 0x243   : > { %4848 = vst [vmem:[%s8277_s19 + $0xb8] sm:$0xff] %v4816_v62  ;;  %v5992_v30 = vadd.f32 %v5960_v56, %v5824_v13  ;;  %v2663_v9 = vpop.f32.mrb[25].mxu1  ;;  %v5961_v14 = vpop.f32.mrb[26].mxu0 }
 0x244   : > { %4846 = vst [vmem:[%s8277_s19 + $0xa8] sm:$0xff] %v4814_v40  ;;  %v5993_v63 = vadd.f32 %v4691_v17, %v2663_v9  ;;  %v5825_v4 = vpop.f32.mrb[26].mxu1  ;;  %v4694_v43 = vpop.f32.mrb[27].mxu0 }
 0x245   : > { %v4787_v16 = vadd.f32 %v5992_v30, %v8269_v2  ;;  %v5994_v58 = vadd.f32 %v5961_v14, %v5825_v4  ;;  %v2666_v50 = vpop.f32.mrb[27].mxu1 }
 0x246   : > { %v4785_v54 = vadd.f32 %v5993_v63, %v8269_v2  ;;  %v5995_v18 = vadd.f32 %v4694_v43, %v2666_v50 }
 0x247   : > { %v4819_v32 = vmax.f32 %v4787_v16, 0.0  ;;  %v4788_v11 = vadd.f32 %v5994_v58, %v8269_v2 }
 0x248   : > { %v4817_v24 = vmax.f32 %v4785_v54, 0.0  ;;  %v4786_v19 = vadd.f32 %v5995_v18, %v8269_v2 }
 0x249   : > { %4851 = vst [vmem:[%s8277_s19 + $0xd0] sm:$0xff] %v4819_v32  ;;  %v4820_v41 = vmax.f32 %v4788_v11, 0.0  ;;  %v5964_v52 = vpop.f32.mrb[28].mxu0 }
 0x24a   : > { %4849 = vst [vmem:[%s8277_s19 + $0xc0] sm:$0xff] %v4817_v24  ;;  %v4818_v39 = vmax.f32 %v4786_v19, 0.0  ;;  %v5828_v5 = vpop.f32.mrb[28].mxu1  ;;  %v4707_v0 = vpop.f32.mrb[29].mxu0 }
 0x24b   : > { %4852 = vst [vmem:[%s8277_s19 + $0xd8] sm:$0xff] %v4820_v41  ;;  %v5996_v36 = vadd.f32 %v5964_v52, %v5828_v5  ;;  %v2679_v10 = vpop.f32.mrb[29].mxu1  ;;  %v5965_v55 = vpop.f32.mrb[30].mxu0 }
 0x24c   : > { %4850 = vst [vmem:[%s8277_s19 + $0xc8] sm:$0xff] %v4818_v39  ;;  %v5997_v59 = vadd.f32 %v4707_v0, %v2679_v10  ;;  %v5829_v38 = vpop.f32.mrb[30].mxu1  ;;  %v4710_v37 = vpop.f32.mrb[31].mxu0 }
 0x24d   : > { %v4791_v29 = vadd.f32 %v5996_v36, %v8269_v2  ;;  %v5998_v26 = vadd.f32 %v5965_v55, %v5829_v38  ;;  %v2682_v35 = vpop.f32.mrb[31].mxu1 }
 0x24e   : > { %v4789_v34 = vadd.f32 %v5997_v59, %v8269_v2  ;;  %v5999_v6 = vadd.f32 %v4710_v37, %v2682_v35 }
 0x24f   : > { %v4823_v49 = vmax.f32 %v4791_v29, 0.0  ;;  %v4792_v23 = vadd.f32 %v5998_v26, %v8269_v2 }
 0x250   : > { %v4821_v25 = vmax.f32 %v4789_v34, 0.0  ;;  %v4790_v1 = vadd.f32 %v5999_v6, %v8269_v2 }
 0x251   : > { %4855 = vst [vmem:[%s8277_s19 + $0xf0] sm:$0xff] %v4823_v49  ;;  %v4824_v7 = vmax.f32 %v4792_v23, 0.0 }
 0x252   : > { %4853 = vst [vmem:[%s8277_s19 + $0xe0] sm:$0xff] %v4821_v25  ;;  %v4822_v61 = vmax.f32 %v4790_v1, 0.0 }
 0x253   : > { %4856 = vst [vmem:[%s8277_s19 + $0xf8] sm:$0xff] %v4824_v7 }
 0x254   : > { %4854 = vst [vmem:[%s8277_s19 + $0xe8] sm:$0xff] %v4822_v61 }
 0x255   : > { %6410 = shalt.err (!%p6407_p5)
}
 0x256   : > { %s6411_s6 = scalar_lea.hbm %s8345_s28, 4096  ;;  %s6415_s9 = scalar_lea.hbm %s8403_s3, 8192 }
 0x257   : > { %p6412_p6 = scmp.ne.s32.totalorder %s8345_s28, %s6411_s6  ;;  %p6416_p10 = scmp.lt.u32.totalorder %s8345_s28, %s8403_s3 }
 0x258   : > { %p6417_p11 = scmp.lt.u32.totalorder %s6415_s9, %s6411_s6  ;;  %p6419_p13 = scmp.lt.u32.totalorder %s6411_s6, %s8345_s28 }
 0x259   : > { %p6413_p7 = pnand %p6412_p6, %p6540_p4 }
 0x25a   : > { %p6418_p12 = por %p6417_p11, %p6416_p10 }
 0x25b   : > { %p6414_p9 = pneg %p6413_p7 }
 0x25c   : > { %p6420_p0 = por %p6419_p13, %p6418_p12 }
 0x25e   : > { %p6421_p1 = pnand %p6420_p0, %p6414_p9 }
 0x260   : > { %6424 = shalt.err (!%p6421_p1)
}
 0x261   : > { %s6478_s18 = smov 128   ;;  %s6479_s19 = smov 8  }
 0x262   : > { %6235 = dma.vmem_to_hbm [thread:$0]  (%p6540_p4), %s8347_s23, 4096, %s8345_s28, %s8354_s15, %s6478_s18, %s6478_s18, %s6479_s19  }
 0x263 PF: > { %p6241_p2 = scmp.ge.s32.totalorder %s6475_s17, 2  ;;  %s4889_s21 = sand.u32 1, %s6455_s12  }
 0x264   : > { %s4890_s26 = scalar_lea.sflag [#allocation3], %s4889_s21 }
 0x265   : > { %p6238_p3 = pnand %p6241_p2, %p6547_p8 }
 0x267   : > { %6450 = dma.done.wait (!%p6238_p3), %s4890_s26, 4096  }
 0x268   : > { %6452 = vsyncadd (!%p6238_p3), %s4890_s26, 4294963200  ;;  %s16_s17 = sadd.s32 1, %s6475_s17   ;;  %s8473_s12 = smov %s6459_s13 }
 0x269   : > { %p13_p5 = scmp.ge.s32.totalorder %s16_s17, 4   ;;  %s8474_s13 = smov %s6463_s14 }
 0x26a   : > { %s8475_s14 = smov %s6553_s25  ;;  %s8476_s15 = smov %s6471_s16 }
 0x26b   : > { %s8477_s16 = smov %s8479_s20  ;;  %15 = sbr.rel (!%p13_p5) target bundleno = 4 (0x4), region = 78 }
 0x272   :  { %4895 = vsyncpa [#allocation3], 1 }
 0x273   :  { %4897 = vsyncpa [#allocation3 + $0x1], 1 }

</bundles_post_ra>
